<compile_context>
chip_gen: v5e
topology: v5e:2x2
jax: 0.10.0
libtpu: 0.0.40
codegen_flags: <defaults>
</compile_context>

<pallas_src>
import math
import jax
import jax.numpy as jnp
from jax.experimental import pallas as pl
from jax.experimental.pallas import tpu as pltpu

# ---------------- synthetic (small) configuration ----------------
BATCH = 2
N_SUBJECTS = 3
N_CHANNELS = 16          # sEEG channels
SEQ_LEN = 64             # time samples
D_SUBJ = 16              # SubjectBlock output dim
PATCH = 8                # samples per token
TOKEN_LEN = SEQ_LEN // PATCH           # 8
D_TOK_IN = PATCH * D_SUBJ              # 128 (lane-dense)
D_MODEL = 32
N_LAYERS = 2
N_HEADS = 4
D_HEAD = D_MODEL // N_HEADS
D_FF = 64
CODEX_SIZE = 64
D_CODEX = D_MODEL        # TODO(synk): d_codex != d_model in/out projections omitted.
VQ_BETA = 1.0
RGS_LOSS_SCALE = 1.0
VQ_LOSS_SCALE = 1.0

N_TRN_PARAMS = 16        # params per TransformerStack (encoder / decoder)


# ---------------- in-kernel helpers ----------------
def _ln(x, g, b, eps=1e-5):
    mu = jnp.mean(x, axis=-1, keepdims=True)
    var = jnp.mean(jnp.square(x - mu), axis=-1, keepdims=True)
    return (x - mu) * jax.lax.rsqrt(var + eps) * g + b


def _transformer_stack(x, trn_refs):
    # Pre-norm transformer (MHA + GELU FFN). Weights are stored head-major:
    # wq/wk/wv (L,H,D,Dh), wo (L,H,Dh,D) -- a repacking of the module's fused in/out proj.
    (ln1g, ln1b, wq, wk, wv, bq, bk, bv, wo, bo,
     ln2g, ln2b, w1, b1, w2, b2) = trn_refs
    scale = 1.0 / math.sqrt(D_HEAD)
    for l in range(N_LAYERS):
        h = _ln(x, ln1g[l], ln1b[l])
        hb = jnp.broadcast_to(h, (N_HEADS, TOKEN_LEN, D_MODEL))
        q = jnp.einsum("htd,hdk->htk", hb, wq[l],
                       preferred_element_type=jnp.float32) + bq[l]
        k = jnp.einsum("htd,hdk->htk", hb, wk[l],
                       preferred_element_type=jnp.float32) + bk[l]
        v = jnp.einsum("htd,hdk->htk", hb, wv[l],
                       preferred_element_type=jnp.float32) + bv[l]
        s = jnp.einsum("hqd,hkd->hqk", q, k,
                       preferred_element_type=jnp.float32) * scale
        s = s - jnp.max(s, axis=-1, keepdims=True)
        e = jnp.exp(s)
        attn_p = e * pl.reciprocal(jnp.sum(e, axis=-1, keepdims=True), approx=True)
        ctx = jnp.einsum("hqk,hkd->hqd", attn_p, v,
                         preferred_element_type=jnp.float32)
        attn = jnp.sum(jnp.einsum("hqd,hdm->hqm", ctx, wo[l],
                                  preferred_element_type=jnp.float32),
                       axis=0) + bo[l]
        x = x + attn
        f = _ln(x, ln2g[l], ln2b[l])
        f = jnp.dot(f, w1[l], preferred_element_type=jnp.float32) + b1[l]
        # TODO(synk): PyTorch nn.GELU default is exact erf; tanh approximation used here.
        f = jax.nn.gelu(f, approximate=True)
        f = jnp.dot(f, w2[l], preferred_element_type=jnp.float32) + b2[l]
        x = x + f
    return x


# ---------------- fused forward kernel (one batch element per grid step) ----------------
def _duin_vqvae_kernel(sid_ref, *refs):
    del sid_ref  # consumed by the BlockSpec index_maps (per-subject weight gather)
    i = 0
    (x_ref, mask_ref, subj_w_ref, subj_b_ref,
     tok_w_ref, tok_b_ref, pos_ref) = refs[i:i + 7]; i += 7
    enc_refs = refs[i:i + N_TRN_PARAMS]; i += N_TRN_PARAMS
    dec_refs = refs[i:i + N_TRN_PARAMS]; i += N_TRN_PARAMS
    (codex_ref, rgs_w_ref, rgs_b_ref,
     desubj_w_ref, desubj_b_ref) = refs[i:i + 5]; i += 5
    (xrec_ref, num_ref, den_ref, vq_ref) = refs[i:i + 4]

    x_tok = x_ref[0]                                   # (T, PATCH*C) lane-dense input
    pos = pos_ref[...]                                 # (T, D_MODEL) sincos TimeEmbedding

    # SubjectBlock: per-subject channel mixing (block-diagonal kron form, one 128x128 matmul).
    x_h = (jnp.dot(x_tok, subj_w_ref[0], preferred_element_type=jnp.float32)
           + subj_b_ref[...])                          # (T, PATCH*D_SUBJ)
    # PatchTokenizer: patch -> d_model linear + GELU.
    # TODO(synk): exact PatchTokenizer internals approximated as linear+GELU per patch.
    tok = (jnp.dot(x_h, tok_w_ref[...], preferred_element_type=jnp.float32)
           + tok_b_ref[...])
    tok = jax.nn.gelu(tok, approximate=True)           # (T, D_MODEL)
    # encoder = sincos TimeEmbedding + TransformerStack, take output [0].
    enc = _transformer_stack(tok + pos, enc_refs)

    # LaBraM vector quantizer: cosine nearest codeword (first index on ties).
    # TODO(synk): EMA codebook update / k-means init are training-time state, omitted.
    e_n = enc * jax.lax.rsqrt(jnp.sum(enc * enc, axis=-1, keepdims=True) + 1e-12)
    cdx = codex_ref[...]
    c_n = cdx * jax.lax.rsqrt(jnp.sum(cdx * cdx, axis=-1, keepdims=True) + 1e-12)
    sim = jnp.einsum("td,cd->tc", e_n, c_n, preferred_element_type=jnp.float32)
    lane = jax.lax.broadcasted_iota(jnp.int32, sim.shape, 1)
    best = jnp.max(sim, axis=-1, keepdims=True)
    idx = jnp.min(jnp.where(sim >= best, lane, CODEX_SIZE), axis=-1, keepdims=True)
    onehot = (lane == idx).astype(jnp.float32)         # (T, CODEX_SIZE)
    e_vq = jnp.dot(onehot, c_n, preferred_element_type=jnp.float32)   # (T, D_MODEL)
    vq_ref[0] = jnp.sum(jnp.square(e_vq - e_n), keepdims=True)        # per-batch VQ sum

    # decoder = same sincos TimeEmbedding + TransformerStack (separate weights).
    dec = _transformer_stack(e_vq + pos, dec_refs)
    # TimeRGSHead: token -> time-domain subject features.
    # TODO(synk): TimeRGSHead approximated as a single token->patch linear projection.
    y = (jnp.dot(dec, rgs_w_ref[...], preferred_element_type=jnp.float32)
         + rgs_b_ref[...])                             # (T, PATCH*D_SUBJ)
    # de-SubjectBlock: subject features -> channels (block-diagonal per-subject weights).
    x_rec = (jnp.dot(y, desubj_w_ref[0], preferred_element_type=jnp.float32)
             + desubj_b_ref[...])                      # (T, PATCH*C) lane-dense
    xrec_ref[0] = x_rec

    # Masked regression loss partials: per-channel mean over time, channel-mask weighted.
    w = mask_ref[0]                                    # (1, PATCH*C) mask tiled per patch
    sq = jnp.square(x_tok - x_rec)
    num_ref[0] = jnp.sum(sq * w, keepdims=True) * (1.0 / SEQ_LEN)
    den_ref[0] = jnp.sum(w, keepdims=True) * (1.0 / PATCH)


def _rep_spec(arr):
    nd = arr.ndim
    return pl.BlockSpec(arr.shape, lambda b, sid, _nd=nd: (0,) * _nd)


def duin_vqvae_pallas(params, x_tok, subj_id, chmask_tok):
    B = x_tok.shape[0]
    lc = PATCH * N_CHANNELS
    ld = PATCH * D_SUBJ
    enc, dec = params["enc"], params["dec"]

    in_specs = [
        pl.BlockSpec((1, TOKEN_LEN, lc), lambda b, sid: (b, 0, 0)),        # X (patched)
        pl.BlockSpec((1, 1, lc), lambda b, sid: (b, 0, 0)),                # channel mask
        pl.BlockSpec((1, lc, ld), lambda b, sid: (sid[b], 0, 0)),          # subj_w gather
        _rep_spec(params["subj_b_big"]),
        _rep_spec(params["tok_w"]), _rep_spec(params["tok_b"]),
        _rep_spec(params["pos"]),
        *[_rep_spec(a) for a in enc],
        *[_rep_spec(a) for a in dec],
        _rep_spec(params["codex"]), _rep_spec(params["rgs_w"]), _rep_spec(params["rgs_b"]),
        pl.BlockSpec((1, ld, lc), lambda b, sid: (sid[b], 0, 0)),          # desubj_w gather
        _rep_spec(params["desubj_b_big"]),
    ]
    out_shape = (
        jax.ShapeDtypeStruct((B, TOKEN_LEN, lc), jnp.float32),             # X_rec (patched)
        jax.ShapeDtypeStruct((B, 1, 1), jnp.float32),                      # rgs num partial
        jax.ShapeDtypeStruct((B, 1, 1), jnp.float32),                      # rgs den partial
        jax.ShapeDtypeStruct((B, 1, 1), jnp.float32),                      # vq sum partial
    )
    out_specs = (
        pl.BlockSpec((1, TOKEN_LEN, lc), lambda b, sid: (b, 0, 0)),
        pl.BlockSpec((1, 1, 1), lambda b, sid: (b, 0, 0)),
        pl.BlockSpec((1, 1, 1), lambda b, sid: (b, 0, 0)),
        pl.BlockSpec((1, 1, 1), lambda b, sid: (b, 0, 0)),
    )
    return pl.pallas_call(
        _duin_vqvae_kernel,
        out_shape=out_shape,
        grid_spec=pltpu.PrefetchScalarGridSpec(
            num_scalar_prefetch=1,
            grid=(B,),
            in_specs=in_specs,
            out_specs=out_specs,
        ),
        compiler_params=pltpu.CompilerParams(dimension_semantics=("parallel",)),
    )(subj_id, x_tok, chmask_tok,
      params["subj_w_big"], params["subj_b_big"],
      params["tok_w"], params["tok_b"], params["pos"],
      *enc, *dec,
      params["codex"], params["rgs_w"], params["rgs_b"],
      params["desubj_w_big"], params["desubj_b_big"])


# ---------------- jitted forward (mirrors duin_vqvae.forward) ----------------
@jax.jit
def duin_vqvae_forward(params, X, subj_id, channel_mask):
    B = X.shape[0]
    # Layout plumbing only (free inside jit): patched, lane-dense views of X and the mask.
    x_tok = X.reshape(B, TOKEN_LEN, PATCH * N_CHANNELS)
    chmask_tok = jnp.tile(channel_mask, (1, PATCH)).reshape(B, 1, PATCH * N_CHANNELS)

    x_rec_tok, num, den, vq = duin_vqvae_pallas(params, x_tok, subj_id, chmask_tok)

    X_reconstr = x_rec_tok.reshape(B, SEQ_LEN, N_CHANNELS)
    loss_rgs = jnp.sum(num) / (jnp.sum(den) + 1e-12)
    loss_vq = VQ_BETA * jnp.sum(vq) / (B * TOKEN_LEN * D_MODEL)
    loss_total = RGS_LOSS_SCALE * loss_rgs + VQ_LOSS_SCALE * loss_vq
    loss = {"total": loss_total, "vq": loss_vq, "rgs": loss_rgs}
    return X_reconstr, loss


# ---------------- parameters / embeddings ----------------
def sincos_pos_emb(max_len, d_model):
    pos = jnp.arange(max_len, dtype=jnp.float32)[:, None]
    i = jnp.arange(d_model // 2, dtype=jnp.float32)[None, :]
    div = jnp.exp(-math.log(10000.0) * (2.0 * i) / d_model)
    pe = jnp.zeros((max_len, d_model), jnp.float32)
    pe = pe.at[:, 0::2].set(jnp.sin(pos * div))
    pe = pe.at[:, 1::2].set(jnp.cos(pos * div))
    return pe


def _init_transformer(key):
    ks = jax.random.split(key, 6)
    nrm = lambda k, s, sc: jax.random.normal(k, s, jnp.float32) * sc
    return (
        jnp.ones((N_LAYERS, 1, D_MODEL), jnp.float32),                 # ln1 gamma
        jnp.zeros((N_LAYERS, 1, D_MODEL), jnp.float32),                # ln1 beta
        nrm(ks[0], (N_LAYERS, N_HEADS, D_MODEL, D_HEAD), 0.05),        # Wq (head-major)
        nrm(ks[1], (N_LAYERS, N_HEADS, D_MODEL, D_HEAD), 0.05),        # Wk
        nrm(ks[2], (N_LAYERS, N_HEADS, D_MODEL, D_HEAD), 0.05),        # Wv
        jnp.zeros((N_LAYERS, N_HEADS, 1, D_HEAD), jnp.float32),        # bq
        jnp.zeros((N_LAYERS, N_HEADS, 1, D_HEAD), jnp.float32),        # bk
        jnp.zeros((N_LAYERS, N_HEADS, 1, D_HEAD), jnp.float32),        # bv
        nrm(ks[3], (N_LAYERS, N_HEADS, D_HEAD, D_MODEL), 0.05),        # Wo (head-major)
        jnp.zeros((N_LAYERS, 1, D_MODEL), jnp.float32),                # bo
        jnp.ones((N_LAYERS, 1, D_MODEL), jnp.float32),                 # ln2 gamma
        jnp.zeros((N_LAYERS, 1, D_MODEL), jnp.float32),                # ln2 beta
        nrm(ks[4], (N_LAYERS, D_MODEL, D_FF), 0.05),                   # W1
        jnp.zeros((N_LAYERS, 1, D_FF), jnp.float32),                   # b1
        nrm(ks[5], (N_LAYERS, D_FF, D_MODEL), 0.05),                   # W2
        jnp.zeros((N_LAYERS, 1, D_MODEL), jnp.float32),                # b2
    )


def init_params(key):
    ks = jax.random.split(key, 8)
    nrm = lambda k, s, sc: jax.random.normal(k, s, jnp.float32) * sc
    subj_w = nrm(ks[0], (N_SUBJECTS, N_CHANNELS, D_SUBJ), 0.1)
    subj_b = jnp.zeros((1, D_SUBJ), jnp.float32)
    desubj_w = nrm(ks[1], (N_SUBJECTS, D_SUBJ, N_CHANNELS), 0.1)
    desubj_b = jnp.zeros((1, N_CHANNELS), jnp.float32)
    # Repack subject mixing weights into block-diagonal kron(I_patch, W) form ("load time")
    # so the kernel works entirely in a 128-lane dense patched layout.
    eye_p = jnp.eye(PATCH, dtype=jnp.float32)
    subj_w_big = jnp.einsum("pq,scd->spcqd", eye_p, subj_w).reshape(
        N_SUBJECTS, PATCH * N_CHANNELS, PATCH * D_SUBJ)
    desubj_w_big = jnp.einsum("pq,sdc->spdqc", eye_p, desubj_w).reshape(
        N_SUBJECTS, PATCH * D_SUBJ, PATCH * N_CHANNELS)
    return {
        "subj_w_big": subj_w_big,
        "subj_b_big": jnp.tile(subj_b, (1, PATCH)),
        "tok_w": nrm(ks[2], (D_TOK_IN, D_MODEL), 0.05),
        "tok_b": jnp.zeros((1, D_MODEL), jnp.float32),
        "pos": sincos_pos_emb(TOKEN_LEN, D_MODEL),
        "enc": _init_transformer(ks[3]),
        "dec": _init_transformer(ks[4]),
        "codex": nrm(ks[5], (CODEX_SIZE, D_CODEX), 1.0),
        "rgs_w": nrm(ks[6], (D_MODEL, PATCH * D_SUBJ), 0.05),
        "rgs_b": jnp.zeros((1, PATCH * D_SUBJ), jnp.float32),
        "desubj_w_big": desubj_w_big,
        "desubj_b_big": jnp.tile(desubj_b, (1, PATCH)),
    }


if __name__ == "__main__":
    key = jax.random.PRNGKey(0)
    kp, kx, ksub, km = jax.random.split(key, 4)

    params = init_params(kp)
    X = jax.random.normal(kx, (BATCH, SEQ_LEN, N_CHANNELS), jnp.float32)
    subj_id = jax.random.randint(ksub, (BATCH,), 0, N_SUBJECTS, dtype=jnp.int32)
    channel_mask = (jax.random.uniform(km, (BATCH, N_CHANNELS)) > 0.2).astype(jnp.float32)

    X_reconstr, loss = duin_vqvae_forward(params, X, subj_id, channel_mask)
    jax.block_until_ready((X_reconstr, loss))

    assert X_reconstr.shape == (BATCH, SEQ_LEN, N_CHANNELS)
    assert loss["total"].shape == ()
    assert loss["rgs"].shape == () and loss["vq"].shape == ()
    print("KERNEL_OK")
</pallas_src>

<mosaic_0001>
module attributes {stable_mosaic.version = 11 : i64} {
  func.func @_duin_vqvae_kernel(%arg0: i32, %arg1: memref<2xi32, #tpu.memory_space<smem>>, %arg2: memref<1x8x128xf32, #tpu.memory_space<vmem>>, %arg3: memref<1x1x128xf32, #tpu.memory_space<vmem>>, %arg4: memref<1x128x128xf32, #tpu.memory_space<vmem>>, %arg5: memref<1x128xf32, #tpu.memory_space<vmem>>, %arg6: memref<128x32xf32, #tpu.memory_space<vmem>>, %arg7: memref<1x32xf32, #tpu.memory_space<vmem>>, %arg8: memref<8x32xf32, #tpu.memory_space<vmem>>, %arg9: memref<2x1x32xf32, #tpu.memory_space<vmem>>, %arg10: memref<2x1x32xf32, #tpu.memory_space<vmem>>, %arg11: memref<2x4x32x8xf32, #tpu.memory_space<vmem>>, %arg12: memref<2x4x32x8xf32, #tpu.memory_space<vmem>>, %arg13: memref<2x4x32x8xf32, #tpu.memory_space<vmem>>, %arg14: memref<2x4x1x8xf32, #tpu.memory_space<vmem>>, %arg15: memref<2x4x1x8xf32, #tpu.memory_space<vmem>>, %arg16: memref<2x4x1x8xf32, #tpu.memory_space<vmem>>, %arg17: memref<2x4x8x32xf32, #tpu.memory_space<vmem>>, %arg18: memref<2x1x32xf32, #tpu.memory_space<vmem>>, %arg19: memref<2x1x32xf32, #tpu.memory_space<vmem>>, %arg20: memref<2x1x32xf32, #tpu.memory_space<vmem>>, %arg21: memref<2x32x64xf32, #tpu.memory_space<vmem>>, %arg22: memref<2x1x64xf32, #tpu.memory_space<vmem>>, %arg23: memref<2x64x32xf32, #tpu.memory_space<vmem>>, %arg24: memref<2x1x32xf32, #tpu.memory_space<vmem>>, %arg25: memref<2x1x32xf32, #tpu.memory_space<vmem>>, %arg26: memref<2x1x32xf32, #tpu.memory_space<vmem>>, %arg27: memref<2x4x32x8xf32, #tpu.memory_space<vmem>>, %arg28: memref<2x4x32x8xf32, #tpu.memory_space<vmem>>, %arg29: memref<2x4x32x8xf32, #tpu.memory_space<vmem>>, %arg30: memref<2x4x1x8xf32, #tpu.memory_space<vmem>>, %arg31: memref<2x4x1x8xf32, #tpu.memory_space<vmem>>, %arg32: memref<2x4x1x8xf32, #tpu.memory_space<vmem>>, %arg33: memref<2x4x8x32xf32, #tpu.memory_space<vmem>>, %arg34: memref<2x1x32xf32, #tpu.memory_space<vmem>>, %arg35: memref<2x1x32xf32, #tpu.memory_space<vmem>>, %arg36: memref<2x1x32xf32, #tpu.memory_space<vmem>>, %arg37: memref<2x32x64xf32, #tpu.memory_space<vmem>>, %arg38: memref<2x1x64xf32, #tpu.memory_space<vmem>>, %arg39: memref<2x64x32xf32, #tpu.memory_space<vmem>>, %arg40: memref<2x1x32xf32, #tpu.memory_space<vmem>>, %arg41: memref<64x32xf32, #tpu.memory_space<vmem>>, %arg42: memref<32x128xf32, #tpu.memory_space<vmem>>, %arg43: memref<1x128xf32, #tpu.memory_space<vmem>>, %arg44: memref<1x128x128xf32, #tpu.memory_space<vmem>>, %arg45: memref<1x128xf32, #tpu.memory_space<vmem>>, %arg46: memref<1x8x128xf32, #tpu.memory_space<vmem>>, %arg47: memref<1x1x1xf32, #tpu.memory_space<vmem>>, %arg48: memref<1x1x1xf32, #tpu.memory_space<vmem>>, %arg49: memref<1x1x1xf32, #tpu.memory_space<vmem>>) attributes {dimension_semantics = [#tpu.dimension_semantics<parallel>], iteration_bounds = array<i64: 2>, scalar_prefetch = 1 : i64, scratch_operands = 0 : i64, tpu.core_type = #tpu.core_type<tc>, window_params = [{transform_indices = @transform_0, window_bounds = array<i64: 1, 8, 128>}, {transform_indices = @transform_1, window_bounds = array<i64: 1, 1, 128>}, {transform_indices = @transform_2, window_bounds = array<i64: 1, 128, 128>}, {pipeline_mode = #tpu.pipeline_mode<synchronous>, transform_indices = @transform_3, window_bounds = array<i64: 1, 128>}, {pipeline_mode = #tpu.pipeline_mode<synchronous>, transform_indices = @transform_4, window_bounds = array<i64: 128, 32>}, {pipeline_mode = #tpu.pipeline_mode<synchronous>, transform_indices = @transform_5, window_bounds = array<i64: 1, 32>}, {pipeline_mode = #tpu.pipeline_mode<synchronous>, transform_indices = @transform_6, window_bounds = array<i64: 8, 32>}, {pipeline_mode = #tpu.pipeline_mode<synchronous>, transform_indices = @transform_7, window_bounds = array<i64: 2, 1, 32>}, {pipeline_mode = #tpu.pipeline_mode<synchronous>, transform_indices = @transform_8, window_bounds = array<i64: 2, 1, 32>}, {pipeline_mode = #tpu.pipeline_mode<synchronous>, transform_indices = @transform_9, window_bounds = array<i64: 2, 4, 32, 8>}, {pipeline_mode = #tpu.pipeline_mode<synchronous>, transform_indices = @transform_10, window_bounds = array<i64: 2, 4, 32, 8>}, {pipeline_mode = #tpu.pipeline_mode<synchronous>, transform_indices = @transform_11, window_bounds = array<i64: 2, 4, 32, 8>}, {pipeline_mode = #tpu.pipeline_mode<synchronous>, transform_indices = @transform_12, window_bounds = array<i64: 2, 4, 1, 8>}, {pipeline_mode = #tpu.pipeline_mode<synchronous>, transform_indices = @transform_13, window_bounds = array<i64: 2, 4, 1, 8>}, {pipeline_mode = #tpu.pipeline_mode<synchronous>, transform_indices = @transform_14, window_bounds = array<i64: 2, 4, 1, 8>}, {pipeline_mode = #tpu.pipeline_mode<synchronous>, transform_indices = @transform_15, window_bounds = array<i64: 2, 4, 8, 32>}, {pipeline_mode = #tpu.pipeline_mode<synchronous>, transform_indices = @transform_16, window_bounds = array<i64: 2, 1, 32>}, {pipeline_mode = #tpu.pipeline_mode<synchronous>, transform_indices = @transform_17, window_bounds = array<i64: 2, 1, 32>}, {pipeline_mode = #tpu.pipeline_mode<synchronous>, transform_indices = @transform_18, window_bounds = array<i64: 2, 1, 32>}, {pipeline_mode = #tpu.pipeline_mode<synchronous>, transform_indices = @transform_19, window_bounds = array<i64: 2, 32, 64>}, {pipeline_mode = #tpu.pipeline_mode<synchronous>, transform_indices = @transform_20, window_bounds = array<i64: 2, 1, 64>}, {pipeline_mode = #tpu.pipeline_mode<synchronous>, transform_indices = @transform_21, window_bounds = array<i64: 2, 64, 32>}, {pipeline_mode = #tpu.pipeline_mode<synchronous>, transform_indices = @transform_22, window_bounds = array<i64: 2, 1, 32>}, {pipeline_mode = #tpu.pipeline_mode<synchronous>, transform_indices = @transform_23, window_bounds = array<i64: 2, 1, 32>}, {pipeline_mode = #tpu.pipeline_mode<synchronous>, transform_indices = @transform_24, window_bounds = array<i64: 2, 1, 32>}, {pipeline_mode = #tpu.pipeline_mode<synchronous>, transform_indices = @transform_25, window_bounds = array<i64: 2, 4, 32, 8>}, {pipeline_mode = #tpu.pipeline_mode<synchronous>, transform_indices = @transform_26, window_bounds = array<i64: 2, 4, 32, 8>}, {pipeline_mode = #tpu.pipeline_mode<synchronous>, transform_indices = @transform_27, window_bounds = array<i64: 2, 4, 32, 8>}, {pipeline_mode = #tpu.pipeline_mode<synchronous>, transform_indices = @transform_28, window_bounds = array<i64: 2, 4, 1, 8>}, {pipeline_mode = #tpu.pipeline_mode<synchronous>, transform_indices = @transform_29, window_bounds = array<i64: 2, 4, 1, 8>}, {pipeline_mode = #tpu.pipeline_mode<synchronous>, transform_indices = @transform_30, window_bounds = array<i64: 2, 4, 1, 8>}, {pipeline_mode = #tpu.pipeline_mode<synchronous>, transform_indices = @transform_31, window_bounds = array<i64: 2, 4, 8, 32>}, {pipeline_mode = #tpu.pipeline_mode<synchronous>, transform_indices = @transform_32, window_bounds = array<i64: 2, 1, 32>}, {pipeline_mode = #tpu.pipeline_mode<synchronous>, transform_indices = @transform_33, window_bounds = array<i64: 2, 1, 32>}, {pipeline_mode = #tpu.pipeline_mode<synchronous>, transform_indices = @transform_34, window_bounds = array<i64: 2, 1, 32>}, {pipeline_mode = #tpu.pipeline_mode<synchronous>, transform_indices = @transform_35, window_bounds = array<i64: 2, 32, 64>}, {pipeline_mode = #tpu.pipeline_mode<synchronous>, transform_indices = @transform_36, window_bounds = array<i64: 2, 1, 64>}, {pipeline_mode = #tpu.pipeline_mode<synchronous>, transform_indices = @transform_37, window_bounds = array<i64: 2, 64, 32>}, {pipeline_mode = #tpu.pipeline_mode<synchronous>, transform_indices = @transform_38, window_bounds = array<i64: 2, 1, 32>}, {pipeline_mode = #tpu.pipeline_mode<synchronous>, transform_indices = @transform_39, window_bounds = array<i64: 64, 32>}, {pipeline_mode = #tpu.pipeline_mode<synchronous>, transform_indices = @transform_40, window_bounds = array<i64: 32, 128>}, {pipeline_mode = #tpu.pipeline_mode<synchronous>, transform_indices = @transform_41, window_bounds = array<i64: 1, 128>}, {transform_indices = @transform_42, window_bounds = array<i64: 1, 128, 128>}, {pipeline_mode = #tpu.pipeline_mode<synchronous>, transform_indices = @transform_43, window_bounds = array<i64: 1, 128>}, {transform_indices = @transform_44, window_bounds = array<i64: 1, 8, 128>}, {transform_indices = @transform_45, window_bounds = array<i64: 1, 1, 1>}, {transform_indices = @transform_46, window_bounds = array<i64: 1, 1, 1>}, {transform_indices = @transform_47, window_bounds = array<i64: 1, 1, 1>}]} {
    %c0 = arith.constant 0 : index
    %c0_0 = arith.constant 0 : index
    %c0_1 = arith.constant 0 : index
    %0 = vector.load %arg2[%c0, %c0_0, %c0_1] : memref<1x8x128xf32, #tpu.memory_space<vmem>>, vector<1x8x128xf32>
    %1 = vector.shape_cast %0 : vector<1x8x128xf32> to vector<8x128xf32>
    %c0_2 = arith.constant 0 : index
    %c0_3 = arith.constant 0 : index
    %2 = vector.load %arg8[%c0_2, %c0_3] : memref<8x32xf32, #tpu.memory_space<vmem>>, vector<8x32xf32>
    %c0_4 = arith.constant 0 : index
    %c0_5 = arith.constant 0 : index
    %c0_6 = arith.constant 0 : index
    %3 = vector.load %arg4[%c0_4, %c0_5, %c0_6] : memref<1x128x128xf32, #tpu.memory_space<vmem>>, vector<1x128x128xf32>
    %4 = vector.shape_cast %3 : vector<1x128x128xf32> to vector<128x128xf32>
    %cst = arith.constant dense<0.000000e+00> : vector<8x128xf32>
    %5 = tpu.matmul %1, %4, %cst {dimension_numbers = #tpu.dot_dimension_numbers<[1], [0], [0], [1], [0, 0, 1, 1], [], []>} : vector<8x128xf32>, vector<128x128xf32>, vector<8x128xf32> -> vector<8x128xf32>
    %c0_7 = arith.constant 0 : index
    %c0_8 = arith.constant 0 : index
    %6 = vector.load %arg5[%c0_7, %c0_8] : memref<1x128xf32, #tpu.memory_space<vmem>>, vector<1x128xf32>
    %7 = vector.broadcast %6 : vector<1x128xf32> to vector<8x128xf32>
    %8 = arith.addf %5, %7 : vector<8x128xf32>
    %c0_9 = arith.constant 0 : index
    %c0_10 = arith.constant 0 : index
    %9 = vector.load %arg6[%c0_9, %c0_10] : memref<128x32xf32, #tpu.memory_space<vmem>>, vector<128x32xf32>
    %cst_11 = arith.constant dense<0.000000e+00> : vector<8x32xf32>
    %10 = tpu.matmul %8, %9, %cst_11 {dimension_numbers = #tpu.dot_dimension_numbers<[1], [0], [0], [1], [0, 0, 1, 1], [], []>} : vector<8x128xf32>, vector<128x32xf32>, vector<8x32xf32> -> vector<8x32xf32>
    %c0_12 = arith.constant 0 : index
    %c0_13 = arith.constant 0 : index
    %11 = vector.load %arg7[%c0_12, %c0_13] : memref<1x32xf32, #tpu.memory_space<vmem>>, vector<1x32xf32>
    %12 = vector.broadcast %11 : vector<1x32xf32> to vector<8x32xf32>
    %13 = arith.addf %10, %12 : vector<8x32xf32>
    %14 = arith.mulf %13, %13 : vector<8x32xf32>
    %15 = arith.mulf %13, %14 : vector<8x32xf32>
    %cst_14 = arith.constant 4.471500e-02 : f32
    %16 = vector.broadcast %cst_14 : f32 to vector<8x32xf32>
    %17 = arith.mulf %16, %15 : vector<8x32xf32>
    %18 = arith.addf %13, %17 : vector<8x32xf32>
    %cst_15 = arith.constant 0.797884583 : f32
    %19 = vector.broadcast %cst_15 : f32 to vector<8x32xf32>
    %20 = arith.mulf %19, %18 : vector<8x32xf32>
    %21 = math.tanh %20 : vector<8x32xf32>
    %cst_16 = arith.constant 1.000000e+00 : f32
    %22 = vector.broadcast %cst_16 : f32 to vector<8x32xf32>
    %23 = arith.addf %22, %21 : vector<8x32xf32>
    %cst_17 = arith.constant 5.000000e-01 : f32
    %24 = vector.broadcast %cst_17 : f32 to vector<8x32xf32>
    %25 = arith.mulf %24, %23 : vector<8x32xf32>
    %26 = arith.mulf %13, %25 : vector<8x32xf32>
    %27 = arith.addf %26, %2 : vector<8x32xf32>
    %c0_18 = arith.constant 0 : index
    %c0_19 = arith.constant 0 : index
    %c0_20 = arith.constant 0 : index
    %28 = vector.load %arg9[%c0_18, %c0_19, %c0_20] : memref<2x1x32xf32, #tpu.memory_space<vmem>>, vector<1x1x32xf32>
    %29 = vector.shape_cast %28 : vector<1x1x32xf32> to vector<1x32xf32>
    %c0_21 = arith.constant 0 : index
    %c0_22 = arith.constant 0 : index
    %c0_23 = arith.constant 0 : index
    %30 = vector.load %arg10[%c0_21, %c0_22, %c0_23] : memref<2x1x32xf32, #tpu.memory_space<vmem>>, vector<1x1x32xf32>
    %31 = vector.shape_cast %30 : vector<1x1x32xf32> to vector<1x32xf32>
    %cst_24 = arith.constant dense<0.000000e+00> : vector<8xf32>
    %32 = vector.multi_reduction <add>, %27, %cst_24 [1] : vector<8x32xf32> to vector<8xf32>
    %33 = vector.shape_cast %32 : vector<8xf32> to vector<8x1xf32>
    %cst_25 = arith.constant 3.200000e+01 : f32
    %34 = vector.broadcast %cst_25 : f32 to vector<8x1xf32>
    %35 = arith.divf %33, %34 : vector<8x1xf32>
    %36 = vector.broadcast %35 : vector<8x1xf32> to vector<8x32xf32>
    %37 = arith.subf %27, %36 : vector<8x32xf32>
    %38 = arith.mulf %37, %37 : vector<8x32xf32>
    %cst_26 = arith.constant dense<0.000000e+00> : vector<8xf32>
    %39 = vector.multi_reduction <add>, %38, %cst_26 [1] : vector<8x32xf32> to vector<8xf32>
    %40 = vector.shape_cast %39 : vector<8xf32> to vector<8x1xf32>
    %cst_27 = arith.constant 3.200000e+01 : f32
    %41 = vector.broadcast %cst_27 : f32 to vector<8x1xf32>
    %42 = arith.divf %40, %41 : vector<8x1xf32>
    %43 = vector.broadcast %35 : vector<8x1xf32> to vector<8x32xf32>
    %44 = arith.subf %27, %43 : vector<8x32xf32>
    %cst_28 = arith.constant 9.99999974E-6 : f32
    %45 = vector.broadcast %cst_28 : f32 to vector<8x1xf32>
    %46 = arith.addf %42, %45 : vector<8x1xf32>
    %47 = math.rsqrt %46 : vector<8x1xf32>
    %48 = vector.broadcast %47 : vector<8x1xf32> to vector<8x32xf32>
    %49 = arith.mulf %44, %48 : vector<8x32xf32>
    %50 = vector.broadcast %29 : vector<1x32xf32> to vector<8x32xf32>
    %51 = arith.mulf %49, %50 : vector<8x32xf32>
    %52 = vector.broadcast %31 : vector<1x32xf32> to vector<8x32xf32>
    %53 = arith.addf %51, %52 : vector<8x32xf32>
    %54 = vector.shape_cast %53 : vector<8x32xf32> to vector<1x8x32xf32>
    %55 = vector.broadcast %54 : vector<1x8x32xf32> to vector<4x8x32xf32>
    %c0_29 = arith.constant 0 : index
    %c0_30 = arith.constant 0 : index
    %c0_31 = arith.constant 0 : index
    %c0_32 = arith.constant 0 : index
    %56 = vector.load %arg11[%c0_29, %c0_30, %c0_31, %c0_32] : memref<2x4x32x8xf32, #tpu.memory_space<vmem>>, vector<1x4x32x8xf32>
    %57 = vector.shape_cast %56 : vector<1x4x32x8xf32> to vector<4x32x8xf32>
    "tpu.trace_start"() <{level = 10 : i32, message = "htd,hdk->htk"}> : () -> ()
    %cst_33 = arith.constant dense<0.000000e+00> : vector<4x8x8xf32>
    %58 = tpu.matmul %55, %57, %cst_33 {dimension_numbers = #tpu.dot_dimension_numbers<[2], [1], [1], [2], [0, 0, 0, 1, 1, 2], [0], [0]>} : vector<4x8x32xf32>, vector<4x32x8xf32>, vector<4x8x8xf32> -> vector<4x8x8xf32>
    "tpu.trace_stop"() : () -> ()
    %c0_34 = arith.constant 0 : index
    %c0_35 = arith.constant 0 : index
    %c0_36 = arith.constant 0 : index
    %c0_37 = arith.constant 0 : index
    %59 = vector.load %arg14[%c0_34, %c0_35, %c0_36, %c0_37] : memref<2x4x1x8xf32, #tpu.memory_space<vmem>>, vector<1x4x1x8xf32>
    %60 = vector.shape_cast %59 : vector<1x4x1x8xf32> to vector<4x1x8xf32>
    %61 = vector.broadcast %60 : vector<4x1x8xf32> to vector<4x8x8xf32>
    %62 = arith.addf %58, %61 : vector<4x8x8xf32>
    %c0_38 = arith.constant 0 : index
    %c0_39 = arith.constant 0 : index
    %c0_40 = arith.constant 0 : index
    %c0_41 = arith.constant 0 : index
    %63 = vector.load %arg12[%c0_38, %c0_39, %c0_40, %c0_41] : memref<2x4x32x8xf32, #tpu.memory_space<vmem>>, vector<1x4x32x8xf32>
    %64 = vector.shape_cast %63 : vector<1x4x32x8xf32> to vector<4x32x8xf32>
    "tpu.trace_start"() <{level = 10 : i32, message = "htd,hdk->htk"}> : () -> ()
    %cst_42 = arith.constant dense<0.000000e+00> : vector<4x8x8xf32>
    %65 = tpu.matmul %55, %64, %cst_42 {dimension_numbers = #tpu.dot_dimension_numbers<[2], [1], [1], [2], [0, 0, 0, 1, 1, 2], [0], [0]>} : vector<4x8x32xf32>, vector<4x32x8xf32>, vector<4x8x8xf32> -> vector<4x8x8xf32>
    "tpu.trace_stop"() : () -> ()
    %c0_43 = arith.constant 0 : index
    %c0_44 = arith.constant 0 : index
    %c0_45 = arith.constant 0 : index
    %c0_46 = arith.constant 0 : index
    %66 = vector.load %arg15[%c0_43, %c0_44, %c0_45, %c0_46] : memref<2x4x1x8xf32, #tpu.memory_space<vmem>>, vector<1x4x1x8xf32>
    %67 = vector.shape_cast %66 : vector<1x4x1x8xf32> to vector<4x1x8xf32>
    %68 = vector.broadcast %67 : vector<4x1x8xf32> to vector<4x8x8xf32>
    %69 = arith.addf %65, %68 : vector<4x8x8xf32>
    %c0_47 = arith.constant 0 : index
    %c0_48 = arith.constant 0 : index
    %c0_49 = arith.constant 0 : index
    %c0_50 = arith.constant 0 : index
    %70 = vector.load %arg13[%c0_47, %c0_48, %c0_49, %c0_50] : memref<2x4x32x8xf32, #tpu.memory_space<vmem>>, vector<1x4x32x8xf32>
    %71 = vector.shape_cast %70 : vector<1x4x32x8xf32> to vector<4x32x8xf32>
    "tpu.trace_start"() <{level = 10 : i32, message = "htd,hdk->htk"}> : () -> ()
    %cst_51 = arith.constant dense<0.000000e+00> : vector<4x8x8xf32>
    %72 = tpu.matmul %55, %71, %cst_51 {dimension_numbers = #tpu.dot_dimension_numbers<[2], [1], [1], [2], [0, 0, 0, 1, 1, 2], [0], [0]>} : vector<4x8x32xf32>, vector<4x32x8xf32>, vector<4x8x8xf32> -> vector<4x8x8xf32>
    "tpu.trace_stop"() : () -> ()
    %c0_52 = arith.constant 0 : index
    %c0_53 = arith.constant 0 : index
    %c0_54 = arith.constant 0 : index
    %c0_55 = arith.constant 0 : index
    %73 = vector.load %arg16[%c0_52, %c0_53, %c0_54, %c0_55] : memref<2x4x1x8xf32, #tpu.memory_space<vmem>>, vector<1x4x1x8xf32>
    %74 = vector.shape_cast %73 : vector<1x4x1x8xf32> to vector<4x1x8xf32>
    %75 = vector.broadcast %74 : vector<4x1x8xf32> to vector<4x8x8xf32>
    %76 = arith.addf %72, %75 : vector<4x8x8xf32>
    "tpu.trace_start"() <{level = 10 : i32, message = "hqd,hkd->hqk"}> : () -> ()
    %cst_56 = arith.constant dense<0.000000e+00> : vector<4x8x8xf32>
    %77 = tpu.matmul %62, %69, %cst_56 {dimension_numbers = #tpu.dot_dimension_numbers<[2], [2], [1], [1], [0, 0, 0, 1, 1, 1], [0], [0]>} : vector<4x8x8xf32>, vector<4x8x8xf32>, vector<4x8x8xf32> -> vector<4x8x8xf32>
    "tpu.trace_stop"() : () -> ()
    %cst_57 = arith.constant 0.353553385 : f32
    %78 = vector.broadcast %cst_57 : f32 to vector<4x8x8xf32>
    %79 = arith.mulf %77, %78 : vector<4x8x8xf32>
    %cst_58 = arith.constant dense<0xFF800000> : vector<4x8xf32>
    %80 = vector.multi_reduction <maximumf>, %79, %cst_58 [2] : vector<4x8x8xf32> to vector<4x8xf32>
    %81 = vector.shape_cast %80 : vector<4x8xf32> to vector<4x8x1xf32>
    %82 = vector.broadcast %81 : vector<4x8x1xf32> to vector<4x8x8xf32>
    %83 = arith.subf %79, %82 : vector<4x8x8xf32>
    %84 = math.exp %83 : vector<4x8x8xf32>
    %cst_59 = arith.constant dense<0.000000e+00> : vector<4x8xf32>
    %85 = vector.multi_reduction <add>, %84, %cst_59 [2] : vector<4x8x8xf32> to vector<4x8xf32>
    %86 = vector.shape_cast %85 : vector<4x8xf32> to vector<4x8x1xf32>
    %87 = tpu.reciprocal %86 {approx = true} : vector<4x8x1xf32> -> vector<4x8x1xf32>
    %88 = vector.broadcast %87 : vector<4x8x1xf32> to vector<4x8x8xf32>
    %89 = arith.mulf %84, %88 : vector<4x8x8xf32>
    "tpu.trace_start"() <{level = 10 : i32, message = "hqk,hkd->hqd"}> : () -> ()
    %cst_60 = arith.constant dense<0.000000e+00> : vector<4x8x8xf32>
    %90 = tpu.matmul %89, %76, %cst_60 {dimension_numbers = #tpu.dot_dimension_numbers<[2], [1], [1], [2], [0, 0, 0, 1, 1, 2], [0], [0]>} : vector<4x8x8xf32>, vector<4x8x8xf32>, vector<4x8x8xf32> -> vector<4x8x8xf32>
    "tpu.trace_stop"() : () -> ()
    %c0_61 = arith.constant 0 : index
    %c0_62 = arith.constant 0 : index
    %c0_63 = arith.constant 0 : index
    %c0_64 = arith.constant 0 : index
    %91 = vector.load %arg17[%c0_61, %c0_62, %c0_63, %c0_64] : memref<2x4x8x32xf32, #tpu.memory_space<vmem>>, vector<1x4x8x32xf32>
    %92 = vector.shape_cast %91 : vector<1x4x8x32xf32> to vector<4x8x32xf32>
    "tpu.trace_start"() <{level = 10 : i32, message = "hqd,hdm->hqm"}> : () -> ()
    %cst_65 = arith.constant dense<0.000000e+00> : vector<4x8x32xf32>
    %93 = tpu.matmul %90, %92, %cst_65 {dimension_numbers = #tpu.dot_dimension_numbers<[2], [1], [1], [2], [0, 0, 0, 1, 1, 2], [0], [0]>} : vector<4x8x8xf32>, vector<4x8x32xf32>, vector<4x8x32xf32> -> vector<4x8x32xf32>
    "tpu.trace_stop"() : () -> ()
    %cst_66 = arith.constant dense<0.000000e+00> : vector<8x32xf32>
    %94 = vector.multi_reduction <add>, %93, %cst_66 [0] : vector<4x8x32xf32> to vector<8x32xf32>
    %c0_67 = arith.constant 0 : index
    %c0_68 = arith.constant 0 : index
    %c0_69 = arith.constant 0 : index
    %95 = vector.load %arg18[%c0_67, %c0_68, %c0_69] : memref<2x1x32xf32, #tpu.memory_space<vmem>>, vector<1x1x32xf32>
    %96 = vector.shape_cast %95 : vector<1x1x32xf32> to vector<1x32xf32>
    %97 = vector.broadcast %96 : vector<1x32xf32> to vector<8x32xf32>
    %98 = arith.addf %94, %97 : vector<8x32xf32>
    %99 = arith.addf %27, %98 : vector<8x32xf32>
    %c0_70 = arith.constant 0 : index
    %c0_71 = arith.constant 0 : index
    %c0_72 = arith.constant 0 : index
    %100 = vector.load %arg19[%c0_70, %c0_71, %c0_72] : memref<2x1x32xf32, #tpu.memory_space<vmem>>, vector<1x1x32xf32>
    %101 = vector.shape_cast %100 : vector<1x1x32xf32> to vector<1x32xf32>
    %c0_73 = arith.constant 0 : index
    %c0_74 = arith.constant 0 : index
    %c0_75 = arith.constant 0 : index
    %102 = vector.load %arg20[%c0_73, %c0_74, %c0_75] : memref<2x1x32xf32, #tpu.memory_space<vmem>>, vector<1x1x32xf32>
    %103 = vector.shape_cast %102 : vector<1x1x32xf32> to vector<1x32xf32>
    %cst_76 = arith.constant dense<0.000000e+00> : vector<8xf32>
    %104 = vector.multi_reduction <add>, %99, %cst_76 [1] : vector<8x32xf32> to vector<8xf32>
    %105 = vector.shape_cast %104 : vector<8xf32> to vector<8x1xf32>
    %cst_77 = arith.constant 3.200000e+01 : f32
    %106 = vector.broadcast %cst_77 : f32 to vector<8x1xf32>
    %107 = arith.divf %105, %106 : vector<8x1xf32>
    %108 = vector.broadcast %107 : vector<8x1xf32> to vector<8x32xf32>
    %109 = arith.subf %99, %108 : vector<8x32xf32>
    %110 = arith.mulf %109, %109 : vector<8x32xf32>
    %cst_78 = arith.constant dense<0.000000e+00> : vector<8xf32>
    %111 = vector.multi_reduction <add>, %110, %cst_78 [1] : vector<8x32xf32> to vector<8xf32>
    %112 = vector.shape_cast %111 : vector<8xf32> to vector<8x1xf32>
    %cst_79 = arith.constant 3.200000e+01 : f32
    %113 = vector.broadcast %cst_79 : f32 to vector<8x1xf32>
    %114 = arith.divf %112, %113 : vector<8x1xf32>
    %115 = vector.broadcast %107 : vector<8x1xf32> to vector<8x32xf32>
    %116 = arith.subf %99, %115 : vector<8x32xf32>
    %cst_80 = arith.constant 9.99999974E-6 : f32
    %117 = vector.broadcast %cst_80 : f32 to vector<8x1xf32>
    %118 = arith.addf %114, %117 : vector<8x1xf32>
    %119 = math.rsqrt %118 : vector<8x1xf32>
    %120 = vector.broadcast %119 : vector<8x1xf32> to vector<8x32xf32>
    %121 = arith.mulf %116, %120 : vector<8x32xf32>
    %122 = vector.broadcast %101 : vector<1x32xf32> to vector<8x32xf32>
    %123 = arith.mulf %121, %122 : vector<8x32xf32>
    %124 = vector.broadcast %103 : vector<1x32xf32> to vector<8x32xf32>
    %125 = arith.addf %123, %124 : vector<8x32xf32>
    %c0_81 = arith.constant 0 : index
    %c0_82 = arith.constant 0 : index
    %c0_83 = arith.constant 0 : index
    %126 = vector.load %arg21[%c0_81, %c0_82, %c0_83] : memref<2x32x64xf32, #tpu.memory_space<vmem>>, vector<1x32x64xf32>
    %127 = vector.shape_cast %126 : vector<1x32x64xf32> to vector<32x64xf32>
    %cst_84 = arith.constant dense<0.000000e+00> : vector<8x64xf32>
    %128 = tpu.matmul %125, %127, %cst_84 {dimension_numbers = #tpu.dot_dimension_numbers<[1], [0], [0], [1], [0, 0, 1, 1], [], []>} : vector<8x32xf32>, vector<32x64xf32>, vector<8x64xf32> -> vector<8x64xf32>
    %c0_85 = arith.constant 0 : index
    %c0_86 = arith.constant 0 : index
    %c0_87 = arith.constant 0 : index
    %129 = vector.load %arg22[%c0_85, %c0_86, %c0_87] : memref<2x1x64xf32, #tpu.memory_space<vmem>>, vector<1x1x64xf32>
    %130 = vector.shape_cast %129 : vector<1x1x64xf32> to vector<1x64xf32>
    %131 = vector.broadcast %130 : vector<1x64xf32> to vector<8x64xf32>
    %132 = arith.addf %128, %131 : vector<8x64xf32>
    %133 = arith.mulf %132, %132 : vector<8x64xf32>
    %134 = arith.mulf %132, %133 : vector<8x64xf32>
    %cst_88 = arith.constant 4.471500e-02 : f32
    %135 = vector.broadcast %cst_88 : f32 to vector<8x64xf32>
    %136 = arith.mulf %135, %134 : vector<8x64xf32>
    %137 = arith.addf %132, %136 : vector<8x64xf32>
    %cst_89 = arith.constant 0.797884583 : f32
    %138 = vector.broadcast %cst_89 : f32 to vector<8x64xf32>
    %139 = arith.mulf %138, %137 : vector<8x64xf32>
    %140 = math.tanh %139 : vector<8x64xf32>
    %cst_90 = arith.constant 1.000000e+00 : f32
    %141 = vector.broadcast %cst_90 : f32 to vector<8x64xf32>
    %142 = arith.addf %141, %140 : vector<8x64xf32>
    %cst_91 = arith.constant 5.000000e-01 : f32
    %143 = vector.broadcast %cst_91 : f32 to vector<8x64xf32>
    %144 = arith.mulf %143, %142 : vector<8x64xf32>
    %145 = arith.mulf %132, %144 : vector<8x64xf32>
    %c0_92 = arith.constant 0 : index
    %c0_93 = arith.constant 0 : index
    %c0_94 = arith.constant 0 : index
    %146 = vector.load %arg23[%c0_92, %c0_93, %c0_94] : memref<2x64x32xf32, #tpu.memory_space<vmem>>, vector<1x64x32xf32>
    %147 = vector.shape_cast %146 : vector<1x64x32xf32> to vector<64x32xf32>
    %cst_95 = arith.constant dense<0.000000e+00> : vector<8x32xf32>
    %148 = tpu.matmul %145, %147, %cst_95 {dimension_numbers = #tpu.dot_dimension_numbers<[1], [0], [0], [1], [0, 0, 1, 1], [], []>} : vector<8x64xf32>, vector<64x32xf32>, vector<8x32xf32> -> vector<8x32xf32>
    %c0_96 = arith.constant 0 : index
    %c0_97 = arith.constant 0 : index
    %c0_98 = arith.constant 0 : index
    %149 = vector.load %arg24[%c0_96, %c0_97, %c0_98] : memref<2x1x32xf32, #tpu.memory_space<vmem>>, vector<1x1x32xf32>
    %150 = vector.shape_cast %149 : vector<1x1x32xf32> to vector<1x32xf32>
    %151 = vector.broadcast %150 : vector<1x32xf32> to vector<8x32xf32>
    %152 = arith.addf %148, %151 : vector<8x32xf32>
    %153 = arith.addf %99, %152 : vector<8x32xf32>
    %c1 = arith.constant 1 : index
    %c0_99 = arith.constant 0 : index
    %c0_100 = arith.constant 0 : index
    %154 = vector.load %arg9[%c1, %c0_99, %c0_100] : memref<2x1x32xf32, #tpu.memory_space<vmem>>, vector<1x1x32xf32>
    %155 = vector.shape_cast %154 : vector<1x1x32xf32> to vector<1x32xf32>
    %c1_101 = arith.constant 1 : index
    %c0_102 = arith.constant 0 : index
    %c0_103 = arith.constant 0 : index
    %156 = vector.load %arg10[%c1_101, %c0_102, %c0_103] : memref<2x1x32xf32, #tpu.memory_space<vmem>>, vector<1x1x32xf32>
    %157 = vector.shape_cast %156 : vector<1x1x32xf32> to vector<1x32xf32>
    %cst_104 = arith.constant dense<0.000000e+00> : vector<8xf32>
    %158 = vector.multi_reduction <add>, %153, %cst_104 [1] : vector<8x32xf32> to vector<8xf32>
    %159 = vector.shape_cast %158 : vector<8xf32> to vector<8x1xf32>
    %cst_105 = arith.constant 3.200000e+01 : f32
    %160 = vector.broadcast %cst_105 : f32 to vector<8x1xf32>
    %161 = arith.divf %159, %160 : vector<8x1xf32>
    %162 = vector.broadcast %161 : vector<8x1xf32> to vector<8x32xf32>
    %163 = arith.subf %153, %162 : vector<8x32xf32>
    %164 = arith.mulf %163, %163 : vector<8x32xf32>
    %cst_106 = arith.constant dense<0.000000e+00> : vector<8xf32>
    %165 = vector.multi_reduction <add>, %164, %cst_106 [1] : vector<8x32xf32> to vector<8xf32>
    %166 = vector.shape_cast %165 : vector<8xf32> to vector<8x1xf32>
    %cst_107 = arith.constant 3.200000e+01 : f32
    %167 = vector.broadcast %cst_107 : f32 to vector<8x1xf32>
    %168 = arith.divf %166, %167 : vector<8x1xf32>
    %169 = vector.broadcast %161 : vector<8x1xf32> to vector<8x32xf32>
    %170 = arith.subf %153, %169 : vector<8x32xf32>
    %cst_108 = arith.constant 9.99999974E-6 : f32
    %171 = vector.broadcast %cst_108 : f32 to vector<8x1xf32>
    %172 = arith.addf %168, %171 : vector<8x1xf32>
    %173 = math.rsqrt %172 : vector<8x1xf32>
    %174 = vector.broadcast %173 : vector<8x1xf32> to vector<8x32xf32>
    %175 = arith.mulf %170, %174 : vector<8x32xf32>
    %176 = vector.broadcast %155 : vector<1x32xf32> to vector<8x32xf32>
    %177 = arith.mulf %175, %176 : vector<8x32xf32>
    %178 = vector.broadcast %157 : vector<1x32xf32> to vector<8x32xf32>
    %179 = arith.addf %177, %178 : vector<8x32xf32>
    %180 = vector.shape_cast %179 : vector<8x32xf32> to vector<1x8x32xf32>
    %181 = vector.broadcast %180 : vector<1x8x32xf32> to vector<4x8x32xf32>
    %c1_109 = arith.constant 1 : index
    %c0_110 = arith.constant 0 : index
    %c0_111 = arith.constant 0 : index
    %c0_112 = arith.constant 0 : index
    %182 = vector.load %arg11[%c1_109, %c0_110, %c0_111, %c0_112] : memref<2x4x32x8xf32, #tpu.memory_space<vmem>>, vector<1x4x32x8xf32>
    %183 = vector.shape_cast %182 : vector<1x4x32x8xf32> to vector<4x32x8xf32>
    "tpu.trace_start"() <{level = 10 : i32, message = "htd,hdk->htk"}> : () -> ()
    %cst_113 = arith.constant dense<0.000000e+00> : vector<4x8x8xf32>
    %184 = tpu.matmul %181, %183, %cst_113 {dimension_numbers = #tpu.dot_dimension_numbers<[2], [1], [1], [2], [0, 0, 0, 1, 1, 2], [0], [0]>} : vector<4x8x32xf32>, vector<4x32x8xf32>, vector<4x8x8xf32> -> vector<4x8x8xf32>
    "tpu.trace_stop"() : () -> ()
    %c1_114 = arith.constant 1 : index
    %c0_115 = arith.constant 0 : index
    %c0_116 = arith.constant 0 : index
    %c0_117 = arith.constant 0 : index
    %185 = vector.load %arg14[%c1_114, %c0_115, %c0_116, %c0_117] : memref<2x4x1x8xf32, #tpu.memory_space<vmem>>, vector<1x4x1x8xf32>
    %186 = vector.shape_cast %185 : vector<1x4x1x8xf32> to vector<4x1x8xf32>
    %187 = vector.broadcast %186 : vector<4x1x8xf32> to vector<4x8x8xf32>
    %188 = arith.addf %184, %187 : vector<4x8x8xf32>
    %c1_118 = arith.constant 1 : index
    %c0_119 = arith.constant 0 : index
    %c0_120 = arith.constant 0 : index
    %c0_121 = arith.constant 0 : index
    %189 = vector.load %arg12[%c1_118, %c0_119, %c0_120, %c0_121] : memref<2x4x32x8xf32, #tpu.memory_space<vmem>>, vector<1x4x32x8xf32>
    %190 = vector.shape_cast %189 : vector<1x4x32x8xf32> to vector<4x32x8xf32>
    "tpu.trace_start"() <{level = 10 : i32, message = "htd,hdk->htk"}> : () -> ()
    %cst_122 = arith.constant dense<0.000000e+00> : vector<4x8x8xf32>
    %191 = tpu.matmul %181, %190, %cst_122 {dimension_numbers = #tpu.dot_dimension_numbers<[2], [1], [1], [2], [0, 0, 0, 1, 1, 2], [0], [0]>} : vector<4x8x32xf32>, vector<4x32x8xf32>, vector<4x8x8xf32> -> vector<4x8x8xf32>
    "tpu.trace_stop"() : () -> ()
    %c1_123 = arith.constant 1 : index
    %c0_124 = arith.constant 0 : index
    %c0_125 = arith.constant 0 : index
    %c0_126 = arith.constant 0 : index
    %192 = vector.load %arg15[%c1_123, %c0_124, %c0_125, %c0_126] : memref<2x4x1x8xf32, #tpu.memory_space<vmem>>, vector<1x4x1x8xf32>
    %193 = vector.shape_cast %192 : vector<1x4x1x8xf32> to vector<4x1x8xf32>
    %194 = vector.broadcast %193 : vector<4x1x8xf32> to vector<4x8x8xf32>
    %195 = arith.addf %191, %194 : vector<4x8x8xf32>
    %c1_127 = arith.constant 1 : index
    %c0_128 = arith.constant 0 : index
    %c0_129 = arith.constant 0 : index
    %c0_130 = arith.constant 0 : index
    %196 = vector.load %arg13[%c1_127, %c0_128, %c0_129, %c0_130] : memref<2x4x32x8xf32, #tpu.memory_space<vmem>>, vector<1x4x32x8xf32>
    %197 = vector.shape_cast %196 : vector<1x4x32x8xf32> to vector<4x32x8xf32>
    "tpu.trace_start"() <{level = 10 : i32, message = "htd,hdk->htk"}> : () -> ()
    %cst_131 = arith.constant dense<0.000000e+00> : vector<4x8x8xf32>
    %198 = tpu.matmul %181, %197, %cst_131 {dimension_numbers = #tpu.dot_dimension_numbers<[2], [1], [1], [2], [0, 0, 0, 1, 1, 2], [0], [0]>} : vector<4x8x32xf32>, vector<4x32x8xf32>, vector<4x8x8xf32> -> vector<4x8x8xf32>
    "tpu.trace_stop"() : () -> ()
    %c1_132 = arith.constant 1 : index
    %c0_133 = arith.constant 0 : index
    %c0_134 = arith.constant 0 : index
    %c0_135 = arith.constant 0 : index
    %199 = vector.load %arg16[%c1_132, %c0_133, %c0_134, %c0_135] : memref<2x4x1x8xf32, #tpu.memory_space<vmem>>, vector<1x4x1x8xf32>
    %200 = vector.shape_cast %199 : vector<1x4x1x8xf32> to vector<4x1x8xf32>
    %201 = vector.broadcast %200 : vector<4x1x8xf32> to vector<4x8x8xf32>
    %202 = arith.addf %198, %201 : vector<4x8x8xf32>
    "tpu.trace_start"() <{level = 10 : i32, message = "hqd,hkd->hqk"}> : () -> ()
    %cst_136 = arith.constant dense<0.000000e+00> : vector<4x8x8xf32>
    %203 = tpu.matmul %188, %195, %cst_136 {dimension_numbers = #tpu.dot_dimension_numbers<[2], [2], [1], [1], [0, 0, 0, 1, 1, 1], [0], [0]>} : vector<4x8x8xf32>, vector<4x8x8xf32>, vector<4x8x8xf32> -> vector<4x8x8xf32>
    "tpu.trace_stop"() : () -> ()
    %cst_137 = arith.constant 0.353553385 : f32
    %204 = vector.broadcast %cst_137 : f32 to vector<4x8x8xf32>
    %205 = arith.mulf %203, %204 : vector<4x8x8xf32>
    %cst_138 = arith.constant dense<0xFF800000> : vector<4x8xf32>
    %206 = vector.multi_reduction <maximumf>, %205, %cst_138 [2] : vector<4x8x8xf32> to vector<4x8xf32>
    %207 = vector.shape_cast %206 : vector<4x8xf32> to vector<4x8x1xf32>
    %208 = vector.broadcast %207 : vector<4x8x1xf32> to vector<4x8x8xf32>
    %209 = arith.subf %205, %208 : vector<4x8x8xf32>
    %210 = math.exp %209 : vector<4x8x8xf32>
    %cst_139 = arith.constant dense<0.000000e+00> : vector<4x8xf32>
    %211 = vector.multi_reduction <add>, %210, %cst_139 [2] : vector<4x8x8xf32> to vector<4x8xf32>
    %212 = vector.shape_cast %211 : vector<4x8xf32> to vector<4x8x1xf32>
    %213 = tpu.reciprocal %212 {approx = true} : vector<4x8x1xf32> -> vector<4x8x1xf32>
    %214 = vector.broadcast %213 : vector<4x8x1xf32> to vector<4x8x8xf32>
    %215 = arith.mulf %210, %214 : vector<4x8x8xf32>
    "tpu.trace_start"() <{level = 10 : i32, message = "hqk,hkd->hqd"}> : () -> ()
    %cst_140 = arith.constant dense<0.000000e+00> : vector<4x8x8xf32>
    %216 = tpu.matmul %215, %202, %cst_140 {dimension_numbers = #tpu.dot_dimension_numbers<[2], [1], [1], [2], [0, 0, 0, 1, 1, 2], [0], [0]>} : vector<4x8x8xf32>, vector<4x8x8xf32>, vector<4x8x8xf32> -> vector<4x8x8xf32>
    "tpu.trace_stop"() : () -> ()
    %c1_141 = arith.constant 1 : index
    %c0_142 = arith.constant 0 : index
    %c0_143 = arith.constant 0 : index
    %c0_144 = arith.constant 0 : index
    %217 = vector.load %arg17[%c1_141, %c0_142, %c0_143, %c0_144] : memref<2x4x8x32xf32, #tpu.memory_space<vmem>>, vector<1x4x8x32xf32>
    %218 = vector.shape_cast %217 : vector<1x4x8x32xf32> to vector<4x8x32xf32>
    "tpu.trace_start"() <{level = 10 : i32, message = "hqd,hdm->hqm"}> : () -> ()
    %cst_145 = arith.constant dense<0.000000e+00> : vector<4x8x32xf32>
    %219 = tpu.matmul %216, %218, %cst_145 {dimension_numbers = #tpu.dot_dimension_numbers<[2], [1], [1], [2], [0, 0, 0, 1, 1, 2], [0], [0]>} : vector<4x8x8xf32>, vector<4x8x32xf32>, vector<4x8x32xf32> -> vector<4x8x32xf32>
    "tpu.trace_stop"() : () -> ()
    %cst_146 = arith.constant dense<0.000000e+00> : vector<8x32xf32>
    %220 = vector.multi_reduction <add>, %219, %cst_146 [0] : vector<4x8x32xf32> to vector<8x32xf32>
    %c1_147 = arith.constant 1 : index
    %c0_148 = arith.constant 0 : index
    %c0_149 = arith.constant 0 : index
    %221 = vector.load %arg18[%c1_147, %c0_148, %c0_149] : memref<2x1x32xf32, #tpu.memory_space<vmem>>, vector<1x1x32xf32>
    %222 = vector.shape_cast %221 : vector<1x1x32xf32> to vector<1x32xf32>
    %223 = vector.broadcast %222 : vector<1x32xf32> to vector<8x32xf32>
    %224 = arith.addf %220, %223 : vector<8x32xf32>
    %225 = arith.addf %153, %224 : vector<8x32xf32>
    %c1_150 = arith.constant 1 : index
    %c0_151 = arith.constant 0 : index
    %c0_152 = arith.constant 0 : index
    %226 = vector.load %arg19[%c1_150, %c0_151, %c0_152] : memref<2x1x32xf32, #tpu.memory_space<vmem>>, vector<1x1x32xf32>
    %227 = vector.shape_cast %226 : vector<1x1x32xf32> to vector<1x32xf32>
    %c1_153 = arith.constant 1 : index
    %c0_154 = arith.constant 0 : index
    %c0_155 = arith.constant 0 : index
    %228 = vector.load %arg20[%c1_153, %c0_154, %c0_155] : memref<2x1x32xf32, #tpu.memory_space<vmem>>, vector<1x1x32xf32>
    %229 = vector.shape_cast %228 : vector<1x1x32xf32> to vector<1x32xf32>
    %cst_156 = arith.constant dense<0.000000e+00> : vector<8xf32>
    %230 = vector.multi_reduction <add>, %225, %cst_156 [1] : vector<8x32xf32> to vector<8xf32>
    %231 = vector.shape_cast %230 : vector<8xf32> to vector<8x1xf32>
    %cst_157 = arith.constant 3.200000e+01 : f32
    %232 = vector.broadcast %cst_157 : f32 to vector<8x1xf32>
    %233 = arith.divf %231, %232 : vector<8x1xf32>
    %234 = vector.broadcast %233 : vector<8x1xf32> to vector<8x32xf32>
    %235 = arith.subf %225, %234 : vector<8x32xf32>
    %236 = arith.mulf %235, %235 : vector<8x32xf32>
    %cst_158 = arith.constant dense<0.000000e+00> : vector<8xf32>
    %237 = vector.multi_reduction <add>, %236, %cst_158 [1] : vector<8x32xf32> to vector<8xf32>
    %238 = vector.shape_cast %237 : vector<8xf32> to vector<8x1xf32>
    %cst_159 = arith.constant 3.200000e+01 : f32
    %239 = vector.broadcast %cst_159 : f32 to vector<8x1xf32>
    %240 = arith.divf %238, %239 : vector<8x1xf32>
    %241 = vector.broadcast %233 : vector<8x1xf32> to vector<8x32xf32>
    %242 = arith.subf %225, %241 : vector<8x32xf32>
    %cst_160 = arith.constant 9.99999974E-6 : f32
    %243 = vector.broadcast %cst_160 : f32 to vector<8x1xf32>
    %244 = arith.addf %240, %243 : vector<8x1xf32>
    %245 = math.rsqrt %244 : vector<8x1xf32>
    %246 = vector.broadcast %245 : vector<8x1xf32> to vector<8x32xf32>
    %247 = arith.mulf %242, %246 : vector<8x32xf32>
    %248 = vector.broadcast %227 : vector<1x32xf32> to vector<8x32xf32>
    %249 = arith.mulf %247, %248 : vector<8x32xf32>
    %250 = vector.broadcast %229 : vector<1x32xf32> to vector<8x32xf32>
    %251 = arith.addf %249, %250 : vector<8x32xf32>
    %c1_161 = arith.constant 1 : index
    %c0_162 = arith.constant 0 : index
    %c0_163 = arith.constant 0 : index
    %252 = vector.load %arg21[%c1_161, %c0_162, %c0_163] : memref<2x32x64xf32, #tpu.memory_space<vmem>>, vector<1x32x64xf32>
    %253 = vector.shape_cast %252 : vector<1x32x64xf32> to vector<32x64xf32>
    %cst_164 = arith.constant dense<0.000000e+00> : vector<8x64xf32>
    %254 = tpu.matmul %251, %253, %cst_164 {dimension_numbers = #tpu.dot_dimension_numbers<[1], [0], [0], [1], [0, 0, 1, 1], [], []>} : vector<8x32xf32>, vector<32x64xf32>, vector<8x64xf32> -> vector<8x64xf32>
    %c1_165 = arith.constant 1 : index
    %c0_166 = arith.constant 0 : index
    %c0_167 = arith.constant 0 : index
    %255 = vector.load %arg22[%c1_165, %c0_166, %c0_167] : memref<2x1x64xf32, #tpu.memory_space<vmem>>, vector<1x1x64xf32>
    %256 = vector.shape_cast %255 : vector<1x1x64xf32> to vector<1x64xf32>
    %257 = vector.broadcast %256 : vector<1x64xf32> to vector<8x64xf32>
    %258 = arith.addf %254, %257 : vector<8x64xf32>
    %259 = arith.mulf %258, %258 : vector<8x64xf32>
    %260 = arith.mulf %258, %259 : vector<8x64xf32>
    %cst_168 = arith.constant 4.471500e-02 : f32
    %261 = vector.broadcast %cst_168 : f32 to vector<8x64xf32>
    %262 = arith.mulf %261, %260 : vector<8x64xf32>
    %263 = arith.addf %258, %262 : vector<8x64xf32>
    %cst_169 = arith.constant 0.797884583 : f32
    %264 = vector.broadcast %cst_169 : f32 to vector<8x64xf32>
    %265 = arith.mulf %264, %263 : vector<8x64xf32>
    %266 = math.tanh %265 : vector<8x64xf32>
    %cst_170 = arith.constant 1.000000e+00 : f32
    %267 = vector.broadcast %cst_170 : f32 to vector<8x64xf32>
    %268 = arith.addf %267, %266 : vector<8x64xf32>
    %cst_171 = arith.constant 5.000000e-01 : f32
    %269 = vector.broadcast %cst_171 : f32 to vector<8x64xf32>
    %270 = arith.mulf %269, %268 : vector<8x64xf32>
    %271 = arith.mulf %258, %270 : vector<8x64xf32>
    %c1_172 = arith.constant 1 : index
    %c0_173 = arith.constant 0 : index
    %c0_174 = arith.constant 0 : index
    %272 = vector.load %arg23[%c1_172, %c0_173, %c0_174] : memref<2x64x32xf32, #tpu.memory_space<vmem>>, vector<1x64x32xf32>
    %273 = vector.shape_cast %272 : vector<1x64x32xf32> to vector<64x32xf32>
    %cst_175 = arith.constant dense<0.000000e+00> : vector<8x32xf32>
    %274 = tpu.matmul %271, %273, %cst_175 {dimension_numbers = #tpu.dot_dimension_numbers<[1], [0], [0], [1], [0, 0, 1, 1], [], []>} : vector<8x64xf32>, vector<64x32xf32>, vector<8x32xf32> -> vector<8x32xf32>
    %c1_176 = arith.constant 1 : index
    %c0_177 = arith.constant 0 : index
    %c0_178 = arith.constant 0 : index
    %275 = vector.load %arg24[%c1_176, %c0_177, %c0_178] : memref<2x1x32xf32, #tpu.memory_space<vmem>>, vector<1x1x32xf32>
    %276 = vector.shape_cast %275 : vector<1x1x32xf32> to vector<1x32xf32>
    %277 = vector.broadcast %276 : vector<1x32xf32> to vector<8x32xf32>
    %278 = arith.addf %274, %277 : vector<8x32xf32>
    %279 = arith.addf %225, %278 : vector<8x32xf32>
    %280 = arith.mulf %279, %279 : vector<8x32xf32>
    %cst_179 = arith.constant dense<0.000000e+00> : vector<8xf32>
    %281 = vector.multi_reduction <add>, %280, %cst_179 [1] : vector<8x32xf32> to vector<8xf32>
    %282 = vector.shape_cast %281 : vector<8xf32> to vector<8x1xf32>
    %cst_180 = arith.constant 9.99999996E-13 : f32
    %283 = vector.broadcast %cst_180 : f32 to vector<8x1xf32>
    %284 = arith.addf %282, %283 : vector<8x1xf32>
    %285 = math.rsqrt %284 : vector<8x1xf32>
    %286 = vector.broadcast %285 : vector<8x1xf32> to vector<8x32xf32>
    %287 = arith.mulf %279, %286 : vector<8x32xf32>
    %c0_181 = arith.constant 0 : index
    %c0_182 = arith.constant 0 : index
    %288 = vector.load %arg41[%c0_181, %c0_182] : memref<64x32xf32, #tpu.memory_space<vmem>>, vector<64x32xf32>
    %289 = arith.mulf %288, %288 : vector<64x32xf32>
    %cst_183 = arith.constant dense<0.000000e+00> : vector<64xf32>
    %290 = vector.multi_reduction <add>, %289, %cst_183 [1] : vector<64x32xf32> to vector<64xf32>
    %291 = vector.shape_cast %290 : vector<64xf32> to vector<64x1xf32>
    %cst_184 = arith.constant 9.99999996E-13 : f32
    %292 = vector.broadcast %cst_184 : f32 to vector<64x1xf32>
    %293 = arith.addf %291, %292 : vector<64x1xf32>
    %294 = math.rsqrt %293 : vector<64x1xf32>
    %295 = vector.broadcast %294 : vector<64x1xf32> to vector<64x32xf32>
    %296 = arith.mulf %288, %295 : vector<64x32xf32>
    "tpu.trace_start"() <{level = 10 : i32, message = "td,cd->tc"}> : () -> ()
    %cst_185 = arith.constant dense<0.000000e+00> : vector<8x64xf32>
    %297 = tpu.matmul %287, %296, %cst_185 {dimension_numbers = #tpu.dot_dimension_numbers<[1], [1], [0], [0], [0, 0, 1, 0], [], []>} : vector<8x32xf32>, vector<64x32xf32>, vector<8x64xf32> -> vector<8x64xf32>
    "tpu.trace_stop"() : () -> ()
    %298 = tpu.iota {dimensions = array<i32: 1>} : vector<8x64xi32>
    %cst_186 = arith.constant dense<0xFF800000> : vector<8xf32>
    %299 = vector.multi_reduction <maximumf>, %297, %cst_186 [1] : vector<8x64xf32> to vector<8xf32>
    %300 = vector.shape_cast %299 : vector<8xf32> to vector<8x1xf32>
    %301 = vector.broadcast %300 : vector<8x1xf32> to vector<8x64xf32>
    %302 = arith.cmpf oge, %297, %301 : vector<8x64xf32>
    %c64_i32 = arith.constant 64 : i32
    %303 = vector.broadcast %c64_i32 : i32 to vector<8x64xi32>
    %304 = arith.select %302, %298, %303 : vector<8x64xi1>, vector<8x64xi32>
    %cst_187 = arith.constant dense<2147483647> : vector<8xi32>
    %305 = vector.multi_reduction <minsi>, %304, %cst_187 [1] : vector<8x64xi32> to vector<8xi32>
    %306 = vector.shape_cast %305 : vector<8xi32> to vector<8x1xi32>
    %307 = vector.broadcast %306 : vector<8x1xi32> to vector<8x64xi32>
    %308 = arith.cmpi eq, %298, %307 : vector<8x64xi32>
    %309 = arith.extui %308 : vector<8x64xi1> to vector<8x64xi32>
    %310 = arith.sitofp %309 : vector<8x64xi32> to vector<8x64xf32>
    %cst_188 = arith.constant dense<0.000000e+00> : vector<8x32xf32>
    %311 = tpu.matmul %310, %296, %cst_188 {dimension_numbers = #tpu.dot_dimension_numbers<[1], [0], [0], [1], [0, 0, 1, 1], [], []>} : vector<8x64xf32>, vector<64x32xf32>, vector<8x32xf32> -> vector<8x32xf32>
    %312 = arith.subf %311, %287 : vector<8x32xf32>
    %313 = arith.mulf %312, %312 : vector<8x32xf32>
    %314 = vector.shape_cast %313 : vector<8x32xf32> to vector<1x8x32xf32>
    %cst_189 = arith.constant dense<0.000000e+00> : vector<1xf32>
    %315 = vector.multi_reduction <add>, %314, %cst_189 [1, 2] : vector<1x8x32xf32> to vector<1xf32>
    %316 = vector.shape_cast %315 : vector<1xf32> to vector<1x1x1xf32>
    %317 = vector.extract %316[0, 0, 0] : f32 from vector<1x1x1xf32>
    %318 = vector.broadcast %317 : f32 to vector<1x1xf32>
    %c0_190 = arith.constant 0 : index
    %c0_191 = arith.constant 0 : index
    %c0_192 = arith.constant 0 : index
    %319 = vector.load %arg49[%c0_190, %c0_191, %c0_192] : memref<1x1x1xf32, #tpu.memory_space<vmem>>, vector<1x1x1xf32>
    %320 = vector.shape_cast %319 : vector<1x1x1xf32> to vector<1x1xf32>
    %321 = vector.shape_cast %318 : vector<1x1xf32> to vector<1x1x1xf32>
    tpu.vector_store %arg49[%c0_190, %c0_191, %c0_192], %321 {strides = array<i32>} : memref<1x1x1xf32, #tpu.memory_space<vmem>>, vector<1x1x1xf32>,
    %322 = arith.addf %311, %2 : vector<8x32xf32>
    %c0_193 = arith.constant 0 : index
    %c0_194 = arith.constant 0 : index
    %c0_195 = arith.constant 0 : index
    %323 = vector.load %arg25[%c0_193, %c0_194, %c0_195] : memref<2x1x32xf32, #tpu.memory_space<vmem>>, vector<1x1x32xf32>
    %324 = vector.shape_cast %323 : vector<1x1x32xf32> to vector<1x32xf32>
    %c0_196 = arith.constant 0 : index
    %c0_197 = arith.constant 0 : index
    %c0_198 = arith.constant 0 : index
    %325 = vector.load %arg26[%c0_196, %c0_197, %c0_198] : memref<2x1x32xf32, #tpu.memory_space<vmem>>, vector<1x1x32xf32>
    %326 = vector.shape_cast %325 : vector<1x1x32xf32> to vector<1x32xf32>
    %cst_199 = arith.constant dense<0.000000e+00> : vector<8xf32>
    %327 = vector.multi_reduction <add>, %322, %cst_199 [1] : vector<8x32xf32> to vector<8xf32>
    %328 = vector.shape_cast %327 : vector<8xf32> to vector<8x1xf32>
    %cst_200 = arith.constant 3.200000e+01 : f32
    %329 = vector.broadcast %cst_200 : f32 to vector<8x1xf32>
    %330 = arith.divf %328, %329 : vector<8x1xf32>
    %331 = vector.broadcast %330 : vector<8x1xf32> to vector<8x32xf32>
    %332 = arith.subf %322, %331 : vector<8x32xf32>
    %333 = arith.mulf %332, %332 : vector<8x32xf32>
    %cst_201 = arith.constant dense<0.000000e+00> : vector<8xf32>
    %334 = vector.multi_reduction <add>, %333, %cst_201 [1] : vector<8x32xf32> to vector<8xf32>
    %335 = vector.shape_cast %334 : vector<8xf32> to vector<8x1xf32>
    %cst_202 = arith.constant 3.200000e+01 : f32
    %336 = vector.broadcast %cst_202 : f32 to vector<8x1xf32>
    %337 = arith.divf %335, %336 : vector<8x1xf32>
    %338 = vector.broadcast %330 : vector<8x1xf32> to vector<8x32xf32>
    %339 = arith.subf %322, %338 : vector<8x32xf32>
    %cst_203 = arith.constant 9.99999974E-6 : f32
    %340 = vector.broadcast %cst_203 : f32 to vector<8x1xf32>
    %341 = arith.addf %337, %340 : vector<8x1xf32>
    %342 = math.rsqrt %341 : vector<8x1xf32>
    %343 = vector.broadcast %342 : vector<8x1xf32> to vector<8x32xf32>
    %344 = arith.mulf %339, %343 : vector<8x32xf32>
    %345 = vector.broadcast %324 : vector<1x32xf32> to vector<8x32xf32>
    %346 = arith.mulf %344, %345 : vector<8x32xf32>
    %347 = vector.broadcast %326 : vector<1x32xf32> to vector<8x32xf32>
    %348 = arith.addf %346, %347 : vector<8x32xf32>
    %349 = vector.shape_cast %348 : vector<8x32xf32> to vector<1x8x32xf32>
    %350 = vector.broadcast %349 : vector<1x8x32xf32> to vector<4x8x32xf32>
    %c0_204 = arith.constant 0 : index
    %c0_205 = arith.constant 0 : index
    %c0_206 = arith.constant 0 : index
    %c0_207 = arith.constant 0 : index
    %351 = vector.load %arg27[%c0_204, %c0_205, %c0_206, %c0_207] : memref<2x4x32x8xf32, #tpu.memory_space<vmem>>, vector<1x4x32x8xf32>
    %352 = vector.shape_cast %351 : vector<1x4x32x8xf32> to vector<4x32x8xf32>
    "tpu.trace_start"() <{level = 10 : i32, message = "htd,hdk->htk"}> : () -> ()
    %cst_208 = arith.constant dense<0.000000e+00> : vector<4x8x8xf32>
    %353 = tpu.matmul %350, %352, %cst_208 {dimension_numbers = #tpu.dot_dimension_numbers<[2], [1], [1], [2], [0, 0, 0, 1, 1, 2], [0], [0]>} : vector<4x8x32xf32>, vector<4x32x8xf32>, vector<4x8x8xf32> -> vector<4x8x8xf32>
    "tpu.trace_stop"() : () -> ()
    %c0_209 = arith.constant 0 : index
    %c0_210 = arith.constant 0 : index
    %c0_211 = arith.constant 0 : index
    %c0_212 = arith.constant 0 : index
    %354 = vector.load %arg30[%c0_209, %c0_210, %c0_211, %c0_212] : memref<2x4x1x8xf32, #tpu.memory_space<vmem>>, vector<1x4x1x8xf32>
    %355 = vector.shape_cast %354 : vector<1x4x1x8xf32> to vector<4x1x8xf32>
    %356 = vector.broadcast %355 : vector<4x1x8xf32> to vector<4x8x8xf32>
    %357 = arith.addf %353, %356 : vector<4x8x8xf32>
    %c0_213 = arith.constant 0 : index
    %c0_214 = arith.constant 0 : index
    %c0_215 = arith.constant 0 : index
    %c0_216 = arith.constant 0 : index
    %358 = vector.load %arg28[%c0_213, %c0_214, %c0_215, %c0_216] : memref<2x4x32x8xf32, #tpu.memory_space<vmem>>, vector<1x4x32x8xf32>
    %359 = vector.shape_cast %358 : vector<1x4x32x8xf32> to vector<4x32x8xf32>
    "tpu.trace_start"() <{level = 10 : i32, message = "htd,hdk->htk"}> : () -> ()
    %cst_217 = arith.constant dense<0.000000e+00> : vector<4x8x8xf32>
    %360 = tpu.matmul %350, %359, %cst_217 {dimension_numbers = #tpu.dot_dimension_numbers<[2], [1], [1], [2], [0, 0, 0, 1, 1, 2], [0], [0]>} : vector<4x8x32xf32>, vector<4x32x8xf32>, vector<4x8x8xf32> -> vector<4x8x8xf32>
    "tpu.trace_stop"() : () -> ()
    %c0_218 = arith.constant 0 : index
    %c0_219 = arith.constant 0 : index
    %c0_220 = arith.constant 0 : index
    %c0_221 = arith.constant 0 : index
    %361 = vector.load %arg31[%c0_218, %c0_219, %c0_220, %c0_221] : memref<2x4x1x8xf32, #tpu.memory_space<vmem>>, vector<1x4x1x8xf32>
    %362 = vector.shape_cast %361 : vector<1x4x1x8xf32> to vector<4x1x8xf32>
    %363 = vector.broadcast %362 : vector<4x1x8xf32> to vector<4x8x8xf32>
    %364 = arith.addf %360, %363 : vector<4x8x8xf32>
    %c0_222 = arith.constant 0 : index
    %c0_223 = arith.constant 0 : index
    %c0_224 = arith.constant 0 : index
    %c0_225 = arith.constant 0 : index
    %365 = vector.load %arg29[%c0_222, %c0_223, %c0_224, %c0_225] : memref<2x4x32x8xf32, #tpu.memory_space<vmem>>, vector<1x4x32x8xf32>
    %366 = vector.shape_cast %365 : vector<1x4x32x8xf32> to vector<4x32x8xf32>
    "tpu.trace_start"() <{level = 10 : i32, message = "htd,hdk->htk"}> : () -> ()
    %cst_226 = arith.constant dense<0.000000e+00> : vector<4x8x8xf32>
    %367 = tpu.matmul %350, %366, %cst_226 {dimension_numbers = #tpu.dot_dimension_numbers<[2], [1], [1], [2], [0, 0, 0, 1, 1, 2], [0], [0]>} : vector<4x8x32xf32>, vector<4x32x8xf32>, vector<4x8x8xf32> -> vector<4x8x8xf32>
    "tpu.trace_stop"() : () -> ()
    %c0_227 = arith.constant 0 : index
    %c0_228 = arith.constant 0 : index
    %c0_229 = arith.constant 0 : index
    %c0_230 = arith.constant 0 : index
    %368 = vector.load %arg32[%c0_227, %c0_228, %c0_229, %c0_230] : memref<2x4x1x8xf32, #tpu.memory_space<vmem>>, vector<1x4x1x8xf32>
    %369 = vector.shape_cast %368 : vector<1x4x1x8xf32> to vector<4x1x8xf32>
    %370 = vector.broadcast %369 : vector<4x1x8xf32> to vector<4x8x8xf32>
    %371 = arith.addf %367, %370 : vector<4x8x8xf32>
    "tpu.trace_start"() <{level = 10 : i32, message = "hqd,hkd->hqk"}> : () -> ()
    %cst_231 = arith.constant dense<0.000000e+00> : vector<4x8x8xf32>
    %372 = tpu.matmul %357, %364, %cst_231 {dimension_numbers = #tpu.dot_dimension_numbers<[2], [2], [1], [1], [0, 0, 0, 1, 1, 1], [0], [0]>} : vector<4x8x8xf32>, vector<4x8x8xf32>, vector<4x8x8xf32> -> vector<4x8x8xf32>
    "tpu.trace_stop"() : () -> ()
    %cst_232 = arith.constant 0.353553385 : f32
    %373 = vector.broadcast %cst_232 : f32 to vector<4x8x8xf32>
    %374 = arith.mulf %372, %373 : vector<4x8x8xf32>
    %cst_233 = arith.constant dense<0xFF800000> : vector<4x8xf32>
    %375 = vector.multi_reduction <maximumf>, %374, %cst_233 [2] : vector<4x8x8xf32> to vector<4x8xf32>
    %376 = vector.shape_cast %375 : vector<4x8xf32> to vector<4x8x1xf32>
    %377 = vector.broadcast %376 : vector<4x8x1xf32> to vector<4x8x8xf32>
    %378 = arith.subf %374, %377 : vector<4x8x8xf32>
    %379 = math.exp %378 : vector<4x8x8xf32>
    %cst_234 = arith.constant dense<0.000000e+00> : vector<4x8xf32>
    %380 = vector.multi_reduction <add>, %379, %cst_234 [2] : vector<4x8x8xf32> to vector<4x8xf32>
    %381 = vector.shape_cast %380 : vector<4x8xf32> to vector<4x8x1xf32>
    %382 = tpu.reciprocal %381 {approx = true} : vector<4x8x1xf32> -> vector<4x8x1xf32>
    %383 = vector.broadcast %382 : vector<4x8x1xf32> to vector<4x8x8xf32>
    %384 = arith.mulf %379, %383 : vector<4x8x8xf32>
    "tpu.trace_start"() <{level = 10 : i32, message = "hqk,hkd->hqd"}> : () -> ()
    %cst_235 = arith.constant dense<0.000000e+00> : vector<4x8x8xf32>
    %385 = tpu.matmul %384, %371, %cst_235 {dimension_numbers = #tpu.dot_dimension_numbers<[2], [1], [1], [2], [0, 0, 0, 1, 1, 2], [0], [0]>} : vector<4x8x8xf32>, vector<4x8x8xf32>, vector<4x8x8xf32> -> vector<4x8x8xf32>
    "tpu.trace_stop"() : () -> ()
    %c0_236 = arith.constant 0 : index
    %c0_237 = arith.constant 0 : index
    %c0_238 = arith.constant 0 : index
    %c0_239 = arith.constant 0 : index
    %386 = vector.load %arg33[%c0_236, %c0_237, %c0_238, %c0_239] : memref<2x4x8x32xf32, #tpu.memory_space<vmem>>, vector<1x4x8x32xf32>
    %387 = vector.shape_cast %386 : vector<1x4x8x32xf32> to vector<4x8x32xf32>
    "tpu.trace_start"() <{level = 10 : i32, message = "hqd,hdm->hqm"}> : () -> ()
    %cst_240 = arith.constant dense<0.000000e+00> : vector<4x8x32xf32>
    %388 = tpu.matmul %385, %387, %cst_240 {dimension_numbers = #tpu.dot_dimension_numbers<[2], [1], [1], [2], [0, 0, 0, 1, 1, 2], [0], [0]>} : vector<4x8x8xf32>, vector<4x8x32xf32>, vector<4x8x32xf32> -> vector<4x8x32xf32>
    "tpu.trace_stop"() : () -> ()
    %cst_241 = arith.constant dense<0.000000e+00> : vector<8x32xf32>
    %389 = vector.multi_reduction <add>, %388, %cst_241 [0] : vector<4x8x32xf32> to vector<8x32xf32>
    %c0_242 = arith.constant 0 : index
    %c0_243 = arith.constant 0 : index
    %c0_244 = arith.constant 0 : index
    %390 = vector.load %arg34[%c0_242, %c0_243, %c0_244] : memref<2x1x32xf32, #tpu.memory_space<vmem>>, vector<1x1x32xf32>
    %391 = vector.shape_cast %390 : vector<1x1x32xf32> to vector<1x32xf32>
    %392 = vector.broadcast %391 : vector<1x32xf32> to vector<8x32xf32>
    %393 = arith.addf %389, %392 : vector<8x32xf32>
    %394 = arith.addf %322, %393 : vector<8x32xf32>
    %c0_245 = arith.constant 0 : index
    %c0_246 = arith.constant 0 : index
    %c0_247 = arith.constant 0 : index
    %395 = vector.load %arg35[%c0_245, %c0_246, %c0_247] : memref<2x1x32xf32, #tpu.memory_space<vmem>>, vector<1x1x32xf32>
    %396 = vector.shape_cast %395 : vector<1x1x32xf32> to vector<1x32xf32>
    %c0_248 = arith.constant 0 : index
    %c0_249 = arith.constant 0 : index
    %c0_250 = arith.constant 0 : index
    %397 = vector.load %arg36[%c0_248, %c0_249, %c0_250] : memref<2x1x32xf32, #tpu.memory_space<vmem>>, vector<1x1x32xf32>
    %398 = vector.shape_cast %397 : vector<1x1x32xf32> to vector<1x32xf32>
    %cst_251 = arith.constant dense<0.000000e+00> : vector<8xf32>
    %399 = vector.multi_reduction <add>, %394, %cst_251 [1] : vector<8x32xf32> to vector<8xf32>
    %400 = vector.shape_cast %399 : vector<8xf32> to vector<8x1xf32>
    %cst_252 = arith.constant 3.200000e+01 : f32
    %401 = vector.broadcast %cst_252 : f32 to vector<8x1xf32>
    %402 = arith.divf %400, %401 : vector<8x1xf32>
    %403 = vector.broadcast %402 : vector<8x1xf32> to vector<8x32xf32>
    %404 = arith.subf %394, %403 : vector<8x32xf32>
    %405 = arith.mulf %404, %404 : vector<8x32xf32>
    %cst_253 = arith.constant dense<0.000000e+00> : vector<8xf32>
    %406 = vector.multi_reduction <add>, %405, %cst_253 [1] : vector<8x32xf32> to vector<8xf32>
    %407 = vector.shape_cast %406 : vector<8xf32> to vector<8x1xf32>
    %cst_254 = arith.constant 3.200000e+01 : f32
    %408 = vector.broadcast %cst_254 : f32 to vector<8x1xf32>
    %409 = arith.divf %407, %408 : vector<8x1xf32>
    %410 = vector.broadcast %402 : vector<8x1xf32> to vector<8x32xf32>
    %411 = arith.subf %394, %410 : vector<8x32xf32>
    %cst_255 = arith.constant 9.99999974E-6 : f32
    %412 = vector.broadcast %cst_255 : f32 to vector<8x1xf32>
    %413 = arith.addf %409, %412 : vector<8x1xf32>
    %414 = math.rsqrt %413 : vector<8x1xf32>
    %415 = vector.broadcast %414 : vector<8x1xf32> to vector<8x32xf32>
    %416 = arith.mulf %411, %415 : vector<8x32xf32>
    %417 = vector.broadcast %396 : vector<1x32xf32> to vector<8x32xf32>
    %418 = arith.mulf %416, %417 : vector<8x32xf32>
    %419 = vector.broadcast %398 : vector<1x32xf32> to vector<8x32xf32>
    %420 = arith.addf %418, %419 : vector<8x32xf32>
    %c0_256 = arith.constant 0 : index
    %c0_257 = arith.constant 0 : index
    %c0_258 = arith.constant 0 : index
    %421 = vector.load %arg37[%c0_256, %c0_257, %c0_258] : memref<2x32x64xf32, #tpu.memory_space<vmem>>, vector<1x32x64xf32>
    %422 = vector.shape_cast %421 : vector<1x32x64xf32> to vector<32x64xf32>
    %cst_259 = arith.constant dense<0.000000e+00> : vector<8x64xf32>
    %423 = tpu.matmul %420, %422, %cst_259 {dimension_numbers = #tpu.dot_dimension_numbers<[1], [0], [0], [1], [0, 0, 1, 1], [], []>} : vector<8x32xf32>, vector<32x64xf32>, vector<8x64xf32> -> vector<8x64xf32>
    %c0_260 = arith.constant 0 : index
    %c0_261 = arith.constant 0 : index
    %c0_262 = arith.constant 0 : index
    %424 = vector.load %arg38[%c0_260, %c0_261, %c0_262] : memref<2x1x64xf32, #tpu.memory_space<vmem>>, vector<1x1x64xf32>
    %425 = vector.shape_cast %424 : vector<1x1x64xf32> to vector<1x64xf32>
    %426 = vector.broadcast %425 : vector<1x64xf32> to vector<8x64xf32>
    %427 = arith.addf %423, %426 : vector<8x64xf32>
    %428 = arith.mulf %427, %427 : vector<8x64xf32>
    %429 = arith.mulf %427, %428 : vector<8x64xf32>
    %cst_263 = arith.constant 4.471500e-02 : f32
    %430 = vector.broadcast %cst_263 : f32 to vector<8x64xf32>
    %431 = arith.mulf %430, %429 : vector<8x64xf32>
    %432 = arith.addf %427, %431 : vector<8x64xf32>
    %cst_264 = arith.constant 0.797884583 : f32
    %433 = vector.broadcast %cst_264 : f32 to vector<8x64xf32>
    %434 = arith.mulf %433, %432 : vector<8x64xf32>
    %435 = math.tanh %434 : vector<8x64xf32>
    %cst_265 = arith.constant 1.000000e+00 : f32
    %436 = vector.broadcast %cst_265 : f32 to vector<8x64xf32>
    %437 = arith.addf %436, %435 : vector<8x64xf32>
    %cst_266 = arith.constant 5.000000e-01 : f32
    %438 = vector.broadcast %cst_266 : f32 to vector<8x64xf32>
    %439 = arith.mulf %438, %437 : vector<8x64xf32>
    %440 = arith.mulf %427, %439 : vector<8x64xf32>
    %c0_267 = arith.constant 0 : index
    %c0_268 = arith.constant 0 : index
    %c0_269 = arith.constant 0 : index
    %441 = vector.load %arg39[%c0_267, %c0_268, %c0_269] : memref<2x64x32xf32, #tpu.memory_space<vmem>>, vector<1x64x32xf32>
    %442 = vector.shape_cast %441 : vector<1x64x32xf32> to vector<64x32xf32>
    %cst_270 = arith.constant dense<0.000000e+00> : vector<8x32xf32>
    %443 = tpu.matmul %440, %442, %cst_270 {dimension_numbers = #tpu.dot_dimension_numbers<[1], [0], [0], [1], [0, 0, 1, 1], [], []>} : vector<8x64xf32>, vector<64x32xf32>, vector<8x32xf32> -> vector<8x32xf32>
    %c0_271 = arith.constant 0 : index
    %c0_272 = arith.constant 0 : index
    %c0_273 = arith.constant 0 : index
    %444 = vector.load %arg40[%c0_271, %c0_272, %c0_273] : memref<2x1x32xf32, #tpu.memory_space<vmem>>, vector<1x1x32xf32>
    %445 = vector.shape_cast %444 : vector<1x1x32xf32> to vector<1x32xf32>
    %446 = vector.broadcast %445 : vector<1x32xf32> to vector<8x32xf32>
    %447 = arith.addf %443, %446 : vector<8x32xf32>
    %448 = arith.addf %394, %447 : vector<8x32xf32>
    %c1_274 = arith.constant 1 : index
    %c0_275 = arith.constant 0 : index
    %c0_276 = arith.constant 0 : index
    %449 = vector.load %arg25[%c1_274, %c0_275, %c0_276] : memref<2x1x32xf32, #tpu.memory_space<vmem>>, vector<1x1x32xf32>
    %450 = vector.shape_cast %449 : vector<1x1x32xf32> to vector<1x32xf32>
    %c1_277 = arith.constant 1 : index
    %c0_278 = arith.constant 0 : index
    %c0_279 = arith.constant 0 : index
    %451 = vector.load %arg26[%c1_277, %c0_278, %c0_279] : memref<2x1x32xf32, #tpu.memory_space<vmem>>, vector<1x1x32xf32>
    %452 = vector.shape_cast %451 : vector<1x1x32xf32> to vector<1x32xf32>
    %cst_280 = arith.constant dense<0.000000e+00> : vector<8xf32>
    %453 = vector.multi_reduction <add>, %448, %cst_280 [1] : vector<8x32xf32> to vector<8xf32>
    %454 = vector.shape_cast %453 : vector<8xf32> to vector<8x1xf32>
    %cst_281 = arith.constant 3.200000e+01 : f32
    %455 = vector.broadcast %cst_281 : f32 to vector<8x1xf32>
    %456 = arith.divf %454, %455 : vector<8x1xf32>
    %457 = vector.broadcast %456 : vector<8x1xf32> to vector<8x32xf32>
    %458 = arith.subf %448, %457 : vector<8x32xf32>
    %459 = arith.mulf %458, %458 : vector<8x32xf32>
    %cst_282 = arith.constant dense<0.000000e+00> : vector<8xf32>
    %460 = vector.multi_reduction <add>, %459, %cst_282 [1] : vector<8x32xf32> to vector<8xf32>
    %461 = vector.shape_cast %460 : vector<8xf32> to vector<8x1xf32>
    %cst_283 = arith.constant 3.200000e+01 : f32
    %462 = vector.broadcast %cst_283 : f32 to vector<8x1xf32>
    %463 = arith.divf %461, %462 : vector<8x1xf32>
    %464 = vector.broadcast %456 : vector<8x1xf32> to vector<8x32xf32>
    %465 = arith.subf %448, %464 : vector<8x32xf32>
    %cst_284 = arith.constant 9.99999974E-6 : f32
    %466 = vector.broadcast %cst_284 : f32 to vector<8x1xf32>
    %467 = arith.addf %463, %466 : vector<8x1xf32>
    %468 = math.rsqrt %467 : vector<8x1xf32>
    %469 = vector.broadcast %468 : vector<8x1xf32> to vector<8x32xf32>
    %470 = arith.mulf %465, %469 : vector<8x32xf32>
    %471 = vector.broadcast %450 : vector<1x32xf32> to vector<8x32xf32>
    %472 = arith.mulf %470, %471 : vector<8x32xf32>
    %473 = vector.broadcast %452 : vector<1x32xf32> to vector<8x32xf32>
    %474 = arith.addf %472, %473 : vector<8x32xf32>
    %475 = vector.shape_cast %474 : vector<8x32xf32> to vector<1x8x32xf32>
    %476 = vector.broadcast %475 : vector<1x8x32xf32> to vector<4x8x32xf32>
    %c1_285 = arith.constant 1 : index
    %c0_286 = arith.constant 0 : index
    %c0_287 = arith.constant 0 : index
    %c0_288 = arith.constant 0 : index
    %477 = vector.load %arg27[%c1_285, %c0_286, %c0_287, %c0_288] : memref<2x4x32x8xf32, #tpu.memory_space<vmem>>, vector<1x4x32x8xf32>
    %478 = vector.shape_cast %477 : vector<1x4x32x8xf32> to vector<4x32x8xf32>
    "tpu.trace_start"() <{level = 10 : i32, message = "htd,hdk->htk"}> : () -> ()
    %cst_289 = arith.constant dense<0.000000e+00> : vector<4x8x8xf32>
    %479 = tpu.matmul %476, %478, %cst_289 {dimension_numbers = #tpu.dot_dimension_numbers<[2], [1], [1], [2], [0, 0, 0, 1, 1, 2], [0], [0]>} : vector<4x8x32xf32>, vector<4x32x8xf32>, vector<4x8x8xf32> -> vector<4x8x8xf32>
    "tpu.trace_stop"() : () -> ()
    %c1_290 = arith.constant 1 : index
    %c0_291 = arith.constant 0 : index
    %c0_292 = arith.constant 0 : index
    %c0_293 = arith.constant 0 : index
    %480 = vector.load %arg30[%c1_290, %c0_291, %c0_292, %c0_293] : memref<2x4x1x8xf32, #tpu.memory_space<vmem>>, vector<1x4x1x8xf32>
    %481 = vector.shape_cast %480 : vector<1x4x1x8xf32> to vector<4x1x8xf32>
    %482 = vector.broadcast %481 : vector<4x1x8xf32> to vector<4x8x8xf32>
    %483 = arith.addf %479, %482 : vector<4x8x8xf32>
    %c1_294 = arith.constant 1 : index
    %c0_295 = arith.constant 0 : index
    %c0_296 = arith.constant 0 : index
    %c0_297 = arith.constant 0 : index
    %484 = vector.load %arg28[%c1_294, %c0_295, %c0_296, %c0_297] : memref<2x4x32x8xf32, #tpu.memory_space<vmem>>, vector<1x4x32x8xf32>
    %485 = vector.shape_cast %484 : vector<1x4x32x8xf32> to vector<4x32x8xf32>
    "tpu.trace_start"() <{level = 10 : i32, message = "htd,hdk->htk"}> : () -> ()
    %cst_298 = arith.constant dense<0.000000e+00> : vector<4x8x8xf32>
    %486 = tpu.matmul %476, %485, %cst_298 {dimension_numbers = #tpu.dot_dimension_numbers<[2], [1], [1], [2], [0, 0, 0, 1, 1, 2], [0], [0]>} : vector<4x8x32xf32>, vector<4x32x8xf32>, vector<4x8x8xf32> -> vector<4x8x8xf32>
    "tpu.trace_stop"() : () -> ()
    %c1_299 = arith.constant 1 : index
    %c0_300 = arith.constant 0 : index
    %c0_301 = arith.constant 0 : index
    %c0_302 = arith.constant 0 : index
    %487 = vector.load %arg31[%c1_299, %c0_300, %c0_301, %c0_302] : memref<2x4x1x8xf32, #tpu.memory_space<vmem>>, vector<1x4x1x8xf32>
    %488 = vector.shape_cast %487 : vector<1x4x1x8xf32> to vector<4x1x8xf32>
    %489 = vector.broadcast %488 : vector<4x1x8xf32> to vector<4x8x8xf32>
    %490 = arith.addf %486, %489 : vector<4x8x8xf32>
    %c1_303 = arith.constant 1 : index
    %c0_304 = arith.constant 0 : index
    %c0_305 = arith.constant 0 : index
    %c0_306 = arith.constant 0 : index
    %491 = vector.load %arg29[%c1_303, %c0_304, %c0_305, %c0_306] : memref<2x4x32x8xf32, #tpu.memory_space<vmem>>, vector<1x4x32x8xf32>
    %492 = vector.shape_cast %491 : vector<1x4x32x8xf32> to vector<4x32x8xf32>
    "tpu.trace_start"() <{level = 10 : i32, message = "htd,hdk->htk"}> : () -> ()
    %cst_307 = arith.constant dense<0.000000e+00> : vector<4x8x8xf32>
    %493 = tpu.matmul %476, %492, %cst_307 {dimension_numbers = #tpu.dot_dimension_numbers<[2], [1], [1], [2], [0, 0, 0, 1, 1, 2], [0], [0]>} : vector<4x8x32xf32>, vector<4x32x8xf32>, vector<4x8x8xf32> -> vector<4x8x8xf32>
    "tpu.trace_stop"() : () -> ()
    %c1_308 = arith.constant 1 : index
    %c0_309 = arith.constant 0 : index
    %c0_310 = arith.constant 0 : index
    %c0_311 = arith.constant 0 : index
    %494 = vector.load %arg32[%c1_308, %c0_309, %c0_310, %c0_311] : memref<2x4x1x8xf32, #tpu.memory_space<vmem>>, vector<1x4x1x8xf32>
    %495 = vector.shape_cast %494 : vector<1x4x1x8xf32> to vector<4x1x8xf32>
    %496 = vector.broadcast %495 : vector<4x1x8xf32> to vector<4x8x8xf32>
    %497 = arith.addf %493, %496 : vector<4x8x8xf32>
    "tpu.trace_start"() <{level = 10 : i32, message = "hqd,hkd->hqk"}> : () -> ()
    %cst_312 = arith.constant dense<0.000000e+00> : vector<4x8x8xf32>
    %498 = tpu.matmul %483, %490, %cst_312 {dimension_numbers = #tpu.dot_dimension_numbers<[2], [2], [1], [1], [0, 0, 0, 1, 1, 1], [0], [0]>} : vector<4x8x8xf32>, vector<4x8x8xf32>, vector<4x8x8xf32> -> vector<4x8x8xf32>
    "tpu.trace_stop"() : () -> ()
    %cst_313 = arith.constant 0.353553385 : f32
    %499 = vector.broadcast %cst_313 : f32 to vector<4x8x8xf32>
    %500 = arith.mulf %498, %499 : vector<4x8x8xf32>
    %cst_314 = arith.constant dense<0xFF800000> : vector<4x8xf32>
    %501 = vector.multi_reduction <maximumf>, %500, %cst_314 [2] : vector<4x8x8xf32> to vector<4x8xf32>
    %502 = vector.shape_cast %501 : vector<4x8xf32> to vector<4x8x1xf32>
    %503 = vector.broadcast %502 : vector<4x8x1xf32> to vector<4x8x8xf32>
    %504 = arith.subf %500, %503 : vector<4x8x8xf32>
    %505 = math.exp %504 : vector<4x8x8xf32>
    %cst_315 = arith.constant dense<0.000000e+00> : vector<4x8xf32>
    %506 = vector.multi_reduction <add>, %505, %cst_315 [2] : vector<4x8x8xf32> to vector<4x8xf32>
    %507 = vector.shape_cast %506 : vector<4x8xf32> to vector<4x8x1xf32>
    %508 = tpu.reciprocal %507 {approx = true} : vector<4x8x1xf32> -> vector<4x8x1xf32>
    %509 = vector.broadcast %508 : vector<4x8x1xf32> to vector<4x8x8xf32>
    %510 = arith.mulf %505, %509 : vector<4x8x8xf32>
    "tpu.trace_start"() <{level = 10 : i32, message = "hqk,hkd->hqd"}> : () -> ()
    %cst_316 = arith.constant dense<0.000000e+00> : vector<4x8x8xf32>
    %511 = tpu.matmul %510, %497, %cst_316 {dimension_numbers = #tpu.dot_dimension_numbers<[2], [1], [1], [2], [0, 0, 0, 1, 1, 2], [0], [0]>} : vector<4x8x8xf32>, vector<4x8x8xf32>, vector<4x8x8xf32> -> vector<4x8x8xf32>
    "tpu.trace_stop"() : () -> ()
    %c1_317 = arith.constant 1 : index
    %c0_318 = arith.constant 0 : index
    %c0_319 = arith.constant 0 : index
    %c0_320 = arith.constant 0 : index
    %512 = vector.load %arg33[%c1_317, %c0_318, %c0_319, %c0_320] : memref<2x4x8x32xf32, #tpu.memory_space<vmem>>, vector<1x4x8x32xf32>
    %513 = vector.shape_cast %512 : vector<1x4x8x32xf32> to vector<4x8x32xf32>
    "tpu.trace_start"() <{level = 10 : i32, message = "hqd,hdm->hqm"}> : () -> ()
    %cst_321 = arith.constant dense<0.000000e+00> : vector<4x8x32xf32>
    %514 = tpu.matmul %511, %513, %cst_321 {dimension_numbers = #tpu.dot_dimension_numbers<[2], [1], [1], [2], [0, 0, 0, 1, 1, 2], [0], [0]>} : vector<4x8x8xf32>, vector<4x8x32xf32>, vector<4x8x32xf32> -> vector<4x8x32xf32>
    "tpu.trace_stop"() : () -> ()
    %cst_322 = arith.constant dense<0.000000e+00> : vector<8x32xf32>
    %515 = vector.multi_reduction <add>, %514, %cst_322 [0] : vector<4x8x32xf32> to vector<8x32xf32>
    %c1_323 = arith.constant 1 : index
    %c0_324 = arith.constant 0 : index
    %c0_325 = arith.constant 0 : index
    %516 = vector.load %arg34[%c1_323, %c0_324, %c0_325] : memref<2x1x32xf32, #tpu.memory_space<vmem>>, vector<1x1x32xf32>
    %517 = vector.shape_cast %516 : vector<1x1x32xf32> to vector<1x32xf32>
    %518 = vector.broadcast %517 : vector<1x32xf32> to vector<8x32xf32>
    %519 = arith.addf %515, %518 : vector<8x32xf32>
    %520 = arith.addf %448, %519 : vector<8x32xf32>
    %c1_326 = arith.constant 1 : index
    %c0_327 = arith.constant 0 : index
    %c0_328 = arith.constant 0 : index
    %521 = vector.load %arg35[%c1_326, %c0_327, %c0_328] : memref<2x1x32xf32, #tpu.memory_space<vmem>>, vector<1x1x32xf32>
    %522 = vector.shape_cast %521 : vector<1x1x32xf32> to vector<1x32xf32>
    %c1_329 = arith.constant 1 : index
    %c0_330 = arith.constant 0 : index
    %c0_331 = arith.constant 0 : index
    %523 = vector.load %arg36[%c1_329, %c0_330, %c0_331] : memref<2x1x32xf32, #tpu.memory_space<vmem>>, vector<1x1x32xf32>
    %524 = vector.shape_cast %523 : vector<1x1x32xf32> to vector<1x32xf32>
    %cst_332 = arith.constant dense<0.000000e+00> : vector<8xf32>
    %525 = vector.multi_reduction <add>, %520, %cst_332 [1] : vector<8x32xf32> to vector<8xf32>
    %526 = vector.shape_cast %525 : vector<8xf32> to vector<8x1xf32>
    %cst_333 = arith.constant 3.200000e+01 : f32
    %527 = vector.broadcast %cst_333 : f32 to vector<8x1xf32>
    %528 = arith.divf %526, %527 : vector<8x1xf32>
    %529 = vector.broadcast %528 : vector<8x1xf32> to vector<8x32xf32>
    %530 = arith.subf %520, %529 : vector<8x32xf32>
    %531 = arith.mulf %530, %530 : vector<8x32xf32>
    %cst_334 = arith.constant dense<0.000000e+00> : vector<8xf32>
    %532 = vector.multi_reduction <add>, %531, %cst_334 [1] : vector<8x32xf32> to vector<8xf32>
    %533 = vector.shape_cast %532 : vector<8xf32> to vector<8x1xf32>
    %cst_335 = arith.constant 3.200000e+01 : f32
    %534 = vector.broadcast %cst_335 : f32 to vector<8x1xf32>
    %535 = arith.divf %533, %534 : vector<8x1xf32>
    %536 = vector.broadcast %528 : vector<8x1xf32> to vector<8x32xf32>
    %537 = arith.subf %520, %536 : vector<8x32xf32>
    %cst_336 = arith.constant 9.99999974E-6 : f32
    %538 = vector.broadcast %cst_336 : f32 to vector<8x1xf32>
    %539 = arith.addf %535, %538 : vector<8x1xf32>
    %540 = math.rsqrt %539 : vector<8x1xf32>
    %541 = vector.broadcast %540 : vector<8x1xf32> to vector<8x32xf32>
    %542 = arith.mulf %537, %541 : vector<8x32xf32>
    %543 = vector.broadcast %522 : vector<1x32xf32> to vector<8x32xf32>
    %544 = arith.mulf %542, %543 : vector<8x32xf32>
    %545 = vector.broadcast %524 : vector<1x32xf32> to vector<8x32xf32>
    %546 = arith.addf %544, %545 : vector<8x32xf32>
    %c1_337 = arith.constant 1 : index
    %c0_338 = arith.constant 0 : index
    %c0_339 = arith.constant 0 : index
    %547 = vector.load %arg37[%c1_337, %c0_338, %c0_339] : memref<2x32x64xf32, #tpu.memory_space<vmem>>, vector<1x32x64xf32>
    %548 = vector.shape_cast %547 : vector<1x32x64xf32> to vector<32x64xf32>
    %cst_340 = arith.constant dense<0.000000e+00> : vector<8x64xf32>
    %549 = tpu.matmul %546, %548, %cst_340 {dimension_numbers = #tpu.dot_dimension_numbers<[1], [0], [0], [1], [0, 0, 1, 1], [], []>} : vector<8x32xf32>, vector<32x64xf32>, vector<8x64xf32> -> vector<8x64xf32>
    %c1_341 = arith.constant 1 : index
    %c0_342 = arith.constant 0 : index
    %c0_343 = arith.constant 0 : index
    %550 = vector.load %arg38[%c1_341, %c0_342, %c0_343] : memref<2x1x64xf32, #tpu.memory_space<vmem>>, vector<1x1x64xf32>
    %551 = vector.shape_cast %550 : vector<1x1x64xf32> to vector<1x64xf32>
    %552 = vector.broadcast %551 : vector<1x64xf32> to vector<8x64xf32>
    %553 = arith.addf %549, %552 : vector<8x64xf32>
    %554 = arith.mulf %553, %553 : vector<8x64xf32>
    %555 = arith.mulf %553, %554 : vector<8x64xf32>
    %cst_344 = arith.constant 4.471500e-02 : f32
    %556 = vector.broadcast %cst_344 : f32 to vector<8x64xf32>
    %557 = arith.mulf %556, %555 : vector<8x64xf32>
    %558 = arith.addf %553, %557 : vector<8x64xf32>
    %cst_345 = arith.constant 0.797884583 : f32
    %559 = vector.broadcast %cst_345 : f32 to vector<8x64xf32>
    %560 = arith.mulf %559, %558 : vector<8x64xf32>
    %561 = math.tanh %560 : vector<8x64xf32>
    %cst_346 = arith.constant 1.000000e+00 : f32
    %562 = vector.broadcast %cst_346 : f32 to vector<8x64xf32>
    %563 = arith.addf %562, %561 : vector<8x64xf32>
    %cst_347 = arith.constant 5.000000e-01 : f32
    %564 = vector.broadcast %cst_347 : f32 to vector<8x64xf32>
    %565 = arith.mulf %564, %563 : vector<8x64xf32>
    %566 = arith.mulf %553, %565 : vector<8x64xf32>
    %c1_348 = arith.constant 1 : index
    %c0_349 = arith.constant 0 : index
    %c0_350 = arith.constant 0 : index
    %567 = vector.load %arg39[%c1_348, %c0_349, %c0_350] : memref<2x64x32xf32, #tpu.memory_space<vmem>>, vector<1x64x32xf32>
    %568 = vector.shape_cast %567 : vector<1x64x32xf32> to vector<64x32xf32>
    %cst_351 = arith.constant dense<0.000000e+00> : vector<8x32xf32>
    %569 = tpu.matmul %566, %568, %cst_351 {dimension_numbers = #tpu.dot_dimension_numbers<[1], [0], [0], [1], [0, 0, 1, 1], [], []>} : vector<8x64xf32>, vector<64x32xf32>, vector<8x32xf32> -> vector<8x32xf32>
    %c1_352 = arith.constant 1 : index
    %c0_353 = arith.constant 0 : index
    %c0_354 = arith.constant 0 : index
    %570 = vector.load %arg40[%c1_352, %c0_353, %c0_354] : memref<2x1x32xf32, #tpu.memory_space<vmem>>, vector<1x1x32xf32>
    %571 = vector.shape_cast %570 : vector<1x1x32xf32> to vector<1x32xf32>
    %572 = vector.broadcast %571 : vector<1x32xf32> to vector<8x32xf32>
    %573 = arith.addf %569, %572 : vector<8x32xf32>
    %574 = arith.addf %520, %573 : vector<8x32xf32>
    %c0_355 = arith.constant 0 : index
    %c0_356 = arith.constant 0 : index
    %575 = vector.load %arg42[%c0_355, %c0_356] : memref<32x128xf32, #tpu.memory_space<vmem>>, vector<32x128xf32>
    %cst_357 = arith.constant dense<0.000000e+00> : vector<8x128xf32>
    %576 = tpu.matmul %574, %575, %cst_357 {dimension_numbers = #tpu.dot_dimension_numbers<[1], [0], [0], [1], [0, 0, 1, 1], [], []>} : vector<8x32xf32>, vector<32x128xf32>, vector<8x128xf32> -> vector<8x128xf32>
    %c0_358 = arith.constant 0 : index
    %c0_359 = arith.constant 0 : index
    %577 = vector.load %arg43[%c0_358, %c0_359] : memref<1x128xf32, #tpu.memory_space<vmem>>, vector<1x128xf32>
    %578 = vector.broadcast %577 : vector<1x128xf32> to vector<8x128xf32>
    %579 = arith.addf %576, %578 : vector<8x128xf32>
    %c0_360 = arith.constant 0 : index
    %c0_361 = arith.constant 0 : index
    %c0_362 = arith.constant 0 : index
    %580 = vector.load %arg44[%c0_360, %c0_361, %c0_362] : memref<1x128x128xf32, #tpu.memory_space<vmem>>, vector<1x128x128xf32>
    %581 = vector.shape_cast %580 : vector<1x128x128xf32> to vector<128x128xf32>
    %cst_363 = arith.constant dense<0.000000e+00> : vector<8x128xf32>
    %582 = tpu.matmul %579, %581, %cst_363 {dimension_numbers = #tpu.dot_dimension_numbers<[1], [0], [0], [1], [0, 0, 1, 1], [], []>} : vector<8x128xf32>, vector<128x128xf32>, vector<8x128xf32> -> vector<8x128xf32>
    %c0_364 = arith.constant 0 : index
    %c0_365 = arith.constant 0 : index
    %583 = vector.load %arg45[%c0_364, %c0_365] : memref<1x128xf32, #tpu.memory_space<vmem>>, vector<1x128xf32>
    %584 = vector.broadcast %583 : vector<1x128xf32> to vector<8x128xf32>
    %585 = arith.addf %582, %584 : vector<8x128xf32>
    %c0_366 = arith.constant 0 : index
    %c0_367 = arith.constant 0 : index
    %c0_368 = arith.constant 0 : index
    %586 = vector.load %arg46[%c0_366, %c0_367, %c0_368] : memref<1x8x128xf32, #tpu.memory_space<vmem>>, vector<1x8x128xf32>
    %587 = vector.shape_cast %586 : vector<1x8x128xf32> to vector<8x128xf32>
    %588 = vector.shape_cast %585 : vector<8x128xf32> to vector<1x8x128xf32>
    tpu.vector_store %arg46[%c0_366, %c0_367, %c0_368], %588 {strides = array<i32>} : memref<1x8x128xf32, #tpu.memory_space<vmem>>, vector<1x8x128xf32>,
    %c0_369 = arith.constant 0 : index
    %c0_370 = arith.constant 0 : index
    %c0_371 = arith.constant 0 : index
    %589 = vector.load %arg3[%c0_369, %c0_370, %c0_371] : memref<1x1x128xf32, #tpu.memory_space<vmem>>, vector<1x1x128xf32>
    %590 = vector.shape_cast %589 : vector<1x1x128xf32> to vector<1x128xf32>
    %591 = arith.subf %1, %585 : vector<8x128xf32>
    %592 = arith.mulf %591, %591 : vector<8x128xf32>
    %593 = vector.broadcast %590 : vector<1x128xf32> to vector<8x128xf32>
    %594 = arith.mulf %592, %593 : vector<8x128xf32>
    %595 = vector.shape_cast %594 : vector<8x128xf32> to vector<1x8x128xf32>
    %cst_372 = arith.constant dense<0.000000e+00> : vector<1xf32>
    %596 = vector.multi_reduction <add>, %595, %cst_372 [1, 2] : vector<1x8x128xf32> to vector<1xf32>
    %597 = vector.shape_cast %596 : vector<1xf32> to vector<1x1x1xf32>
    %598 = vector.extract %597[0, 0, 0] : f32 from vector<1x1x1xf32>
    %599 = vector.broadcast %598 : f32 to vector<1x1xf32>
    %cst_373 = arith.constant 1.562500e-02 : f32
    %600 = vector.broadcast %cst_373 : f32 to vector<1x1xf32>
    %601 = arith.mulf %599, %600 : vector<1x1xf32>
    %c0_374 = arith.constant 0 : index
    %c0_375 = arith.constant 0 : index
    %c0_376 = arith.constant 0 : index
    %602 = vector.load %arg47[%c0_374, %c0_375, %c0_376] : memref<1x1x1xf32, #tpu.memory_space<vmem>>, vector<1x1x1xf32>
    %603 = vector.shape_cast %602 : vector<1x1x1xf32> to vector<1x1xf32>
    %604 = vector.shape_cast %601 : vector<1x1xf32> to vector<1x1x1xf32>
    tpu.vector_store %arg47[%c0_374, %c0_375, %c0_376], %604 {strides = array<i32>} : memref<1x1x1xf32, #tpu.memory_space<vmem>>, vector<1x1x1xf32>,
    %605 = vector.shape_cast %590 : vector<1x128xf32> to vector<1x1x128xf32>
    %cst_377 = arith.constant dense<0.000000e+00> : vector<1xf32>
    %606 = vector.multi_reduction <add>, %605, %cst_377 [1, 2] : vector<1x1x128xf32> to vector<1xf32>
    %607 = vector.shape_cast %606 : vector<1xf32> to vector<1x1x1xf32>
    %608 = vector.extract %607[0, 0, 0] : f32 from vector<1x1x1xf32>
    %609 = vector.broadcast %608 : f32 to vector<1x1xf32>
    %cst_378 = arith.constant 1.250000e-01 : f32
    %610 = vector.broadcast %cst_378 : f32 to vector<1x1xf32>
    %611 = arith.mulf %609, %610 : vector<1x1xf32>
    %c0_379 = arith.constant 0 : index
    %c0_380 = arith.constant 0 : index
    %c0_381 = arith.constant 0 : index
    %612 = vector.load %arg48[%c0_379, %c0_380, %c0_381] : memref<1x1x1xf32, #tpu.memory_space<vmem>>, vector<1x1x1xf32>
    %613 = vector.shape_cast %612 : vector<1x1x1xf32> to vector<1x1xf32>
    %614 = vector.shape_cast %611 : vector<1x1xf32> to vector<1x1x1xf32>
    tpu.vector_store %arg48[%c0_379, %c0_380, %c0_381], %614 {strides = array<i32>} : memref<1x1x1xf32, #tpu.memory_space<vmem>>, vector<1x1x1xf32>,
    return
  }
  func.func @transform_0(%arg0: i32, %arg1: memref<2xi32, #tpu.memory_space<smem>>) -> (i32, i32, i32) {
    %c0_i32 = arith.constant 0 : i32
    %c0_i32_0 = arith.constant 0 : i32
    %c0_i32_1 = arith.constant 0 : i32
    return %arg0, %c0_i32, %c0_i32_0 : i32, i32, i32
  }
  func.func @transform_1(%arg0: i32, %arg1: memref<2xi32, #tpu.memory_space<smem>>) -> (i32, i32, i32) {
    %c0_i32 = arith.constant 0 : i32
    %c0_i32_0 = arith.constant 0 : i32
    %c0_i32_1 = arith.constant 0 : i32
    return %arg0, %c0_i32, %c0_i32_0 : i32, i32, i32
  }
  func.func @transform_2(%arg0: i32, %arg1: memref<2xi32, #tpu.memory_space<smem>>) -> (i32, i32, i32) {
    %0 = arith.index_cast %arg0 : i32 to index
    %1 = memref.load %arg1[%0] : memref<2xi32, #tpu.memory_space<smem>>
    %c0_i32 = arith.constant 0 : i32
    %c0_i32_0 = arith.constant 0 : i32
    %c0_i32_1 = arith.constant 0 : i32
    return %1, %c0_i32, %c0_i32_0 : i32, i32, i32
  }
  func.func @transform_3(%arg0: i32, %arg1: memref<2xi32, #tpu.memory_space<smem>>) -> (i32, i32) {
    %c0_i32 = arith.constant 0 : i32
    %c0_i32_0 = arith.constant 0 : i32
    %c0_i32_1 = arith.constant 0 : i32
    return %c0_i32, %c0_i32_0 : i32, i32
  }
  func.func @transform_4(%arg0: i32, %arg1: memref<2xi32, #tpu.memory_space<smem>>) -> (i32, i32) {
    %c0_i32 = arith.constant 0 : i32
    %c0_i32_0 = arith.constant 0 : i32
    %c0_i32_1 = arith.constant 0 : i32
    return %c0_i32, %c0_i32_0 : i32, i32
  }
  func.func @transform_5(%arg0: i32, %arg1: memref<2xi32, #tpu.memory_space<smem>>) -> (i32, i32) {
    %c0_i32 = arith.constant 0 : i32
    %c0_i32_0 = arith.constant 0 : i32
    %c0_i32_1 = arith.constant 0 : i32
    return %c0_i32, %c0_i32_0 : i32, i32
  }
  func.func @transform_6(%arg0: i32, %arg1: memref<2xi32, #tpu.memory_space<smem>>) -> (i32, i32) {
    %c0_i32 = arith.constant 0 : i32
    %c0_i32_0 = arith.constant 0 : i32
    %c0_i32_1 = arith.constant 0 : i32
    return %c0_i32, %c0_i32_0 : i32, i32
  }
  func.func @transform_7(%arg0: i32, %arg1: memref<2xi32, #tpu.memory_space<smem>>) -> (i32, i32, i32) {
    %c0_i32 = arith.constant 0 : i32
    %c0_i32_0 = arith.constant 0 : i32
    %c0_i32_1 = arith.constant 0 : i32
    %c0_i32_2 = arith.constant 0 : i32
    return %c0_i32, %c0_i32_0, %c0_i32_1 : i32, i32, i32
  }
  func.func @transform_8(%arg0: i32, %arg1: memref<2xi32, #tpu.memory_space<smem>>) -> (i32, i32, i32) {
    %c0_i32 = arith.constant 0 : i32
    %c0_i32_0 = arith.constant 0 : i32
    %c0_i32_1 = arith.constant 0 : i32
    %c0_i32_2 = arith.constant 0 : i32
    return %c0_i32, %c0_i32_0, %c0_i32_1 : i32, i32, i32
  }
  func.func @transform_9(%arg0: i32, %arg1: memref<2xi32, #tpu.memory_space<smem>>) -> (i32, i32, i32, i32) {
    %c0_i32 = arith.constant 0 : i32
    %c0_i32_0 = arith.constant 0 : i32
    %c0_i32_1 = arith.constant 0 : i32
    %c0_i32_2 = arith.constant 0 : i32
    %c0_i32_3 = arith.constant 0 : i32
    return %c0_i32, %c0_i32_0, %c0_i32_1, %c0_i32_2 : i32, i32, i32, i32
  }
  func.func @transform_10(%arg0: i32, %arg1: memref<2xi32, #tpu.memory_space<smem>>) -> (i32, i32, i32, i32) {
    %c0_i32 = arith.constant 0 : i32
    %c0_i32_0 = arith.constant 0 : i32
    %c0_i32_1 = arith.constant 0 : i32
    %c0_i32_2 = arith.constant 0 : i32
    %c0_i32_3 = arith.constant 0 : i32
    return %c0_i32, %c0_i32_0, %c0_i32_1, %c0_i32_2 : i32, i32, i32, i32
  }
  func.func @transform_11(%arg0: i32, %arg1: memref<2xi32, #tpu.memory_space<smem>>) -> (i32, i32, i32, i32) {
    %c0_i32 = arith.constant 0 : i32
    %c0_i32_0 = arith.constant 0 : i32
    %c0_i32_1 = arith.constant 0 : i32
    %c0_i32_2 = arith.constant 0 : i32
    %c0_i32_3 = arith.constant 0 : i32
    return %c0_i32, %c0_i32_0, %c0_i32_1, %c0_i32_2 : i32, i32, i32, i32
  }
  func.func @transform_12(%arg0: i32, %arg1: memref<2xi32, #tpu.memory_space<smem>>) -> (i32, i32, i32, i32) {
    %c0_i32 = arith.constant 0 : i32
    %c0_i32_0 = arith.constant 0 : i32
    %c0_i32_1 = arith.constant 0 : i32
    %c0_i32_2 = arith.constant 0 : i32
    %c0_i32_3 = arith.constant 0 : i32
    return %c0_i32, %c0_i32_0, %c0_i32_1, %c0_i32_2 : i32, i32, i32, i32
  }
  func.func @transform_13(%arg0: i32, %arg1: memref<2xi32, #tpu.memory_space<smem>>) -> (i32, i32, i32, i32) {
    %c0_i32 = arith.constant 0 : i32
    %c0_i32_0 = arith.constant 0 : i32
    %c0_i32_1 = arith.constant 0 : i32
    %c0_i32_2 = arith.constant 0 : i32
    %c0_i32_3 = arith.constant 0 : i32
    return %c0_i32, %c0_i32_0, %c0_i32_1, %c0_i32_2 : i32, i32, i32, i32
  }
  func.func @transform_14(%arg0: i32, %arg1: memref<2xi32, #tpu.memory_space<smem>>) -> (i32, i32, i32, i32) {
    %c0_i32 = arith.constant 0 : i32
    %c0_i32_0 = arith.constant 0 : i32
    %c0_i32_1 = arith.constant 0 : i32
    %c0_i32_2 = arith.constant 0 : i32
    %c0_i32_3 = arith.constant 0 : i32
    return %c0_i32, %c0_i32_0, %c0_i32_1, %c0_i32_2 : i32, i32, i32, i32
  }
  func.func @transform_15(%arg0: i32, %arg1: memref<2xi32, #tpu.memory_space<smem>>) -> (i32, i32, i32, i32) {
    %c0_i32 = arith.constant 0 : i32
    %c0_i32_0 = arith.constant 0 : i32
    %c0_i32_1 = arith.constant 0 : i32
    %c0_i32_2 = arith.constant 0 : i32
    %c0_i32_3 = arith.constant 0 : i32
    return %c0_i32, %c0_i32_0, %c0_i32_1, %c0_i32_2 : i32, i32, i32, i32
  }
  func.func @transform_16(%arg0: i32, %arg1: memref<2xi32, #tpu.memory_space<smem>>) -> (i32, i32, i32) {
    %c0_i32 = arith.constant 0 : i32
    %c0_i32_0 = arith.constant 0 : i32
    %c0_i32_1 = arith.constant 0 : i32
    %c0_i32_2 = arith.constant 0 : i32
    return %c0_i32, %c0_i32_0, %c0_i32_1 : i32, i32, i32
  }
  func.func @transform_17(%arg0: i32, %arg1: memref<2xi32, #tpu.memory_space<smem>>) -> (i32, i32, i32) {
    %c0_i32 = arith.constant 0 : i32
    %c0_i32_0 = arith.constant 0 : i32
    %c0_i32_1 = arith.constant 0 : i32
    %c0_i32_2 = arith.constant 0 : i32
    return %c0_i32, %c0_i32_0, %c0_i32_1 : i32, i32, i32
  }
  func.func @transform_18(%arg0: i32, %arg1: memref<2xi32, #tpu.memory_space<smem>>) -> (i32, i32, i32) {
    %c0_i32 = arith.constant 0 : i32
    %c0_i32_0 = arith.constant 0 : i32
    %c0_i32_1 = arith.constant 0 : i32
    %c0_i32_2 = arith.constant 0 : i32
    return %c0_i32, %c0_i32_0, %c0_i32_1 : i32, i32, i32
  }
  func.func @transform_19(%arg0: i32, %arg1: memref<2xi32, #tpu.memory_space<smem>>) -> (i32, i32, i32) {
    %c0_i32 = arith.constant 0 : i32
    %c0_i32_0 = arith.constant 0 : i32
    %c0_i32_1 = arith.constant 0 : i32
    %c0_i32_2 = arith.constant 0 : i32
    return %c0_i32, %c0_i32_0, %c0_i32_1 : i32, i32, i32
  }
  func.func @transform_20(%arg0: i32, %arg1: memref<2xi32, #tpu.memory_space<smem>>) -> (i32, i32, i32) {
    %c0_i32 = arith.constant 0 : i32
    %c0_i32_0 = arith.constant 0 : i32
    %c0_i32_1 = arith.constant 0 : i32
    %c0_i32_2 = arith.constant 0 : i32
    return %c0_i32, %c0_i32_0, %c0_i32_1 : i32, i32, i32
  }
  func.func @transform_21(%arg0: i32, %arg1: memref<2xi32, #tpu.memory_space<smem>>) -> (i32, i32, i32) {
    %c0_i32 = arith.constant 0 : i32
    %c0_i32_0 = arith.constant 0 : i32
    %c0_i32_1 = arith.constant 0 : i32
    %c0_i32_2 = arith.constant 0 : i32
    return %c0_i32, %c0_i32_0, %c0_i32_1 : i32, i32, i32
  }
  func.func @transform_22(%arg0: i32, %arg1: memref<2xi32, #tpu.memory_space<smem>>) -> (i32, i32, i32) {
    %c0_i32 = arith.constant 0 : i32
    %c0_i32_0 = arith.constant 0 : i32
    %c0_i32_1 = arith.constant 0 : i32
    %c0_i32_2 = arith.constant 0 : i32
    return %c0_i32, %c0_i32_0, %c0_i32_1 : i32, i32, i32
  }
  func.func @transform_23(%arg0: i32, %arg1: memref<2xi32, #tpu.memory_space<smem>>) -> (i32, i32, i32) {
    %c0_i32 = arith.constant 0 : i32
    %c0_i32_0 = arith.constant 0 : i32
    %c0_i32_1 = arith.constant 0 : i32
    %c0_i32_2 = arith.constant 0 : i32
    return %c0_i32, %c0_i32_0, %c0_i32_1 : i32, i32, i32
  }
  func.func @transform_24(%arg0: i32, %arg1: memref<2xi32, #tpu.memory_space<smem>>) -> (i32, i32, i32) {
    %c0_i32 = arith.constant 0 : i32
    %c0_i32_0 = arith.constant 0 : i32
    %c0_i32_1 = arith.constant 0 : i32
    %c0_i32_2 = arith.constant 0 : i32
    return %c0_i32, %c0_i32_0, %c0_i32_1 : i32, i32, i32
  }
  func.func @transform_25(%arg0: i32, %arg1: memref<2xi32, #tpu.memory_space<smem>>) -> (i32, i32, i32, i32) {
    %c0_i32 = arith.constant 0 : i32
    %c0_i32_0 = arith.constant 0 : i32
    %c0_i32_1 = arith.constant 0 : i32
    %c0_i32_2 = arith.constant 0 : i32
    %c0_i32_3 = arith.constant 0 : i32
    return %c0_i32, %c0_i32_0, %c0_i32_1, %c0_i32_2 : i32, i32, i32, i32
  }
  func.func @transform_26(%arg0: i32, %arg1: memref<2xi32, #tpu.memory_space<smem>>) -> (i32, i32, i32, i32) {
    %c0_i32 = arith.constant 0 : i32
    %c0_i32_0 = arith.constant 0 : i32
    %c0_i32_1 = arith.constant 0 : i32
    %c0_i32_2 = arith.constant 0 : i32
    %c0_i32_3 = arith.constant 0 : i32
    return %c0_i32, %c0_i32_0, %c0_i32_1, %c0_i32_2 : i32, i32, i32, i32
  }
  func.func @transform_27(%arg0: i32, %arg1: memref<2xi32, #tpu.memory_space<smem>>) -> (i32, i32, i32, i32) {
    %c0_i32 = arith.constant 0 : i32
    %c0_i32_0 = arith.constant 0 : i32
    %c0_i32_1 = arith.constant 0 : i32
    %c0_i32_2 = arith.constant 0 : i32
    %c0_i32_3 = arith.constant 0 : i32
    return %c0_i32, %c0_i32_0, %c0_i32_1, %c0_i32_2 : i32, i32, i32, i32
  }
  func.func @transform_28(%arg0: i32, %arg1: memref<2xi32, #tpu.memory_space<smem>>) -> (i32, i32, i32, i32) {
    %c0_i32 = arith.constant 0 : i32
    %c0_i32_0 = arith.constant 0 : i32
    %c0_i32_1 = arith.constant 0 : i32
    %c0_i32_2 = arith.constant 0 : i32
    %c0_i32_3 = arith.constant 0 : i32
    return %c0_i32, %c0_i32_0, %c0_i32_1, %c0_i32_2 : i32, i32, i32, i32
  }
  func.func @transform_29(%arg0: i32, %arg1: memref<2xi32, #tpu.memory_space<smem>>) -> (i32, i32, i32, i32) {
    %c0_i32 = arith.constant 0 : i32
    %c0_i32_0 = arith.constant 0 : i32
    %c0_i32_1 = arith.constant 0 : i32
    %c0_i32_2 = arith.constant 0 : i32
    %c0_i32_3 = arith.constant 0 : i32
    return %c0_i32, %c0_i32_0, %c0_i32_1, %c0_i32_2 : i32, i32, i32, i32
  }
  func.func @transform_30(%arg0: i32, %arg1: memref<2xi32, #tpu.memory_space<smem>>) -> (i32, i32, i32, i32) {
    %c0_i32 = arith.constant 0 : i32
    %c0_i32_0 = arith.constant 0 : i32
    %c0_i32_1 = arith.constant 0 : i32
    %c0_i32_2 = arith.constant 0 : i32
    %c0_i32_3 = arith.constant 0 : i32
    return %c0_i32, %c0_i32_0, %c0_i32_1, %c0_i32_2 : i32, i32, i32, i32
  }
  func.func @transform_31(%arg0: i32, %arg1: memref<2xi32, #tpu.memory_space<smem>>) -> (i32, i32, i32, i32) {
    %c0_i32 = arith.constant 0 : i32
    %c0_i32_0 = arith.constant 0 : i32
    %c0_i32_1 = arith.constant 0 : i32
    %c0_i32_2 = arith.constant 0 : i32
    %c0_i32_3 = arith.constant 0 : i32
    return %c0_i32, %c0_i32_0, %c0_i32_1, %c0_i32_2 : i32, i32, i32, i32
  }
  func.func @transform_32(%arg0: i32, %arg1: memref<2xi32, #tpu.memory_space<smem>>) -> (i32, i32, i32) {
    %c0_i32 = arith.constant 0 : i32
    %c0_i32_0 = arith.constant 0 : i32
    %c0_i32_1 = arith.constant 0 : i32
    %c0_i32_2 = arith.constant 0 : i32
    return %c0_i32, %c0_i32_0, %c0_i32_1 : i32, i32, i32
  }
  func.func @transform_33(%arg0: i32, %arg1: memref<2xi32, #tpu.memory_space<smem>>) -> (i32, i32, i32) {
    %c0_i32 = arith.constant 0 : i32
    %c0_i32_0 = arith.constant 0 : i32
    %c0_i32_1 = arith.constant 0 : i32
    %c0_i32_2 = arith.constant 0 : i32
    return %c0_i32, %c0_i32_0, %c0_i32_1 : i32, i32, i32
  }
  func.func @transform_34(%arg0: i32, %arg1: memref<2xi32, #tpu.memory_space<smem>>) -> (i32, i32, i32) {
    %c0_i32 = arith.constant 0 : i32
    %c0_i32_0 = arith.constant 0 : i32
    %c0_i32_1 = arith.constant 0 : i32
    %c0_i32_2 = arith.constant 0 : i32
    return %c0_i32, %c0_i32_0, %c0_i32_1 : i32, i32, i32
  }
  func.func @transform_35(%arg0: i32, %arg1: memref<2xi32, #tpu.memory_space<smem>>) -> (i32, i32, i32) {
    %c0_i32 = arith.constant 0 : i32
    %c0_i32_0 = arith.constant 0 : i32
    %c0_i32_1 = arith.constant 0 : i32
    %c0_i32_2 = arith.constant 0 : i32
    return %c0_i32, %c0_i32_0, %c0_i32_1 : i32, i32, i32
  }
  func.func @transform_36(%arg0: i32, %arg1: memref<2xi32, #tpu.memory_space<smem>>) -> (i32, i32, i32) {
    %c0_i32 = arith.constant 0 : i32
    %c0_i32_0 = arith.constant 0 : i32
    %c0_i32_1 = arith.constant 0 : i32
    %c0_i32_2 = arith.constant 0 : i32
    return %c0_i32, %c0_i32_0, %c0_i32_1 : i32, i32, i32
  }
  func.func @transform_37(%arg0: i32, %arg1: memref<2xi32, #tpu.memory_space<smem>>) -> (i32, i32, i32) {
    %c0_i32 = arith.constant 0 : i32
    %c0_i32_0 = arith.constant 0 : i32
    %c0_i32_1 = arith.constant 0 : i32
    %c0_i32_2 = arith.constant 0 : i32
    return %c0_i32, %c0_i32_0, %c0_i32_1 : i32, i32, i32
  }
  func.func @transform_38(%arg0: i32, %arg1: memref<2xi32, #tpu.memory_space<smem>>) -> (i32, i32, i32) {
    %c0_i32 = arith.constant 0 : i32
    %c0_i32_0 = arith.constant 0 : i32
    %c0_i32_1 = arith.constant 0 : i32
    %c0_i32_2 = arith.constant 0 : i32
    return %c0_i32, %c0_i32_0, %c0_i32_1 : i32, i32, i32
  }
  func.func @transform_39(%arg0: i32, %arg1: memref<2xi32, #tpu.memory_space<smem>>) -> (i32, i32) {
    %c0_i32 = arith.constant 0 : i32
    %c0_i32_0 = arith.constant 0 : i32
    %c0_i32_1 = arith.constant 0 : i32
    return %c0_i32, %c0_i32_0 : i32, i32
  }
  func.func @transform_40(%arg0: i32, %arg1: memref<2xi32, #tpu.memory_space<smem>>) -> (i32, i32) {
    %c0_i32 = arith.constant 0 : i32
    %c0_i32_0 = arith.constant 0 : i32
    %c0_i32_1 = arith.constant 0 : i32
    return %c0_i32, %c0_i32_0 : i32, i32
  }
  func.func @transform_41(%arg0: i32, %arg1: memref<2xi32, #tpu.memory_space<smem>>) -> (i32, i32) {
    %c0_i32 = arith.constant 0 : i32
    %c0_i32_0 = arith.constant 0 : i32
    %c0_i32_1 = arith.constant 0 : i32
    return %c0_i32, %c0_i32_0 : i32, i32
  }
  func.func @transform_42(%arg0: i32, %arg1: memref<2xi32, #tpu.memory_space<smem>>) -> (i32, i32, i32) {
    %0 = arith.index_cast %arg0 : i32 to index
    %1 = memref.load %arg1[%0] : memref<2xi32, #tpu.memory_space<smem>>
    %c0_i32 = arith.constant 0 : i32
    %c0_i32_0 = arith.constant 0 : i32
    %c0_i32_1 = arith.constant 0 : i32
    return %1, %c0_i32, %c0_i32_0 : i32, i32, i32
  }
  func.func @transform_43(%arg0: i32, %arg1: memref<2xi32, #tpu.memory_space<smem>>) -> (i32, i32) {
    %c0_i32 = arith.constant 0 : i32
    %c0_i32_0 = arith.constant 0 : i32
    %c0_i32_1 = arith.constant 0 : i32
    return %c0_i32, %c0_i32_0 : i32, i32
  }
  func.func @transform_44(%arg0: i32, %arg1: memref<2xi32, #tpu.memory_space<smem>>) -> (i32, i32, i32) {
    %c0_i32 = arith.constant 0 : i32
    %c0_i32_0 = arith.constant 0 : i32
    %c0_i32_1 = arith.constant 0 : i32
    return %arg0, %c0_i32, %c0_i32_0 : i32, i32, i32
  }
  func.func @transform_45(%arg0: i32, %arg1: memref<2xi32, #tpu.memory_space<smem>>) -> (i32, i32, i32) {
    %c0_i32 = arith.constant 0 : i32
    %c0_i32_0 = arith.constant 0 : i32
    %c0_i32_1 = arith.constant 0 : i32
    return %arg0, %c0_i32, %c0_i32_0 : i32, i32, i32
  }
  func.func @transform_46(%arg0: i32, %arg1: memref<2xi32, #tpu.memory_space<smem>>) -> (i32, i32, i32) {
    %c0_i32 = arith.constant 0 : i32
    %c0_i32_0 = arith.constant 0 : i32
    %c0_i32_1 = arith.constant 0 : i32
    return %arg0, %c0_i32, %c0_i32_0 : i32, i32, i32
  }
  func.func @transform_47(%arg0: i32, %arg1: memref<2xi32, #tpu.memory_space<smem>>) -> (i32, i32, i32) {
    %c0_i32 = arith.constant 0 : i32
    %c0_i32_0 = arith.constant 0 : i32
    %c0_i32_1 = arith.constant 0 : i32
    return %arg0, %c0_i32, %c0_i32_0 : i32, i32, i32
  }
}

</mosaic_0001>

<bundles_post_ra>
// kernel: duin_vqvae_forward.1
= control target key start
LH: loop header
LB: loop body
LE: loop exit
PB: predicated region body
PF: predicated region fallthrough
CT: control target
= control target key end

     0   :  { %s6137_s6 = smov 1   ;;  %s6138_s10 = smov 2   ;;  %s7270_s0 = inlined_call_operand.smem [shape: u32[49], index: -1, kind: input, shape index: {}] }
   0x1   :  { %s6196_s5 = sld [smem:[%s7270_s0]]   ;;  %s6139_s14 = smov 3  }
   0x2   :  { %s6201_s9 = sld [smem:[%s7270_s0 + %s6137_s6]]   ;;  %s6140_s18 = smov 4  }
   0x3   :  { %s6206_s13 = sld [smem:[%s7270_s0 + %s6138_s10]]   ;;  %s6141_s22 = smov 5  }
   0x4   :  { %s6211_s17 = sld [smem:[%s7270_s0 + %s6139_s14]]   ;;  %s6142_s26 = smov 6  }
   0x5   :  { %s6216_s21 = sld [smem:[%s7270_s0 + %s6140_s18]]   ;;  %s6143_s30 = smov 7  }
   0x6   :  { %s6221_s25 = sld [smem:[%s7270_s0 + %s6141_s22]]   ;;  %s6144_s4 = smov 8  }
   0x7   :  { %s6226_s29 = sld [smem:[%s7270_s0 + %s6142_s26]]   ;;  %s6145_s10 = smov 9  }
   0x8   :  { %7319 = sst [smem:[#allocation5_spill]] %s6201_s9  ;;  %s6146_s15 = smov 10  }
   0x9   :  { %7320 = sst [smem:[#allocation6_spill]] %s6206_s13  ;;  %s6147_s20 = smov 11  }
   0xa   :  { %7321 = sst [smem:[#allocation7_spill]] %s6211_s17  ;;  %s6148_s26 = smov 12  }
   0xb   :  { %7322 = sst [smem:[#allocation8_spill]] %s6216_s21  ;;  %s6149_s1 = smov 13  }
   0xc   :  { %s6231_s3 = sld [smem:[%s7270_s0 + %s6143_s30]]   ;;  %s6150_s7 = smov 14  }
   0xd   :  { %s6236_s8 = sld [smem:[%s7270_s0 + %s6144_s4]]   ;;  %s6152_s22 = smov 16  }
   0xe   :  { %s6241_s14 = sld [smem:[%s7270_s0 + %s6145_s10]]   ;;  %s6153_s28 = smov 17  }
   0xf   :  { %s6246_s19 = sld [smem:[%s7270_s0 + %s6146_s15]]   ;;  %s6151_s15 = smov 15  }
  0x10   :  { %s6251_s24 = sld [smem:[%s7270_s0 + %s6147_s20]]   ;;  %s6183_s18 = smov 47  }
  0x11   :  { %s6256_s30 = sld [smem:[%s7270_s0 + %s6148_s26]]   ;;  %s6184_s26 = smov 48  }
  0x12   :  { %7323 = sst [smem:[#allocation9_spill]] %s6231_s3 }
  0x13   :  { %7324 = sst [smem:[#allocation10_spill]] %s6236_s8 }
  0x14   :  { %7325 = sst [smem:[#allocation11_spill]] %s6241_s14 }
  0x15   :  { %7326 = sst [smem:[#allocation12_spill]] %s6246_s19 }
  0x16   :  { %s6261_s6 = sld [smem:[%s7270_s0 + %s6149_s1]]  }
  0x17   :  { %s6266_s12 = sld [smem:[%s7270_s0 + %s6150_s7]]   ;;  %s6154_s7 = smov 18  }
  0x18   :  { %s6271_s20 = sld [smem:[%s7270_s0 + %s6151_s15]]   ;;  %s6155_s15 = smov 19  }
  0x19   :  { %s6276_s27 = sld [smem:[%s7270_s0 + %s6152_s22]]   ;;  %s6156_s22 = smov 20  }
  0x1a   :  { %s6281_s4 = sld [smem:[%s7270_s0 + %s6153_s28]]   ;;  %s6157_s28 = smov 21  }
  0x1b   :  { %s6286_s13 = sld [smem:[%s7270_s0 + %s6154_s7]]   ;;  %s6158_s7 = smov 22  }
  0x1c   :  { %7327 = sst [smem:[#allocation13_spill]] %s6261_s6 }
  0x1d   :  { %7328 = sst [smem:[#allocation14_spill]] %s6266_s12 }
  0x1e   :  { %7329 = sst [smem:[#allocation15_spill]] %s6271_s20 }
  0x1f   :  { %7330 = sst [smem:[#allocation16_spill]] %s6276_s27 }
  0x20   :  { %7331 = sst [smem:[#allocation17_spill]] %s6281_s4 }
  0x21   :  { %7332 = sst [smem:[#allocation18_spill]] %s6286_s13 }
  0x22   :  { %s6291_s6 = sld [smem:[%s7270_s0 + %s6155_s15]]   ;;  %s6159_s15 = smov 23  }
  0x23   :  { %s6296_s27 = sld [smem:[%s7270_s0 + %s6156_s22]]   ;;  %s6160_s22 = smov 24  }
  0x24   :  { %s6301_s4 = sld [smem:[%s7270_s0 + %s6157_s28]]   ;;  %s6161_s28 = smov 25  }
  0x25   :  { %s6306_s13 = sld [smem:[%s7270_s0 + %s6158_s7]]   ;;  %s6162_s7 = smov 26  }
  0x28   :  { %7333 = sst [smem:[#allocation19_spill]] %s6291_s6 }
  0x29   :  { %7334 = sst [smem:[#allocation20_spill]] %s6296_s27 }
  0x2a   :  { %7335 = sst [smem:[#allocation21_spill]] %s6301_s4 }
  0x2b   :  { %7336 = sst [smem:[#allocation22_spill]] %s6306_s13 }
  0x2c   :  { %s6311_s6 = sld [smem:[%s7270_s0 + %s6159_s15]]   ;;  %s6163_s15 = smov 27  }
  0x2d   :  { %s6316_s27 = sld [smem:[%s7270_s0 + %s6160_s22]]   ;;  %s6164_s22 = smov 28  }
  0x2e   :  { %s6321_s4 = sld [smem:[%s7270_s0 + %s6161_s28]]   ;;  %s6165_s28 = smov 29  }
  0x2f   :  { %s6326_s13 = sld [smem:[%s7270_s0 + %s6162_s7]]   ;;  %s6166_s7 = smov 30  }
  0x32   :  { %7337 = sst [smem:[#allocation23_spill]] %s6311_s6 }
  0x33   :  { %7338 = sst [smem:[#allocation24_spill]] %s6316_s27 }
  0x34   :  { %7339 = sst [smem:[#allocation25_spill]] %s6321_s4 }
  0x35   :  { %7340 = sst [smem:[#allocation26_spill]] %s6326_s13 }
  0x36   :  { %s6331_s6 = sld [smem:[%s7270_s0 + %s6163_s15]]   ;;  %s6167_s15 = smov 31  }
  0x37   :  { %s6336_s27 = sld [smem:[%s7270_s0 + %s6164_s22]]   ;;  %s6168_s22 = smov 32  }
  0x38   :  { %s6341_s4 = sld [smem:[%s7270_s0 + %s6165_s28]]   ;;  %s6169_s28 = smov 33  }
  0x39   :  { %s6346_s13 = sld [smem:[%s7270_s0 + %s6166_s7]]   ;;  %s6170_s7 = smov 34  }
  0x3c   :  { %7341 = sst [smem:[#allocation27_spill]] %s6331_s6 }
  0x3d   :  { %7342 = sst [smem:[#allocation28_spill]] %s6336_s27 }
  0x3e   :  { %7343 = sst [smem:[#allocation29_spill]] %s6341_s4 }
  0x3f   :  { %7344 = sst [smem:[#allocation30_spill]] %s6346_s13 }
  0x40   :  { %s6351_s6 = sld [smem:[%s7270_s0 + %s6167_s15]]   ;;  %s6171_s15 = smov 35  }
  0x41   :  { %s6356_s27 = sld [smem:[%s7270_s0 + %s6168_s22]]   ;;  %s6172_s22 = smov 36  }
  0x42   :  { %s6361_s4 = sld [smem:[%s7270_s0 + %s6169_s28]]   ;;  %s6173_s28 = smov 37  }
  0x43   :  { %s6366_s13 = sld [smem:[%s7270_s0 + %s6170_s7]]   ;;  %s6174_s7 = smov 38  }
  0x46   :  { %7345 = sst [smem:[#allocation31_spill]] %s6351_s6 }
  0x47   :  { %7346 = sst [smem:[#allocation32_spill]] %s6356_s27 }
  0x48   :  { %7347 = sst [smem:[#allocation33_spill]] %s6361_s4 }
  0x49   :  { %7348 = sst [smem:[#allocation34_spill]] %s6366_s13 }
  0x4a   :  { %s6371_s6 = sld [smem:[%s7270_s0 + %s6171_s15]]   ;;  %s6175_s15 = smov 39  }
  0x4b   :  { %s6376_s27 = sld [smem:[%s7270_s0 + %s6172_s22]]   ;;  %s6176_s22 = smov 40  }
  0x4c   :  { %s6381_s4 = sld [smem:[%s7270_s0 + %s6173_s28]]   ;;  %s6177_s28 = smov 41  }
  0x4d   :  { %s6386_s13 = sld [smem:[%s7270_s0 + %s6174_s7]]   ;;  %s6178_s7 = smov 42  }
  0x4e   :  { %s6391_s23 = sld [smem:[%s7270_s0 + %s6175_s15]]   ;;  %s6179_s15 = smov 43  }
  0x4f   :  { %s6396_s1 = sld [smem:[%s7270_s0 + %s6176_s22]]  }
  0x50   :  { %7349 = sst [smem:[#allocation35_spill]] %s6371_s6  ;;  %s6180_s6 = smov 44  }
  0x51   :  { %7350 = sst [smem:[#allocation36_spill]] %s6376_s27 }
  0x52   :  { %7351 = sst [smem:[#allocation37_spill]] %s6381_s4 }
  0x53   :  { %7352 = sst [smem:[#allocation38_spill]] %s6386_s13 }
  0x54   :  { %7353 = sst [smem:[#allocation39_spill]] %s6391_s23 }
  0x55   :  { %7354 = sst [smem:[#allocation40_spill]] %s6396_s1 }
  0x56   :  { %s6401_s10 = sld [smem:[%s7270_s0 + %s6177_s28]]   ;;  %s6181_s28 = smov 45  }
  0x57   :  { %s6406_s16 = sld [smem:[%s7270_s0 + %s6178_s7]]   ;;  %s6182_s7 = smov 46  }
  0x58   :  { %s6411_s27 = sld [smem:[%s7270_s0 + %s6179_s15]]   ;;  %s104_s15 = sshll.u32 %s6196_s5, 4  ;;  %s105_s15 = int_to_ptr.vmem [resolvable:$true] %s104_s15 }
  0x59   :  { %s6416_s4 = sld [smem:[%s7270_s0 + %s6180_s6]]  }
  0x5a   :  { %s6421_s13 = sld [smem:[%s7270_s0 + %s6181_s28]]   ;;  %s6115_s28 = sshra.s32 %s105_s15, 4  ;;  %s6116_s28 = int_to_ptr.vmem [resolvable:$true] %s6115_s28 }
  0x5b   :  { %s6426_s23 = sld [smem:[%s7270_s0 + %s6182_s7]]   ;;  %s6117_s2 = scalar_lea.vmem %s6116_s28, 1 }
  0x5c   :  { %7355 = sst [smem:[#allocation41_spill]] %s6401_s10  ;;  %p6118_p0 = scmp.ne.s32.totalorder %s6116_s28, %s6117_s2 }
  0x5d   :  { %7356 = sst [smem:[#allocation42_spill]] %s6406_s16  ;;  %s6119_s16 = scalar_lea.vmem %s6196_s5, 1 }
  0x5e   :  { %7357 = sst [smem:[#allocation43_spill]] %s6411_s27  ;;  %p6120_p1 = scmp.lt.s32.totalorder %s6116_s28, %s6196_s5 }
  0x5f   :  { %7358 = sst [smem:[#allocation44_spill]] %s6416_s4  ;;  %p6121_p2 = scmp.lt.s32.totalorder %s6119_s16, %s6117_s2 }
  0x60   :  { %s6432_s6 = sld [smem:[%s7270_s0 + %s6183_s18]]  }
  0x61   :  { %s6437_s10 = sld [smem:[%s7270_s0 + %s6184_s26]]   ;;  %p6122_p3 = por %p6121_p2, %p6120_p1 }
  0x63   :  { %p6123_p4 = pnand %p6122_p3, %p6118_p0 }
  0x65   :  { %6126 = shalt.err (!%p6123_p4)  }
  0x66   :  { %s6185_s27 = smov [#allocation3]  }
  0x67   :  { %107 = dma.vmem_to_smem %s105_s15, 16, %s6185_s27, [#allocation2] }
  0x68   :  { %6131 = dma.done.wait [#allocation2], 16 }
  0x69   :  { %6132 = vsyncadd [#allocation2], 4294967280 }
  0x6a   :  { %110 = sfence }
  0x6b   :  { %s6441_s7 = smov 0  }
  0x6c LB: > { %s7359_s20 = sld [smem:[#allocation15_spill]]  ;;  %s6447_s0 = sadd.s32 4294967295, %s6135_s7   ;;  %s6135_s7 = sphi %s6441_s7, %s116_s7  }
  0x6d   : > { %s7360_s19 = sld [smem:[#allocation12_spill]]  ;;  %p5548_p5 = scmp.ge.s32.totalorder %s6135_s7, 1 }
  0x6e   : > { %s7361_s14 = sld [smem:[#allocation11_spill]]  ;;  %p1337_p6 = scmp.lt.s32.totalorder %s6135_s7, 3 }
  0x6f   : > { %s7362_s12 = sld [smem:[#allocation14_spill]] }
  0x70   : > { %s7363_s8 = sld [smem:[#allocation10_spill]]  ;;  %p1338_p7 = pnand %p5548_p5, %p1337_p6 }
  0x71   : > { %s7364_s3 = sld [smem:[#allocation9_spill]]  ;;  %p1471_p9 = scmp.lt.s32.totalorder (!%p1338_p7), %s6447_s0, 1 }
  0x72   : > { %1341 = sbr.rel (%p1338_p7) target bundleno = 8209 (0x2011), region = 196  ;;  %s7365_s17 = sld [smem:[#allocation7_spill]] (!%p1338_p7) }
  0x73   : > { %s1478_s5 = sld [smem:[#allocation3 + %s6447_s0]] (!%p1338_p7) }
  0x74   : > { %s7366_s9 = sld [smem:[#allocation5_spill]] (!%p1338_p7) }
  0x75   : > { %s7367_s21 = sld [smem:[#allocation8_spill]] (!%p1338_p7) }
  0x76   : > { %s7368_s22 = sld [smem:[#allocation13_spill]] (!%p1338_p7) }
  0x77   : > { %s6461_s11 = scalar_select %p1471_p9, %s6447_s0, 1  ;;  %v1562_v4 = vld [vmem:[%s6221_s25 + $0x78] sm:$0xff]  ;;  %v1561_v5 = vld [vmem:[%s6221_s25 + $0x70] sm:$0xff]  ;;  %v1560_v7 = vld [vmem:[%s6221_s25 + $0x68] sm:$0xff]  ;;  %vm1599_vm0 = vcmask 261120   ;;  %v6186_v51 = vmov 32.0  }
  0x78   : > { %1567 = vmatpush.msra.mxu1 %v1562_v4  ;;  %v1559_v10 = vld [vmem:[%s6221_s25 + $0x60] sm:$0xff]  ;;  %v1558_v11 = vld [vmem:[%s6221_s25 + $0x58] sm:$0xff]  ;;  %v1557_v13 = vld [vmem:[%s6221_s25 + $0x50] sm:$0xff]  ;;  %vm1976_vm5 = vcmask 64512   ;;  %s7369_s26 = sld [smem:[#allocation16_spill]]  ;;  %vm2414_vm9 = vcmask 523264  }
  0x79   : > { %p1479_p8 = scmp.lt.s32.totalorder %s1478_s5, 2  ;;  %s7298_s15 = sshll.u32 %s6461_s11, 3  ;;  %v1556_v15 = vld [vmem:[%s6221_s25 + $0x48] sm:$0xff]  ;;  %v1555_v17 = vld [vmem:[%s6221_s25 + $0x40] sm:$0xff]  ;;  %v1554_v19 = vld [vmem:[%s6221_s25 + $0x38] sm:$0xff] }
  0x7a   : > { %1568 = vmatpush.msra.mxu1 %v1561_v5  ;;  %v1553_v21 = vld [vmem:[%s6221_s25 + $0x30] sm:$0xff]  ;;  %v1552_v23 = vld [vmem:[%s6221_s25 + $0x28] sm:$0xff]  ;;  %v1551_v25 = vld [vmem:[%s6221_s25 + $0x20] sm:$0xff]  ;;  %s6490_s18 = scalar_lea.vmem %s7366_s9, %s7298_s15  ;;  %s7370_s28 = sld [smem:[#allocation17_spill]] }
  0x7b   : > { %s7409_s5 = smov (!%p1479_p8, %s1478_s5), 2  ;;  %v1550_v27 = vld [vmem:[%s6221_s25 + $0x18] sm:$0xff]  ;;  %v1505_v29 = vld [vmem:[%s6490_s18] sm:$0xff]  ;;  %v1549_v30 = vld [vmem:[%s6221_s25 + $0x10] sm:$0xff]  ;;  %s7371_s2 = sld [smem:[#allocation20_spill]] }
  0x7c   : > { %s5855_s1 = sshll.u32 %s7409_s5, 7  ;;  %1569 = vmatpush.msra.mxu1 %v1560_v7  ;;  %v1548_v31 = vld [vmem:[%s6221_s25 + $0x8] sm:$0xff]  ;;  %v1547_v32 = vld [vmem:[%s6221_s25] sm:$0xff]  ;;  %v1640_v63 = vld [vmem:[%s7360_s19 + $0x18] sm:$0xff]  ;;  %s7372_s16 = sld [smem:[#allocation18_spill]] }
  0x7d   : > { %s6453_s4 = scalar_lea.vmem %s7365_s17, %s5855_s1  ;;  %v5922_v33 = vld [vmem:[%s7367_s21] ss:$0 sm:$0xff]  ;;  %1684 = vmatpush.msra.mxu2 %v1640_v63  ;;  %v1643_v4 = vld [vmem:[%s7360_s19 + $0x30] sm:$0xff]  ;;  %v1638_v7 = vld [vmem:[%s7360_s19 + $0x8] sm:$0xff]  ;;  %s7373_s27 = sld [smem:[#allocation19_spill]] }
  0x7e   : > { %v1522_v0 = vld [vmem:[%s6453_s4 + $0x78] sm:$0xff]  ;;  %v1521_v1 = vld [vmem:[%s6453_s4 + $0x70] sm:$0xff]  ;;  %v1520_v2 = vld [vmem:[%s6453_s4 + $0x68] sm:$0xff]  ;;  %1570 = vmatpush.msra.mxu1 %v1559_v10  ;;  %s7374_s5 = sld [smem:[#allocation22_spill]] }
  0x7f   : > { %1527 = vmatpush.msra.mxu0 %v1522_v0  ;;  %v1519_v3 = vld [vmem:[%s6453_s4 + $0x60] sm:$0xff]  ;;  %v1518_v6 = vld [vmem:[%s6453_s4 + $0x58] sm:$0xff]  ;;  %v1517_v8 = vld [vmem:[%s6453_s4 + $0x50] sm:$0xff]  ;;  %s7375_s1 = sld [smem:[#allocation21_spill]] }
  0x80   : > { %v1516_v9 = vld [vmem:[%s6453_s4 + $0x48] sm:$0xff]  ;;  %v1515_v12 = vld [vmem:[%s6453_s4 + $0x40] sm:$0xff]  ;;  %v1514_v14 = vld [vmem:[%s6453_s4 + $0x38] sm:$0xff]  ;;  %1571 = vmatpush.msra.mxu1 %v1558_v11  ;;  %s7377_s15 = sld [smem:[#allocation40_spill]] }
  0x81   : > { %1528 = vmatpush.msra.mxu0 %v1521_v1  ;;  %v1513_v16 = vld [vmem:[%s6453_s4 + $0x30] sm:$0xff]  ;;  %v1512_v18 = vld [vmem:[%s6453_s4 + $0x28] sm:$0xff]  ;;  %v1511_v20 = vld [vmem:[%s6453_s4 + $0x20] sm:$0xff]  ;;  %s7392_s9 = sld [smem:[#allocation31_spill]] }
  0x82   : > { %1572 = vmatpush.msra.mxu1 %v1557_v13  ;;  %v1510_v22 = vld [vmem:[%s6453_s4 + $0x18] sm:$0xff]  ;;  %v1509_v24 = vld [vmem:[%s6453_s4 + $0x10] sm:$0xff]  ;;  %v1508_v26 = vld [vmem:[%s6453_s4 + $0x8] sm:$0xff]  ;;  %s7397_s17 = sld [smem:[#allocation34_spill]] }
  0x83   : > { %1529 = vmatpush.msra.mxu0 %v1520_v2  ;;  %v1507_v28 = vld [vmem:[%s6453_s4] sm:$0xff]  ;;  %v1644_v0 = vld [vmem:[%s7360_s19 + $0x38] sm:$0xff]  ;;  %v1866_v5 = vld [vmem:[%s6256_s30 + $0x10] sm:$0xff]  ;;  %s7376_s4 = sld [smem:[#allocation23_spill]] }
  0x84   : > { %1573 = vmatpush.msra.mxu1 %v1556_v15  ;;  %v5923_v36 = vld [vmem:[%s6226_s29] ss:$0 sm:$0xff]  ;;  %v1867_v1 = vld [vmem:[%s6256_s30 + $0x18] sm:$0xff]  ;;  %1704 = vmatpush.msra.mxu3 %v1644_v0  ;;  %v1869_v10 = vld [vmem:[%s6256_s30 + $0x28] sm:$0xff]  ;;  %s7400_s21 = sld [smem:[#allocation37_spill]] }
  0x85   : > { %1530 = vmatpush.msra.mxu0 %v1519_v3  ;;  %v1506_v47 = vld [vmem:[%s7364_s3] sm:$0xff]  ;;  %v1871_v2 = vld [vmem:[%s6256_s30 + $0x38] sm:$0xff]  ;;  %v1639_v3 = vld [vmem:[%s7360_s19 + $0x10] sm:$0xff] }
  0x86   : > { %1574 = vmatpush.msra.mxu1 %v1555_v17  ;;  %1685 = vmatpush.msra.mxu2 %v1639_v3  ;;  %v1637_v11 = vld [vmem:[%s7360_s19] sm:$0xff]  ;;  %v1648_v15 = vld [vmem:[%s7360_s19 + $0x58] sm:$0xff]  ;;  %v1647_v17 = vld [vmem:[%s7360_s19 + $0x50] sm:$0xff] }
  0x87   : > { %1531 = vmatpush.msra.mxu0 %v1518_v6  ;;  %1705 = vmatpush.msra.mxu3 %v1643_v4  ;;  %v1870_v6 = vld [vmem:[%s6256_s30 + $0x30] sm:$0xff]  ;;  %v1864_v13 = vld [vmem:[%s6256_s30] sm:$0xff] }
  0x88   : > { %1575 = vmatpush.msra.mxu1 %v1554_v19  ;;  %1686 = vmatpush.msra.mxu2 %v1638_v7  ;;  %v1876_v63 = vld [vmem:[%s6256_s30 + $0x60] sm:$0xff] }
  0x89   : > { %1532 = vmatpush.msra.mxu0 %v1517_v8  ;;  %v1642_v8 = vld [vmem:[%s7360_s19 + $0x28] sm:$0xff]  ;;  %v5932_v4 = vld [vmem:[%s7362_s12] ss:$0 sm:$0xff]  ;;  %v5927_v7 = vld [vmem:[%s7359_s20 + $0x1] ss:$0 sm:$0xff] }
  0x8a   : > { %1576 = vmatpush.msra.mxu1 %v1553_v21  ;;  %1706 = vmatpush.msra.mxu3 %v1642_v8  ;;  %v1650_v21 = vld [vmem:[%s7360_s19 + $0x68] sm:$0xff] }
  0x8b   : > { %1533 = vmatpush.msra.mxu0 %v1516_v9  ;;  %v1865_v9 = vld [vmem:[%s6256_s30 + $0x8] sm:$0xff]  ;;  %1687 = vmatpush.msra.mxu2 %v1637_v11  ;;  %v5929_v11 = vld [vmem:[%s7368_s22 + $0x1] ss:$0 sm:$0xff] }
  0x8c   : > { %1577 = vmatpush.msra.mxu1 %v1552_v23  ;;  %v1645_v23 = vld [vmem:[%s7360_s19 + $0x40] sm:$0xff] }
  0x8d   : > { %1534 = vmatpush.msra.mxu0 %v1515_v12  ;;  %v1641_v12 = vld [vmem:[%s7360_s19 + $0x20] sm:$0xff]  ;;  %1724 = vmatpush.msrb.mxu2 %v1648_v15 }
  0x8e   : > { %1578 = vmatpush.msra.mxu1 %v1551_v25  ;;  %1707 = vmatpush.msra.mxu3 %v1641_v12 }
  0x8f   : > { %1535 = vmatpush.msra.mxu0 %v1514_v14  ;;  %v1868_v14 = vld [vmem:[%s6256_s30 + $0x20] sm:$0xff]  ;;  %1725 = vmatpush.msrb.mxu2 %v1647_v17 }
  0x90   : > { %1579 = vmatpush.msra.mxu1 %v1550_v27 }
  0x91   : > { %1536 = vmatpush.msra.mxu0 %v1513_v16  ;;  %v1652_v16 = vld [vmem:[%s7360_s19 + $0x78] sm:$0xff] }
  0x92   : > { %1580 = vmatpush.msra.mxu1 %v1549_v30  ;;  %1744 = vmatpush.msrb.mxu3 %v1652_v16 }
  0x93   : > { %1537 = vmatpush.msra.mxu0 %v1512_v18  ;;  %v1651_v18 = vld [vmem:[%s7360_s19 + $0x70] sm:$0xff] }
  0x94   : > { %1581 = vmatpush.msra.mxu1 %v1548_v31  ;;  %1745 = vmatpush.msrb.mxu3 %v1651_v18 }
  0x95   : > { %1538 = vmatpush.msra.mxu0 %v1511_v20  ;;  %v1646_v20 = vld [vmem:[%s7360_s19 + $0x48] sm:$0xff] }
  0x96   : > { %1582 = vmatpush.msra.mxu1 %v1547_v32  ;;  %1726 = vmatpush.msrb.mxu2 %v1646_v20  ;;  %v5924_v32 = vld [vmem:[%s7363_s8] ss:$0 sm:$0xff]  ;;  %v5934_v20 = vld [vmem:[%s7362_s12 + $0x2] ss:$0 sm:$0xff] }
  0x97   : > { %1539 = vmatpush.msra.mxu0 %v1510_v22  ;;  %1746 = vmatpush.msrb.mxu3 %v1650_v21  ;;  %v5935_v21 = vld [vmem:[%s7362_s12 + $0x3] ss:$0 sm:$0xff] }
  0x98   : > { %1928 = vmatpush.msrb.mxu1 %v1871_v2  ;;  %1727 = vmatpush.msrb.mxu2 %v1645_v23  ;;  %v5931_v23 = vld [vmem:[%s7368_s22 + $0x3] ss:$0 sm:$0xff] }
  0x99   : > { %1540 = vmatpush.msra.mxu0 %v1509_v24  ;;  %v1649_v24 = vld [vmem:[%s7360_s19 + $0x60] sm:$0xff] }
  0x9a   : > { %1929 = vmatpush.msrb.mxu1 %v1870_v6  ;;  %1747 = vmatpush.msrb.mxu3 %v1649_v24  ;;  %v5926_v6 = vld [vmem:[%s7359_s20] ss:$0 sm:$0xff] }
  0x9b   : > { %1541 = vmatpush.msra.mxu0 %v1508_v26 }
  0x9c   : > { %1930 = vmatpush.msrb.mxu1 %v1869_v10  ;;  %v5928_v10 = vld [vmem:[%s7368_s22] ss:$0 sm:$0xff] }
  0x9d   : > { %1542 = vmatpush.msra.mxu0 %v1507_v28 }
  0x9e   : > { %1543 = vmatmul.f32.vlgmr.msra.gmra.mxu0 %v1505_v29  ;;  %1931 = vmatpush.msrb.mxu1 %v1868_v14 }
  0x9f   : > { %1908 = vmatpush.msrb.mxu0 %v1867_v1 }
  0xa1   : > { %1909 = vmatpush.msrb.mxu0 %v1866_v5  ;;  %v5933_v5 = vld [vmem:[%s7362_s12 + $0x1] ss:$0 sm:$0xff] }
  0xa3   : > { %1910 = vmatpush.msrb.mxu0 %v1865_v9 }
  0xa5   : > { %1911 = vmatpush.msrb.mxu0 %v1864_v13 }
 0x11b   : > { %v1544_v34 = vpop.f32.mrf.mxu0 }
 0x11c   : > { %v1545_v35 = vadd.f32 %v5922_v33, %v1544_v34  ;;  %v5925_v34 = vld [vmem:[%s7361_s14] ss:$0 sm:$0xff] }
 0x11e   : > { %1583 = vmatmul.f32.vlgmr.msra.gmra.mxu1 %v1545_v35 }
 0x19b   : > { %v1584_v37 = vpop.f32.mrf.mxu1 }
 0x19c   : > { %v1585_v38 = vadd.f32 %v5923_v36, %v1584_v37 }
 0x19e   : > { %v1587_v39 = vmul.f32 %v1585_v38, %v1585_v38 }
 0x1a0   : > { %v1588_v40 = vmul.f32 %v1587_v39, %v1585_v38  ;;  %v1759_v39 = vld [vmem:[%s6251_s24 + $0x38] sm:$0xff] }
 0x1a2   : > { %v1589_v41 = vmul.f32 0.044715, %v1588_v40  ;;  %v1754_v40 = vld [vmem:[%s6251_s24 + $0x10] sm:$0xff] }
 0x1a4   : > { %v1590_v42 = vadd.f32 %v1589_v41, %v1585_v38  ;;  %v1758_v41 = vld [vmem:[%s6251_s24 + $0x30] sm:$0xff] }
 0x1a6   : > { %v1591_v43 = vmul.f32 0.7978846, %v1590_v42  ;;  %v1753_v42 = vld [vmem:[%s6251_s24 + $0x8] sm:$0xff] }
 0x1a8   : > { %6003 = vtanh.f32 %v1591_v43  ;;  %v1757_v43 = vld [vmem:[%s6251_s24 + $0x28] sm:$0xff] }
 0x1a9   : > { %6005 = vrcp.f32 %v6186_v51  ;;  %v1761_v51 = vld [vmem:[%s6251_s24 + $0x48] sm:$0xff] }
 0x1ae   : > { %v6004_v44 = vpop.eup %6003 }
 0x1af   : > { %v1593_v45 = vadd.f32 1.0, %v6004_v44  ;;  %v6006_v52 = vpop.eup %6005  ;;  %v1752_v44 = vld [vmem:[%s6251_s24] sm:$0xff] }
 0x1b0   : > { %v1604_v53 = vmul.f32 32.0, %v6006_v52  ;;  %vm1608_vm1 = vweird.f32 %v6006_v52 }
 0x1b1   : > { %v1594_v46 = vmul.f32 0.5, %v1593_v45  ;;  %v1756_v45 = vld [vmem:[%s6251_s24 + $0x20] sm:$0xff] }
 0x1b2   : > { %v1605_v54 = vsub.f32 1.0, %v1604_v53  ;;  %v1760_v53 = vld [vmem:[%s6251_s24 + $0x40] sm:$0xff] }
 0x1b3   : > { %v1595_v48 = vmul.f32 %v1594_v46, %v1585_v38  ;;  %v1755_v38 = vld [vmem:[%s6251_s24 + $0x18] sm:$0xff] }
 0x1b4   : > { %v1606_v55 = vmul.f32 %v6006_v52, %v1605_v54  ;;  %v1763_v46 = vld [vmem:[%s6251_s24 + $0x58] sm:$0xff]  ;;  %v1764_v54 = vld [vmem:[%s6251_s24 + $0x60] sm:$0xff] }
 0x1b5   : > { %v6501_v49 = vadd.f32 %v1595_v48, %v1506_v47  ;;  %v1767_v47 = vld [vmem:[%s6251_s24 + $0x78] sm:$0xff]  ;;  %v1762_v48 = vld [vmem:[%s6251_s24 + $0x50] sm:$0xff] }
 0x1b6   : > { %v1607_v56 = vadd.f32 %v6006_v52, %v1606_v55  ;;  %v1875_v55 = vld [vmem:[%s6256_s30 + $0x58] sm:$0xff] }
 0x1b7   : > { %v1600_v50 = vsel %vm1599_vm0, %v6501_v49, 0.0 }
 0x1b8   : > { %1601 = vadd.xlane.f32.xlu0 %v1600_v50  ;;  %v6505_v57 = vsel %vm1608_vm1, %v6006_v52, %v1607_v56  ;;  %v1766_v50 = vld [vmem:[%s6251_s24 + $0x70] sm:$0xff]  ;;  %v1765_v52 = vld [vmem:[%s6251_s24 + $0x68] sm:$0xff]  ;;  %v1879_v56 = vld [vmem:[%s6256_s30 + $0x78] sm:$0xff] }
 0x22b   : > { %v1602_v58 = vpop.xlane.xlu0 %1601 }
 0x22c   : > { %v1610_v59 = vmul.f32 %v6505_v57, %v1602_v58  ;;  %v1874_v58 = vld [vmem:[%s6256_s30 + $0x50] sm:$0xff] }
 0x22e   : > { %v6509_v60 = vsub.f32 %v6501_v49, %v1610_v59  ;;  %v1878_v59 = vld [vmem:[%s6256_s30 + $0x70] sm:$0xff] }
 0x230   : > { %v1612_v61 = vmul.f32 %v6509_v60, %v6509_v60 }
 0x232   : > { %v1613_v62 = vsel %vm1599_vm0, %v1612_v61, 0.0  ;;  %v1877_v61 = vld [vmem:[%s6256_s30 + $0x68] sm:$0xff] }
 0x233   : > { %1614 = vadd.xlane.f32.xlu0 %v1613_v62  ;;  %v1872_v62 = vld [vmem:[%s6256_s30 + $0x40] sm:$0xff] }
 0x2a6   : > { %v1615_v19 = vpop.xlane.xlu0 %1614 }
 0x2a7   : > { %v1616_v22 = vmul.f32 %v1615_v19, %v6505_v57 }
 0x2a9   : > { %v1617_v25 = vadd.f32 1e-05, %v1616_v22  ;;  %v5930_v22 = vld [vmem:[%s7368_s22 + $0x2] ss:$0 sm:$0xff] }
 0x2ab   : > { %6007 = vrsqrt.f32 %v1617_v25  ;;  %vm1624_vm3 = vweird.f32 %v1617_v25 }
 0x2b1   : > { %v6008_v26 = vpop.eup %6007 }
 0x2b2   : > { %v1619_v27 = vmul.f32 %v6008_v26, %v1617_v25  ;;  %vm1625_vm2 = vweird.f32 %v6008_v26 }
 0x2b3   : > { %vm1626_vm4 = vmor %vm1624_vm3, %vm1625_vm2 }
 0x2b4   : > { %v1620_v28 = vmul.f32 %v6008_v26, %v1619_v27 }
 0x2b6   : > { %v1621_v29 = vmul.f32 0.5, %v1620_v28 }
 0x2b8   : > { %v1622_v30 = vsub.f32 1.5, %v1621_v29 }
 0x2ba   : > { %v1623_v31 = vmul.f32 %v6008_v26, %v1622_v30  ;;  %v5936_v30 = vld [vmem:[%s7359_s20 + $0x2] ss:$0 sm:$0xff] }
 0x2bc   : > { %v1627_v33 = vsel %vm1626_vm4, %v6008_v26, %v1623_v31  ;;  %v5937_v31 = vld [vmem:[%s7359_s20 + $0x3] ss:$0 sm:$0xff] }
 0x2bd   : > { %v1628_v35 = vmul.f32 %v1627_v33, %v6509_v60  ;;  %v1873_v60 = vld [vmem:[%s6256_s30 + $0x48] sm:$0xff] }
 0x2bf   : > { %v1632_v36 = vmul.f32 %v5924_v32, %v1628_v35 }
 0x2c1   : > { %v1636_v37 = vadd.f32 %v5925_v34, %v1632_v36 }
 0x2c3   : > { %5555 = vmatmul.msk.f32.vlgmr.msra.gmra.mxu2 %vm1599_vm0, %v1636_v37  ;;  %5556 = vmatmul.msk.f32.vlgmr.msra.gmra.mxu3 %vm1599_vm0, %v1636_v37 }
 0x2c4   : > { %5563 = vmatmul.msk.f32.vlgmr.msrb.gmra.mxu0 %vm1599_vm0, %v1636_v37  ;;  %5564 = vmatmul.msk.f32.vlgmr.msrb.gmra.mxu1 %vm1599_vm0, %v1636_v37 }
 0x2c5   : > { %1796 = vmatpush.msra.mxu2 %v1755_v38  ;;  %1816 = vmatpush.msra.mxu3 %v1759_v39 }
 0x2c7   : > { %1797 = vmatpush.msra.mxu2 %v1754_v40  ;;  %1817 = vmatpush.msra.mxu3 %v1758_v41 }
 0x2c9   : > { %1798 = vmatpush.msra.mxu2 %v1753_v42  ;;  %1818 = vmatpush.msra.mxu3 %v1757_v43 }
 0x2cb   : > { %5557 = vmatmul.msk.f32.vlgmr.msrb.gmra.mxu2 %vm1599_vm0, %v1636_v37  ;;  %5558 = vmatmul.msk.f32.vlgmr.msrb.gmra.mxu3 %vm1599_vm0, %v1636_v37 }
 0x2cc   : > { %1799 = vmatpush.msra.mxu2 %v1752_v44  ;;  %1819 = vmatpush.msra.mxu3 %v1756_v45 }
 0x2ce   : > { %1836 = vmatpush.msrb.mxu2 %v1763_v46  ;;  %1856 = vmatpush.msrb.mxu3 %v1767_v47 }
 0x2d0   : > { %1837 = vmatpush.msrb.mxu2 %v1762_v48  ;;  %1857 = vmatpush.msrb.mxu3 %v1766_v50 }
 0x2d2   : > { %1838 = vmatpush.msrb.mxu2 %v1761_v51  ;;  %1858 = vmatpush.msrb.mxu3 %v1765_v52 }
 0x2d3   : > { %5559 = vmatmul.msk.f32.vlgmr.msra.gmra.mxu2 %vm1599_vm0, %v1636_v37  ;;  %5560 = vmatmul.msk.f32.vlgmr.msra.gmra.mxu3 %vm1599_vm0, %v1636_v37 }
 0x2d4   : > { %1839 = vmatpush.msrb.mxu2 %v1760_v53  ;;  %1859 = vmatpush.msrb.mxu3 %v1764_v54 }
 0x2d6   : > { %1948 = vmatpush.msra.mxu2 %v1875_v55  ;;  %1968 = vmatpush.msra.mxu3 %v1879_v56 }
 0x2d8   : > { %1949 = vmatpush.msra.mxu2 %v1874_v58  ;;  %1969 = vmatpush.msra.mxu3 %v1878_v59 }
 0x2da   : > { %1950 = vmatpush.msra.mxu2 %v1873_v60  ;;  %1970 = vmatpush.msra.mxu3 %v1877_v61 }
 0x2db   : > { %5561 = vmatmul.msk.f32.vlgmr.msrb.gmra.mxu2 %vm1599_vm0, %v1636_v37  ;;  %5562 = vmatmul.msk.f32.vlgmr.msrb.gmra.mxu3 %vm1599_vm0, %v1636_v37 }
 0x2dc   : > { %1951 = vmatpush.msra.mxu2 %v1872_v62  ;;  %1971 = vmatpush.msra.mxu3 %v1876_v63 }
 0x2e3   : > { %5565 = vmatmul.msk.f32.vlgmr.msra.gmra.mxu2 %vm1599_vm0, %v1636_v37  ;;  %5566 = vmatmul.msk.f32.vlgmr.msra.gmra.mxu3 %vm1599_vm0, %v1636_v37 }
 0x341   : > { %v1913_v8 = vpop.f32.mrf.mxu0  ;;  %v1933_v9 = vpop.f32.mrf.mxu1 }
 0x342   : > { %v1914_v16 = vadd.f32 %v5926_v6, %v1913_v8  ;;  %v1934_v17 = vadd.f32 %v5927_v7, %v1933_v9 }
 0x346   : > { %v1689_v0 = vpop.f32.mrf.mxu2  ;;  %v1709_v1 = vpop.f32.mrf.mxu3 }
 0x347   : > { %v1690_v18 = vadd.f32 %v5928_v10, %v1689_v0  ;;  %v1710_v19 = vadd.f32 %v5929_v11, %v1709_v1 }
 0x34e   : > { %v1729_v2 = vpop.f32.mrf.mxu2  ;;  %v1749_v3 = vpop.f32.mrf.mxu3 }
 0x34f   : > { %v1730_v28 = vadd.f32 %v5930_v22, %v1729_v2  ;;  %v1750_v29 = vadd.f32 %v5931_v23, %v1749_v3 }
 0x356   : > { %v1801_v12 = vpop.f32.mrf.mxu2  ;;  %v1821_v13 = vpop.f32.mrf.mxu3 }
 0x357   : > { %v1802_v14 = vadd.f32 %v5932_v4, %v1801_v12  ;;  %v1822_v15 = vadd.f32 %v5933_v5, %v1821_v13 }
 0x359   : > { %5567 = vmatpush.xpose.msk.msra.mxu0 %vm1976_vm5, %v1802_v14  ;;  %5569 = vmatpush.xpose.msk.msra.mxu1 %vm1976_vm5, %v1822_v15 }
 0x35c   : > { %5568 = vmatmul.msk.f32.vlgmr.msra.gmra.mxu0 %vm1976_vm5, %v1690_v18  ;;  %5570 = vmatmul.msk.f32.vlgmr.msra.gmra.mxu1 %vm1976_vm5, %v1710_v19  ;;  %v2221_v18 = vld [vmem:[%s7369_s26] sm:$0xff]  ;;  %v2223_v19 = vld [vmem:[%s7369_s26 + $0x10] sm:$0xff] }
 0x35d   : > { %2147 = vmatpush.msrb.mxu0 %v1914_v16  ;;  %2170 = vmatpush.msrb.mxu1 %v1934_v17 }
 0x35e   : > { %v1841_v24 = vpop.f32.mrf.mxu2  ;;  %v1861_v25 = vpop.f32.mrf.mxu3 }
 0x35f   : > { %v1842_v26 = vadd.f32 %v5934_v20, %v1841_v24  ;;  %v1862_v27 = vadd.f32 %v5935_v21, %v1861_v25  ;;  %2243 = vmatpush.msra.mxu0 %v2221_v18  ;;  %v2222_v20 = vld [vmem:[%s7369_s26 + $0x8] sm:$0xff]  ;;  %v2224_v21 = vld [vmem:[%s7369_s26 + $0x18] sm:$0xff] }
 0x360   : > { %2266 = vmatpush.msra.mxu1 %v2222_v20 }
 0x361   : > { %5571 = vmatpush.xpose.msk.msrb.mxu2 %vm1976_vm5, %v1842_v26  ;;  %5573 = vmatpush.xpose.msk.msrb.mxu3 %vm1976_vm5, %v1862_v27 }
 0x364   : > { %5572 = vmatmul.msk.f32.vlgmr.msrb.gmra.mxu2 %vm1976_vm5, %v1730_v28  ;;  %5574 = vmatmul.msk.f32.vlgmr.msrb.gmra.mxu3 %vm1976_vm5, %v1750_v29 }
 0x366   : > { %v1953_v32 = vpop.f32.mrf.mxu2  ;;  %v1973_v33 = vpop.f32.mrf.mxu3 }
 0x367   : > { %v1954_v34 = vadd.f32 %v5936_v30, %v1953_v32  ;;  %v1974_v35 = vadd.f32 %v5937_v31, %v1973_v33 }
 0x369   : > { %2193 = vmatpush.msra.mxu2 %v1954_v34  ;;  %2216 = vmatpush.msra.mxu3 %v1974_v35  ;;  %v5938_v35 = vld [vmem:[%s7370_s28] ss:$0 sm:$0xff] }
 0x36b   : > { %2289 = vmatpush.msrb.mxu2 %v2223_v19  ;;  %2312 = vmatpush.msrb.mxu3 %v2224_v21 }
 0x3d9   : > { %v2000_v36 = vpop.f32.mrf.mxu0  ;;  %v2026_v39 = vpop.f32.mrf.mxu1 }
 0x3da   : > { %v2081_v37 = vmul.f32 0.35355338, %v2000_v36  ;;  %v2082_v40 = vmul.f32 0.35355338, %v2026_v39 }
 0x3dc   : > { %v2085_v38 = vsel %vm1976_vm5, %v2081_v37, -inf  ;;  %v2088_v41 = vsel %vm1976_vm5, %v2082_v40, -inf }
 0x3dd   : > { %2086 = vmax.xlane.f32.xlu2 %v2085_v38 }
 0x3e5   : > { %2089 = vmax.xlane.f32.xlu2 %v2088_v41 }
 0x3e7   : > { %v2052_v42 = vpop.f32.mrf.mxu2  ;;  %v2078_v45 = vpop.f32.mrf.mxu3 }
 0x3e8   : > { %v2083_v43 = vmul.f32 0.35355338, %v2052_v42  ;;  %v2084_v46 = vmul.f32 0.35355338, %v2078_v45 }
 0x3ea   : > { %v2091_v44 = vsel %vm1976_vm5, %v2083_v43, -inf  ;;  %v2094_v47 = vsel %vm1976_vm5, %v2084_v46, -inf }
 0x3eb   : > { %2092 = vmax.xlane.f32.xlu1 %v2091_v44 }
 0x3f3   : > { %2095 = vmax.xlane.f32.xlu1 %v2094_v47  ;;  %v2364_v47 = vld [vmem:[%s7371_s2 + $0x10] sm:$0xff] }
 0x450   : > { %v2087_v48 = vpop.xlane.xlu2 %2086 }
 0x451   : > { %v2097_v50 = vsub.f32 %v2081_v37, %v2087_v48  ;;  %v2363_v48 = vld [vmem:[%s7371_s2 + $0x8] sm:$0xff] }
 0x453   : > { %v2101_v51 = vmul.f32 1.442695, %v2097_v50 }
 0x455   : > { %6009 = vpow2.f32 %v2101_v51 }
 0x458   : > { %v2090_v54 = vpop.xlane.xlu2 %2089 }
 0x459   : > { %v2098_v58 = vsub.f32 %v2082_v40, %v2090_v54 }
 0x45b   : > { %v6010_v52 = vpop.eup %6009  ;;  %v2103_v60 = vmul.f32 1.442695, %v2098_v58 }
 0x45c   : > { %v2109_v53 = vsel %vm1976_vm5, %v6010_v52, 0.0 }
 0x45d   : > { %2110 = vadd.xlane.f32.xlu2 %v2109_v53 }
 0x45e   : > { %v2093_v55 = vpop.xlane.xlu1 %2092 }
 0x45f   : > { %v2099_v56 = vsub.f32 %v2083_v43, %v2093_v55 }
 0x461   : > { %v2105_v59 = vmul.f32 1.442695, %v2099_v56 }
 0x463   : > { %6011 = vpow2.f32 %v2105_v59 }
 0x464   : > { %6013 = vpow2.f32 %v2103_v60  ;;  %v5939_v60 = vld [vmem:[%s7372_s16] ss:$0 sm:$0xff] }
 0x466   : > { %v2096_v61 = vpop.xlane.xlu1 %2095 }
 0x467   : > { %v2100_v62 = vsub.f32 %v2084_v46, %v2096_v61  ;;  %v2365_v46 = vld [vmem:[%s7371_s2 + $0x18] sm:$0xff] }
 0x469   : > { %v6012_v63 = vpop.eup %6011  ;;  %v2107_v0 = vmul.f32 1.442695, %v2100_v62 }
 0x46a   : > { %v2115_v1 = vsel %vm1976_vm5, %v6012_v63, 0.0  ;;  %v6014_v2 = vpop.eup %6013 }
 0x46b   : > { %6015 = vpow2.f32 %v2107_v0  ;;  %2116 = vadd.xlane.f32.xlu0 %v2115_v1  ;;  %v2112_v5 = vsel %vm1976_vm5, %v6014_v2, 0.0 }
 0x471   : > { %v6016_v3 = vpop.eup %6015 }
 0x472   : > { %v2118_v4 = vsel %vm1976_vm5, %v6016_v3, 0.0 }
 0x473   : > { %2119 = vadd.xlane.f32.xlu1 %v2118_v4  ;;  %2113 = vadd.xlane.f32.xlu0 %v2112_v5  ;;  %v2407_v4 = vld [vmem:[%s7374_s5 + $0x28] sm:$0xff]  ;;  %v2406_v5 = vld [vmem:[%s7374_s5 + $0x20] sm:$0xff] }
 0x4d0   : > { %v2111_v6 = vpop.xlane.xlu2 %2110 }
 0x4d1   : > { %6017 = vrcp.f32 %v2111_v6  ;;  %v2405_v6 = vld [vmem:[%s7374_s5 + $0x18] sm:$0xff] }
 0x4d7   : > { %v6018_v7 = vpop.eup %6017 }
 0x4d8   : > { %v2125_v8 = vmul.f32 %v6018_v7, %v6010_v52  ;;  %v2404_v7 = vld [vmem:[%s7374_s5 + $0x10] sm:$0xff] }
 0x4da   : > { %5575 = vmatmul.msk.f32.vlgmr.msrb.gmra.mxu0 %vm1976_vm5, %v2125_v8  ;;  %v2403_v8 = vld [vmem:[%s7374_s5 + $0x8] sm:$0xff] }
 0x4db   : > { %2385 = vmatpush.msrb.mxu0 %v2365_v46  ;;  %v5595_v46 = vld [vmem:[%s7360_s19 + $0xc0] sm:$0xff] }
 0x4dd   : > { %2386 = vmatpush.msrb.mxu0 %v2364_v47  ;;  %v5619_v47 = vld [vmem:[%s6251_s24 + $0xc0] sm:$0xff] }
 0x4de   : > { %v2117_v9 = vpop.xlane.xlu0 %2116 }
 0x4df   : > { %6019 = vrcp.f32 %v2117_v9  ;;  %2387 = vmatpush.msrb.mxu0 %v2363_v48  ;;  %v2402_v9 = vld [vmem:[%s7374_s5] sm:$0xff]  ;;  %v5602_v48 = vld [vmem:[%s7360_s19 + $0xf8] sm:$0xff] }
 0x4e5   : > { %v6020_v10 = vpop.eup %6019 }
 0x4e6   : > { %v2127_v11 = vmul.f32 %v6020_v10, %v6012_v63  ;;  %v2120_v12 = vpop.xlane.xlu1 %2119  ;;  %v2114_v13 = vpop.xlane.xlu0 %2113  ;;  %v5940_v63 = vld [vmem:[%s7373_s27] ss:$0 sm:$0xff] }
 0x4e7   : > { %6021 = vrcp.f32 %v2120_v12  ;;  %v5941_v10 = vld [vmem:[%s7375_s1] ss:$0 sm:$0xff] }
 0x4e8   : > { %6023 = vrcp.f32 %v2114_v13  ;;  %5577 = vmatmul.msk.f32.vlgmr.msra.gmra.mxu2 %vm1976_vm5, %v2127_v11 }
 0x4ed   : > { %v6022_v14 = vpop.eup %6021 }
 0x4ee   : > { %v6024_v15 = vpop.eup %6023  ;;  %v2128_v16 = vmul.f32 %v6022_v14, %v6016_v3  ;;  %v2408_v3 = vld [vmem:[%s7374_s5 + $0x30] sm:$0xff] }
 0x4ef   : > { %v2126_v17 = vmul.f32 %v6024_v15, %v6014_v2  ;;  %v2409_v2 = vld [vmem:[%s7374_s5 + $0x38] sm:$0xff] }
 0x4f0   : > { %5578 = vmatmul.msk.f32.vlgmr.msra.gmra.mxu3 %vm1976_vm5, %v2128_v16 }
 0x4f1   : > { %5576 = vmatmul.msk.f32.vlgmr.msrb.gmra.mxu1 %vm1976_vm5, %v2126_v17 }
 0x4f2   : > { %2426 = vmatpush.msrb.mxu1 %v2409_v2  ;;  %v5615_v2 = vld [vmem:[%s6251_s24 + $0xa0] sm:$0xff] }
 0x4f4   : > { %2427 = vmatpush.msrb.mxu1 %v2408_v3  ;;  %v5643_v3 = vld [vmem:[%s6256_s30 + $0xc0] sm:$0xff] }
 0x4f6   : > { %2428 = vmatpush.msrb.mxu1 %v2407_v4 }
 0x4f8   : > { %2429 = vmatpush.msrb.mxu1 %v2406_v5 }
 0x4fa   : > { %2430 = vmatpush.msrb.mxu1 %v2405_v6 }
 0x4fc   : > { %2431 = vmatpush.msrb.mxu1 %v2404_v7 }
 0x4fe   : > { %2432 = vmatpush.msrb.mxu1 %v2403_v8 }
 0x500   : > { %2433 = vmatpush.msrb.mxu1 %v2402_v9 }
 0x557   : > { %v2149_v22 = vpop.f32.mrf.mxu0 }
 0x558   : > { %5579 = vmatmul.msk.f32.vlgmr.msra.gmra.mxu0 %vm1976_vm5, %v2149_v22  ;;  %v5942_v22 = vld [vmem:[%s7376_s4] ss:$0 sm:$0xff] }
 0x56b   : > { %v2195_v23 = vpop.f32.mrf.mxu2 }
 0x56c   : > { %5581 = vmatmul.msk.f32.vlgmr.msrb.gmra.mxu2 %vm1976_vm5, %v2195_v23 }
 0x56e   : > { %v2172_v24 = vpop.f32.mrf.mxu1 }
 0x56f   : > { %5580 = vmatmul.msk.f32.vlgmr.msra.gmra.mxu1 %vm1976_vm5, %v2172_v24 }
 0x573   : > { %v2218_v25 = vpop.f32.mrf.mxu3 }
 0x574   : > { %5582 = vmatmul.msk.f32.vlgmr.msrb.gmra.mxu3 %vm1976_vm5, %v2218_v25 }
 0x5d5   : > { %v2245_v27 = vpop.f32.mrf.mxu0 }
 0x5d6   : > { %v2317_v30 = vsel %vm1599_vm0, %v2245_v27, 0.0 }
 0x5ec   : > { %v2268_v26 = vpop.f32.mrf.mxu1 }
 0x5ed   : > { %v2318_v29 = vsel %vm1599_vm0, %v2268_v26, 0.0 }
 0x5ee   : > { %v2319_v32 = vadd.f32 %v2318_v29, %v2317_v30 }
 0x5ef   : > { %v2291_v28 = vpop.f32.mrf.mxu2 }
 0x5f0   : > { %v2320_v31 = vsel %vm1599_vm0, %v2291_v28, 0.0 }
 0x5f1   : > { %v2321_v33 = vadd.f32 %v2320_v31, %v2319_v32  ;;  %v5590_v32 = vld [vmem:[%s7360_s19 + $0x98] sm:$0xff] }
 0x5f2   : > { %2522 = vmatpush.msra.mxu2 %v5590_v32  ;;  %v5647_v32 = vld [vmem:[%s6256_s30 + $0xe0] sm:$0xff] }
 0x5f7   : > { %v2314_v34 = vpop.f32.mrf.mxu3 }
 0x5f8   : > { %v2322_v36 = vsel %vm1599_vm0, %v2314_v34, 0.0  ;;  %v5598_v34 = vld [vmem:[%s7360_s19 + $0xd8] sm:$0xff] }
 0x5f9   : > { %v2323_v37 = vadd.f32 %v2322_v36, %v2321_v33  ;;  %v5594_v33 = vld [vmem:[%s7360_s19 + $0xb8] sm:$0xff]  ;;  %v5589_v36 = vld [vmem:[%s7360_s19 + $0x90] sm:$0xff] }
 0x5fa   : > { %2542 = vmatpush.msra.mxu3 %v5594_v33  ;;  %2523 = vmatpush.msra.mxu2 %v5589_v36  ;;  %v5946_v33 = vld [vmem:[%s7362_s12 + $0x6] ss:$0 sm:$0xff] }
 0x5fb   : > { %v2328_v38 = vadd.f32 %v5938_v35, %v2323_v37  ;;  %v5622_v35 = vld [vmem:[%s6251_s24 + $0xd8] sm:$0xff]  ;;  %v5593_v37 = vld [vmem:[%s7360_s19 + $0xb0] sm:$0xff] }
 0x5fc   : > { %2676 = vmatpush.msra.mxu1 %v5622_v35  ;;  %2543 = vmatpush.msra.mxu3 %v5593_v37 }
 0x5fd   : > { %v6624_v39 = vadd.f32 %v2328_v38, %v6501_v49  ;;  %v2362_v49 = vld [vmem:[%s7371_s2] sm:$0xff]  ;;  %v5597_v38 = vld [vmem:[%s7360_s19 + $0xd0] sm:$0xff] }
 0x5fe   : > { %2388 = vmatpush.msrb.mxu0 %v2362_v49  ;;  %v5614_v49 = vld [vmem:[%s6251_s24 + $0x98] sm:$0xff] }
 0x5ff   : > { %v2332_v40 = vsel %vm1599_vm0, %v6624_v39, 0.0 }
 0x600   : > { %2333 = vadd.xlane.f32.xlu1 %v2332_v40  ;;  %2562 = vmatpush.msra.mxu0 %v5598_v34  ;;  %v5588_v40 = vld [vmem:[%s7360_s19 + $0x88] sm:$0xff]  ;;  %v5945_v34 = vld [vmem:[%s7368_s22 + $0x6] ss:$0 sm:$0xff] }
 0x601   : > { %2524 = vmatpush.msra.mxu2 %v5588_v40 }
 0x602   : > { %2563 = vmatpush.msra.mxu0 %v5597_v38 }
 0x673   : > { %v2334_v41 = vpop.xlane.xlu1 %2333 }
 0x674   : > { %v2335_v42 = vmul.f32 %v2334_v41, %v6505_v57  ;;  %v5592_v41 = vld [vmem:[%s7360_s19 + $0xa8] sm:$0xff] }
 0x675   : > { %2544 = vmatpush.msra.mxu3 %v5592_v41  ;;  %v5949_v41 = vld [vmem:[%s7362_s12 + $0x5] ss:$0 sm:$0xff] }
 0x676   : > { %v2336_v43 = vsub.f32 %v6624_v39, %v2335_v42  ;;  %v5596_v42 = vld [vmem:[%s7360_s19 + $0xc8] sm:$0xff] }
 0x677   : > { %2564 = vmatpush.msra.mxu0 %v5596_v42  ;;  %v5950_v42 = vld [vmem:[%s7359_s20 + $0x6] ss:$0 sm:$0xff] }
 0x678   : > { %v2337_v44 = vmul.f32 %v2336_v43, %v2336_v43 }
 0x679   : > { %2565 = vmatpush.msra.mxu0 %v5595_v46 }
 0x67a   : > { %v2338_v45 = vsel %vm1599_vm0, %v2337_v44, 0.0  ;;  %v5587_v44 = vld [vmem:[%s7360_s19 + $0x80] sm:$0xff] }
 0x67b   : > { %2339 = vadd.xlane.f32.xlu2 %v2338_v45  ;;  %v5591_v45 = vld [vmem:[%s7360_s19 + $0xa0] sm:$0xff]  ;;  %2525 = vmatpush.msra.mxu2 %v5587_v44 }
 0x67c   : > { %2545 = vmatpush.msra.mxu3 %v5591_v45 }
 0x67d   : > { %2582 = vmatpush.msrb.mxu2 %v5602_v48  ;;  %v5952_v48 = vld [vmem:[%s7362_s12 + $0x4] ss:$0 sm:$0xff] }
 0x67e   : > { %2636 = vmatpush.msrb.mxu3 %v5614_v49 }
 0x6ee   : > { %v2340_v50 = vpop.xlane.xlu2 %2339 }
 0x6ef   : > { %v2341_v51 = vmul.f32 %v2340_v50, %v6505_v57  ;;  %v5618_v50 = vld [vmem:[%s6251_s24 + $0xb8] sm:$0xff] }
 0x6f1   : > { %v2342_v52 = vadd.f32 1e-05, %v2341_v51  ;;  %v5646_v51 = vld [vmem:[%s6256_s30 + $0xd8] sm:$0xff] }
 0x6f3   : > { %6025 = vrsqrt.f32 %v2342_v52  ;;  %vm2349_vm7 = vweird.f32 %v2342_v52 }
 0x6f9   : > { %v6026_v53 = vpop.eup %6025 }
 0x6fa   : > { %v2344_v54 = vmul.f32 %v6026_v53, %v2342_v52  ;;  %vm2350_vm6 = vweird.f32 %v6026_v53  ;;  %v5601_v52 = vld [vmem:[%s7360_s19 + $0xf0] sm:$0xff] }
 0x6fb   : > { %vm2351_vm8 = vmor %vm2349_vm7, %vm2350_vm6  ;;  %2583 = vmatpush.msrb.mxu2 %v5601_v52 }
 0x6fc   : > { %v2345_v55 = vmul.f32 %v6026_v53, %v2344_v54 }
 0x6fe   : > { %v2346_v56 = vmul.f32 0.5, %v2345_v55  ;;  %v5617_v55 = vld [vmem:[%s6251_s24 + $0xb0] sm:$0xff] }
 0x700   : > { %v2347_v58 = vsub.f32 1.5, %v2346_v56  ;;  %v5645_v56 = vld [vmem:[%s6256_s30 + $0xd0] sm:$0xff] }
 0x702   : > { %v2348_v59 = vmul.f32 %v6026_v53, %v2347_v58  ;;  %v5600_v58 = vld [vmem:[%s7360_s19 + $0xe8] sm:$0xff] }
 0x703   : > { %2584 = vmatpush.msrb.mxu2 %v5600_v58 }
 0x704   : > { %v2352_v61 = vsel %vm2351_vm8, %v6026_v53, %v2348_v59  ;;  %v5613_v53 = vld [vmem:[%s6251_s24 + $0x90] sm:$0xff] }
 0x705   : > { %v2353_v62 = vmul.f32 %v2352_v61, %v2336_v43  ;;  %v5620_v43 = vld [vmem:[%s6251_s24 + $0xc8] sm:$0xff]  ;;  %2637 = vmatpush.msrb.mxu3 %v5613_v53  ;;  %v5953_v53 = vld [vmem:[%s7359_s20 + $0x5] ss:$0 sm:$0xff] }
 0x706   : > { %v5616_v61 = vld [vmem:[%s6251_s24 + $0xa8] sm:$0xff] }
 0x707   : > { %v2357_v0 = vmul.f32 %v5939_v60, %v2353_v62  ;;  %v5612_v60 = vld [vmem:[%s6251_s24 + $0x88] sm:$0xff] }
 0x708   : > { %v5644_v62 = vld [vmem:[%s6256_s30 + $0xc8] sm:$0xff]  ;;  %2638 = vmatpush.msrb.mxu3 %v5612_v60  ;;  %v5955_v60 = vld [vmem:[%s7359_s20 + $0x4] ss:$0 sm:$0xff] }
 0x709   : > { %v2361_v1 = vadd.f32 %v5940_v63, %v2357_v0  ;;  %v5599_v63 = vld [vmem:[%s7360_s19 + $0xe0] sm:$0xff]  ;;  %s7398_s19 = sld [smem:[#allocation35_spill]] }
 0x70a   : > { %v5611_v0 = vld [vmem:[%s6251_s24 + $0x80] sm:$0xff]  ;;  %2585 = vmatpush.msrb.mxu2 %v5599_v63 }
 0x70b   : > { %5583 = vmatmul.msk.f32.vlgmr.msrb.gmra.mxu0 %vm1599_vm0, %v2361_v1  ;;  %2639 = vmatpush.msrb.mxu3 %v5611_v0 }
 0x70c   : > { %2656 = vmatpush.msrb.mxu0 %v5618_v50  ;;  %v5947_v50 = vld [vmem:[%s7368_s22 + $0x4] ss:$0 sm:$0xff] }
 0x70e   : > { %2657 = vmatpush.msrb.mxu0 %v5617_v55 }
 0x710   : > { %2658 = vmatpush.msrb.mxu0 %v5616_v61  ;;  %v5951_v61 = vld [vmem:[%s7368_s22 + $0x7] ss:$0 sm:$0xff] }
 0x712   : > { %2659 = vmatpush.msrb.mxu0 %v5615_v2 }
 0x788   : > { %v2390_v11 = vpop.f32.mrf.mxu0 }
 0x789   : > { %v2391_v12 = vadd.f32 %v5941_v10, %v2390_v11  ;;  %v5943_v10 = vld [vmem:[%s7363_s8 + $0x1] ss:$0 sm:$0xff]  ;;  %s7391_s8 = sld [smem:[#allocation30_spill]] }
 0x78b   : > { %v2393_v13 = vmul.f32 %v2391_v12, %v2391_v12 }
 0x78d   : > { %v2394_v14 = vmul.f32 %v2393_v13, %v2391_v12 }
 0x78f   : > { %v2395_v15 = vmul.f32 0.044715, %v2394_v14 }
 0x791   : > { %v2396_v16 = vadd.f32 %v2395_v15, %v2391_v12 }
 0x793   : > { %v2397_v17 = vmul.f32 0.7978846, %v2396_v16  ;;  %v5626_v16 = vld [vmem:[%s6251_s24 + $0xf8] sm:$0xff] }
 0x795   : > { %6027 = vtanh.f32 %v2397_v17  ;;  %v5638_v17 = vld [vmem:[%s6256_s30 + $0x98] sm:$0xff] }
 0x79b   : > { %v6028_v18 = vpop.eup %6027 }
 0x79c   : > { %v2399_v19 = vadd.f32 1.0, %v6028_v18  ;;  %v5642_v18 = vld [vmem:[%s6256_s30 + $0xb8] sm:$0xff] }
 0x79e   : > { %v2400_v20 = vmul.f32 0.5, %v2399_v19  ;;  %v5625_v19 = vld [vmem:[%s6251_s24 + $0xf0] sm:$0xff] }
 0x7a0   : > { %v2401_v21 = vmul.f32 %v2400_v20, %v2391_v12  ;;  %v5944_v12 = vld [vmem:[%s7361_s14 + $0x1] ss:$0 sm:$0xff]  ;;  %v5637_v20 = vld [vmem:[%s6256_s30 + $0x90] sm:$0xff]  ;;  %s7394_s14 = sld [smem:[#allocation32_spill]] }
 0x7a2   : > { %5584 = vmatmul.msk.f32.vlgmr.msrb.gmra.mxu1 %vm2414_vm9, %v2401_v21  ;;  %v5641_v21 = vld [vmem:[%s6256_s30 + $0xb0] sm:$0xff] }
 0x81f   : > { %v2435_v23 = vpop.f32.mrf.mxu1 }
 0x820   : > { %v2436_v24 = vadd.f32 %v5942_v22, %v2435_v23  ;;  %v5624_v22 = vld [vmem:[%s6251_s24 + $0xe8] sm:$0xff] }
 0x821   : > { %v5636_v23 = vld [vmem:[%s6256_s30 + $0x88] sm:$0xff] }
 0x822   : > { %v6651_v25 = vadd.f32 %v2436_v24, %v6624_v39  ;;  %v5621_v39 = vld [vmem:[%s6251_s24 + $0xd0] sm:$0xff]  ;;  %v5640_v24 = vld [vmem:[%s6256_s30 + $0xa8] sm:$0xff] }
 0x823   : > { %2677 = vmatpush.msra.mxu1 %v5621_v39 }
 0x824   : > { %v2443_v26 = vsel %vm1599_vm0, %v6651_v25, 0.0 }
 0x825   : > { %2444 = vadd.xlane.f32.xlu0 %v2443_v26  ;;  %2678 = vmatpush.msra.mxu1 %v5620_v43  ;;  %v5623_v26 = vld [vmem:[%s6251_s24 + $0xe0] sm:$0xff] }
 0x826   : > { %v5948_v43 = vld [vmem:[%s7368_s22 + $0x5] ss:$0 sm:$0xff]  ;;  %s7401_s22 = sld [smem:[#allocation39_spill]] }
 0x827   : > { %2679 = vmatpush.msra.mxu1 %v5619_v47 }
 0x829   : > { %2790 = vmatpush.msrb.mxu1 %v5646_v51 }
 0x82b   : > { %2791 = vmatpush.msrb.mxu1 %v5645_v56 }
 0x82d   : > { %2792 = vmatpush.msrb.mxu1 %v5644_v62 }
 0x82f   : > { %2793 = vmatpush.msrb.mxu1 %v5643_v3  ;;  %v5956_v3 = vld [vmem:[%s7359_s20 + $0x7] ss:$0 sm:$0xff]  ;;  %s7399_s20 = sld [smem:[#allocation38_spill]] }
 0x898   : > { %v2445_v27 = vpop.xlane.xlu0 %2444 }
 0x899   : > { %v2446_v28 = vmul.f32 %v2445_v27, %v6505_v57  ;;  %v5635_v27 = vld [vmem:[%s6256_s30 + $0x80] sm:$0xff] }
 0x89b   : > { %v6657_v29 = vsub.f32 %v6651_v25, %v2446_v28  ;;  %v5639_v28 = vld [vmem:[%s6256_s30 + $0xa0] sm:$0xff] }
 0x89d   : > { %v2448_v30 = vmul.f32 %v6657_v29, %v6657_v29 }
 0x89f   : > { %v2449_v31 = vsel %vm1599_vm0, %v2448_v30, 0.0  ;;  %v5649_v30 = vld [vmem:[%s6256_s30 + $0xf0] sm:$0xff] }
 0x8a0   : > { %2450 = vadd.xlane.f32.xlu1 %v2449_v31  ;;  %v5648_v31 = vld [vmem:[%s6256_s30 + $0xe8] sm:$0xff] }
 0x913   : > { %v2451_v54 = vpop.xlane.xlu1 %2450 }
 0x914   : > { %v2452_v59 = vmul.f32 %v2451_v54, %v6505_v57 }
 0x916   : > { %v2453_v1 = vadd.f32 1e-05, %v2452_v59  ;;  %v5954_v59 = vld [vmem:[%s7362_s12 + $0x7] ss:$0 sm:$0xff]  ;;  %s7393_s12 = sld [smem:[#allocation29_spill]] }
 0x918   : > { %6029 = vrsqrt.f32 %v2453_v1  ;;  %vm2460_vm11 = vweird.f32 %v2453_v1 }
 0x91e   : > { %v6030_v4 = vpop.eup %6029 }
 0x91f   : > { %v2455_v5 = vmul.f32 %v6030_v4, %v2453_v1  ;;  %vm2461_vm10 = vweird.f32 %v6030_v4 }
 0x920   : > { %vm2462_vm12 = vmor %vm2460_vm11, %vm2461_vm10 }
 0x921   : > { %v2456_v6 = vmul.f32 %v6030_v4, %v2455_v5 }
 0x923   : > { %v2457_v7 = vmul.f32 0.5, %v2456_v6 }
 0x925   : > { %v2458_v8 = vsub.f32 1.5, %v2457_v7 }
 0x927   : > { %v2459_v9 = vmul.f32 %v6030_v4, %v2458_v8 }
 0x929   : > { %v2463_v11 = vsel %vm2462_vm12, %v6030_v4, %v2459_v9 }
 0x92a   : > { %v2464_v13 = vmul.f32 %v2463_v11, %v6657_v29  ;;  %v5650_v29 = vld [vmem:[%s6256_s30 + $0xf8] sm:$0xff] }
 0x92c   : > { %v2468_v14 = vmul.f32 %v5943_v10, %v2464_v13 }
 0x92e   : > { %v2472_v15 = vadd.f32 %v5944_v12, %v2468_v14 }
 0x930   : > { %5607 = vmatmul.msk.f32.vlgmr.msra.gmra.mxu2 %vm1599_vm0, %v2472_v15  ;;  %5608 = vmatmul.msk.f32.vlgmr.msra.gmra.mxu3 %vm1599_vm0, %v2472_v15 }
 0x931   : > { %5609 = vmatmul.msk.f32.vlgmr.msra.gmra.mxu0 %vm1599_vm0, %v2472_v15  ;;  %5633 = vmatmul.msk.f32.vlgmr.msra.gmra.mxu1 %vm1599_vm0, %v2472_v15 }
 0x932   : > { %2696 = vmatpush.msra.mxu2 %v5626_v16  ;;  %2750 = vmatpush.msra.mxu3 %v5638_v17 }
 0x933   : > { %2770 = vmatpush.msra.mxu0 %v5642_v18 }
 0x934   : > { %2697 = vmatpush.msra.mxu2 %v5625_v19  ;;  %2751 = vmatpush.msra.mxu3 %v5637_v20 }
 0x935   : > { %2771 = vmatpush.msra.mxu0 %v5641_v21 }
 0x936   : > { %2698 = vmatpush.msra.mxu2 %v5624_v22  ;;  %2752 = vmatpush.msra.mxu3 %v5636_v23 }
 0x937   : > { %2772 = vmatpush.msra.mxu0 %v5640_v24 }
 0x938   : > { %5610 = vmatmul.msk.f32.vlgmr.msrb.gmra.mxu2 %vm1599_vm0, %v2472_v15  ;;  %5631 = vmatmul.msk.f32.vlgmr.msrb.gmra.mxu3 %vm1599_vm0, %v2472_v15 }
 0x939   : > { %5632 = vmatmul.msk.f32.vlgmr.msrb.gmra.mxu0 %vm1599_vm0, %v2472_v15  ;;  %5657 = vmatmul.msk.f32.vlgmr.msrb.gmra.mxu1 %vm1599_vm0, %v2472_v15 }
 0x93a   : > { %2699 = vmatpush.msra.mxu2 %v5623_v26  ;;  %2753 = vmatpush.msra.mxu3 %v5635_v27 }
 0x93b   : > { %2773 = vmatpush.msra.mxu0 %v5639_v28 }
 0x93c   : > { %2810 = vmatpush.msrb.mxu2 %v5650_v29 }
 0x93e   : > { %2811 = vmatpush.msrb.mxu2 %v5649_v30 }
 0x940   : > { %2812 = vmatpush.msrb.mxu2 %v5648_v31  ;;  %5655 = vmatmul.msk.f32.vlgmr.msra.gmra.mxu3 %vm1599_vm0, %v2472_v15 }
 0x941   : > { %5634 = vmatmul.msk.f32.vlgmr.msra.gmra.mxu2 %vm1599_vm0, %v2472_v15  ;;  %5656 = vmatmul.msk.f32.vlgmr.msra.gmra.mxu0 %vm1599_vm0, %v2472_v15 }
 0x942   : > { %2813 = vmatpush.msrb.mxu2 %v5647_v32 }
 0x949   : > { %5658 = vmatmul.msk.f32.vlgmr.msrb.gmra.mxu2 %vm1599_vm0, %v2472_v15 }
 0x9ae   : > { %v2567_v35 = vpop.f32.mrf.mxu0  ;;  %v2681_v36 = vpop.f32.mrf.mxu1 }
 0x9af   : > { %v2682_v37 = vadd.f32 %v5946_v33, %v2681_v36  ;;  %v2568_v38 = vadd.f32 %v5945_v34, %v2567_v35 }
 0x9b1   : > { %5663 = vmatpush.xpose.msk.msra.mxu1 %vm1976_vm5, %v2682_v37 }
 0x9b3   : > { %v2527_v39 = vpop.f32.mrf.mxu2  ;;  %v2547_v40 = vpop.f32.mrf.mxu3 }
 0x9b4   : > { %5664 = vmatmul.msk.f32.vlgmr.msra.gmra.mxu1 %vm1976_vm5, %v2568_v38  ;;  %v2548_v49 = vadd.f32 %v5948_v43, %v2547_v40  ;;  %v2528_v56 = vadd.f32 %v5947_v50, %v2527_v39 }
 0x9b6   : > { %v2661_v44 = vpop.f32.mrf.mxu0  ;;  %v2795_v45 = vpop.f32.mrf.mxu1 }
 0x9b7   : > { %v2662_v46 = vadd.f32 %v5949_v41, %v2661_v44  ;;  %v2796_v47 = vadd.f32 %v5950_v42, %v2795_v45 }
 0x9b9   : > { %5661 = vmatpush.xpose.msk.msrb.mxu0 %vm1976_vm5, %v2662_v46  ;;  %3034 = vmatpush.msrb.mxu1 %v2796_v47 }
 0x9bb   : > { %v2587_v51 = vpop.f32.mrf.mxu2  ;;  %v2641_v52 = vpop.f32.mrf.mxu3 }
 0x9bc   : > { %v2642_v54 = vadd.f32 %v5952_v48, %v2641_v52  ;;  %5662 = vmatmul.msk.f32.vlgmr.msrb.gmra.mxu0 %vm1976_vm5, %v2548_v49  ;;  %v2588_v2 = vadd.f32 %v5951_v61, %v2587_v51  ;;  %v5672_v51 = vld [vmem:[%s7369_s26 + $0x28] sm:$0xff]  ;;  %v5671_v52 = vld [vmem:[%s7369_s26 + $0x20] sm:$0xff] }
 0x9be   : > { %v2775_v55 = vpop.f32.mrf.mxu0  ;;  %5659 = vmatpush.xpose.msk.msrb.mxu3 %vm1976_vm5, %v2642_v54  ;;  %v5674_v54 = vld [vmem:[%s7369_s26 + $0x38] sm:$0xff] }
 0x9bf   : > { %v2776_v58 = vadd.f32 %v5953_v53, %v2775_v55  ;;  %v5673_v53 = vld [vmem:[%s7369_s26 + $0x30] sm:$0xff] }
 0x9c0   : > { %3131 = vmatpush.msra.mxu1 %v5673_v53 }
 0x9c1   : > { %3011 = vmatpush.msra.mxu0 %v2776_v58  ;;  %5660 = vmatmul.msk.f32.vlgmr.msrb.gmra.mxu3 %vm1976_vm5, %v2528_v56 }
 0x9c3   : > { %v2755_v63 = vpop.f32.mrf.mxu3  ;;  %3108 = vmatpush.msrb.mxu0 %v5672_v51  ;;  %v5960_v51 = vld [vmem:[%s7375_s1 + $0x1] ss:$0 sm:$0xff]  ;;  %s7386_s1 = sld [smem:[#allocation26_spill]] }
 0x9c4   : > { %v2701_v62 = vpop.f32.mrf.mxu2  ;;  %v2756_v1 = vadd.f32 %v5955_v60, %v2755_v63 }
 0x9c5   : > { %v2702_v0 = vadd.f32 %v5954_v59, %v2701_v62 }
 0x9c6   : > { %2988 = vmatpush.msra.mxu3 %v2756_v1 }
 0x9c7   : > { %5665 = vmatpush.xpose.msk.msra.mxu2 %vm1976_vm5, %v2702_v0 }
 0x9c8   : > { %3085 = vmatpush.msrb.mxu3 %v5671_v52 }
 0x9ca   : > { %5666 = vmatmul.msk.f32.vlgmr.msra.gmra.mxu2 %vm1976_vm5, %v2588_v2 }
 0x9cc   : > { %v2815_v4 = vpop.f32.mrf.mxu2 }
 0x9cd   : > { %v2816_v5 = vadd.f32 %v5956_v3, %v2815_v4 }
 0x9cf   : > { %3057 = vmatpush.msrb.mxu2 %v2816_v5  ;;  %v5957_v5 = vld [vmem:[%s7370_s28 + $0x1] ss:$0 sm:$0xff] }
 0x9d1   : > { %3154 = vmatpush.msra.mxu2 %v5674_v54 }
 0xa31   : > { %v2893_v12 = vpop.f32.mrf.mxu1 }
 0xa32   : > { %v2924_v13 = vmul.f32 0.35355338, %v2893_v12 }
 0xa34   : > { %v2932_v17 = vsel %vm1976_vm5, %v2924_v13, -inf }
 0xa39   : > { %v2867_v6 = vpop.f32.mrf.mxu0 }
 0xa3a   : > { %v2923_v7 = vmul.f32 0.35355338, %v2867_v6 }
 0xa3c   : > { %v2929_v8 = vsel %vm1976_vm5, %v2923_v7, -inf }
 0xa3d   : > { %2930 = vmax.xlane.f32.xlu1 %v2929_v8 }
 0xa44   : > { %v2841_v9 = vpop.f32.mrf.mxu3 }
 0xa45   : > { %v2922_v10 = vmul.f32 0.35355338, %v2841_v9 }
 0xa47   : > { %v2926_v11 = vsel %vm1976_vm5, %v2922_v10, -inf }
 0xa48   : > { %2927 = vmax.xlane.f32.xlu2 %v2926_v11 }
 0xa4d   : > { %v2919_v14 = vpop.f32.mrf.mxu2 }
 0xa4e   : > { %v2925_v15 = vmul.f32 0.35355338, %v2919_v14 }
 0xa50   : > { %v2935_v16 = vsel %vm1976_vm5, %v2925_v15, -inf  ;;  %2933 = vmax.xlane.f32.xlu2 %v2932_v17  ;;  %v5684_v17 = vld [vmem:[%s7371_s2 + $0x30] sm:$0xff] }
 0xa51   : > { %2936 = vmax.xlane.f32.xlu0 %v2935_v16  ;;  %v5685_v16 = vld [vmem:[%s7371_s2 + $0x38] sm:$0xff] }
 0xab0   : > { %v2931_v18 = vpop.xlane.xlu1 %2930 }
 0xab1   : > { %v2939_v19 = vsub.f32 %v2923_v7, %v2931_v18  ;;  %v5683_v18 = vld [vmem:[%s7371_s2 + $0x28] sm:$0xff] }
 0xab3   : > { %v2944_v20 = vmul.f32 1.442695, %v2939_v19 }
 0xab5   : > { %6031 = vpow2.f32 %v2944_v20 }
 0xabb   : > { %v6032_v21 = vpop.eup %6031  ;;  %v2928_v22 = vpop.xlane.xlu2 %2927 }
 0xabc   : > { %v2938_v23 = vsub.f32 %v2922_v10, %v2928_v22  ;;  %v2953_v24 = vsel %vm1976_vm5, %v6032_v21, 0.0 }
 0xabd   : > { %2954 = vadd.xlane.f32.xlu2 %v2953_v24 }
 0xabe   : > { %v2942_v26 = vmul.f32 1.442695, %v2938_v23 }
 0xac0   : > { %6033 = vpow2.f32 %v2942_v26 }
 0xac3   : > { %v2934_v28 = vpop.xlane.xlu2 %2933 }
 0xac4   : > { %v2937_v27 = vpop.xlane.xlu0 %2936  ;;  %v2940_v30 = vsub.f32 %v2924_v13, %v2934_v28 }
 0xac5   : > { %v2941_v29 = vsub.f32 %v2925_v15, %v2937_v27 }
 0xac6   : > { %v6034_v31 = vpop.eup %6033  ;;  %v2946_v33 = vmul.f32 1.442695, %v2940_v30 }
 0xac7   : > { %v2948_v32 = vmul.f32 1.442695, %v2941_v29  ;;  %v2950_v34 = vsel %vm1976_vm5, %v6034_v31, 0.0  ;;  %v5958_v29 = vld [vmem:[%s7372_s16 + $0x1] ss:$0 sm:$0xff]  ;;  %s7396_s16 = sld [smem:[#allocation36_spill]] }
 0xac8   : > { %2951 = vadd.xlane.f32.xlu0 %v2950_v34 }
 0xac9   : > { %6035 = vpow2.f32 %v2948_v32  ;;  %v5959_v32 = vld [vmem:[%s7373_s27 + $0x1] ss:$0 sm:$0xff] }
 0xaca   : > { %6037 = vpow2.f32 %v2946_v33 }
 0xacf   : > { %v6036_v35 = vpop.eup %6035 }
 0xad0   : > { %v6038_v36 = vpop.eup %6037  ;;  %v2959_v37 = vsel %vm1976_vm5, %v6036_v35, 0.0 }
 0xad1   : > { %2960 = vadd.xlane.f32.xlu1 %v2959_v37  ;;  %v2956_v38 = vsel %vm1976_vm5, %v6038_v36, 0.0  ;;  %v5693_v37 = vld [vmem:[%s7374_s5 + $0x68] sm:$0xff] }
 0xad2   : > { %2957 = vadd.xlane.f32.xlu0 %v2956_v38  ;;  %v5692_v38 = vld [vmem:[%s7374_s5 + $0x60] sm:$0xff] }
 0xb30   : > { %v2955_v39 = vpop.xlane.xlu2 %2954 }
 0xb31   : > { %6039 = vrcp.f32 %v2955_v39  ;;  %v5691_v39 = vld [vmem:[%s7374_s5 + $0x58] sm:$0xff] }
 0xb37   : > { %v6040_v40 = vpop.eup %6039 }
 0xb38   : > { %v2967_v41 = vmul.f32 %v6040_v40, %v6032_v21  ;;  %v5690_v40 = vld [vmem:[%s7374_s5 + $0x50] sm:$0xff] }
 0xb3a   : > { %5668 = vmatmul.msk.f32.vlgmr.msra.gmra.mxu0 %vm1976_vm5, %v2967_v41  ;;  %v5689_v41 = vld [vmem:[%s7374_s5 + $0x48] sm:$0xff] }
 0xb3b   : > { %v2952_v42 = vpop.xlane.xlu0 %2951 }
 0xb3c   : > { %6041 = vrcp.f32 %v2952_v42  ;;  %v5688_v42 = vld [vmem:[%s7374_s5 + $0x40] sm:$0xff] }
 0xb42   : > { %v6042_v43 = vpop.eup %6041 }
 0xb43   : > { %v2966_v44 = vmul.f32 %v6042_v43, %v6034_v31  ;;  %v6796_v43 = vld [vmem:[%s7377_s15 + $0x38] sm:$0xff] }
 0xb44   : > { %v2961_v45 = vpop.xlane.xlu1 %2960 }
 0xb45   : > { %6043 = vrcp.f32 %v2961_v45  ;;  %v2958_v46 = vpop.xlane.xlu0 %2957  ;;  %5667 = vmatmul.msk.f32.vlgmr.msra.gmra.mxu3 %vm1976_vm5, %v2966_v44  ;;  %v6799_v44 = vld [vmem:[%s7377_s15 + $0x30] sm:$0xff]  ;;  %v6802_v45 = vld [vmem:[%s7377_s15 + $0x28] sm:$0xff] }
 0xb46   : > { %6045 = vrcp.f32 %v2958_v46  ;;  %3232 = vmatpush.msra.mxu3 %v5685_v16  ;;  %v3318_v46 = vmul.f32 %v6796_v43, %v6796_v43 }
 0xb48   : > { %3233 = vmatpush.msra.mxu3 %v5684_v17  ;;  %v3340_v52 = vsel %vm1599_vm0, %v3318_v46, 0.0 }
 0xb49   : > { %3341 = vadd.xlane.f32.xlu0 %v3340_v52 }
 0xb4a   : > { %3234 = vmatpush.msra.mxu3 %v5683_v18 }
 0xb4b   : > { %v6044_v47 = vpop.eup %6043 }
 0xb4c   : > { %v6046_v48 = vpop.eup %6045  ;;  %v2969_v49 = vmul.f32 %v6044_v47, %v6036_v35  ;;  %v5695_v35 = vld [vmem:[%s7374_s5 + $0x78] sm:$0xff]  ;;  %v3317_v47 = vmul.f32 %v6799_v44, %v6799_v44 }
 0xb4d   : > { %v2968_v50 = vmul.f32 %v6046_v48, %v6038_v36  ;;  %3274 = vmatpush.msra.mxu0 %v5695_v35  ;;  %v5694_v36 = vld [vmem:[%s7374_s5 + $0x70] sm:$0xff]  ;;  %v3316_v48 = vmul.f32 %v6802_v45, %v6802_v45  ;;  %s7390_s5 = sld [smem:[#allocation25_spill]] }
 0xb4e   : > { %5670 = vmatmul.msk.f32.vlgmr.msrb.gmra.mxu2 %vm1976_vm5, %v2969_v49  ;;  %v6811_v49 = vld [vmem:[%s7377_s15 + $0x20] sm:$0xff]  ;;  %v3337_v53 = vsel %vm1599_vm0, %v3317_v47, 0.0 }
 0xb4f   : > { %5669 = vmatmul.msk.f32.vlgmr.msrb.gmra.mxu1 %vm1976_vm5, %v2968_v50  ;;  %3275 = vmatpush.msra.mxu0 %v5694_v36  ;;  %v6814_v50 = vld [vmem:[%s7377_s15 + $0x18] sm:$0xff]  ;;  %v3334_v54 = vsel %vm1599_vm0, %v3316_v48, 0.0 }
 0xb51   : > { %3276 = vmatpush.msra.mxu0 %v5693_v37 }
 0xb53   : > { %3277 = vmatpush.msra.mxu0 %v5692_v38 }
 0xb55   : > { %3278 = vmatpush.msra.mxu0 %v5691_v39 }
 0xb57   : > { %3279 = vmatpush.msra.mxu0 %v5690_v40 }
 0xb59   : > { %3280 = vmatpush.msra.mxu0 %v5689_v41 }
 0xb5b   : > { %3281 = vmatpush.msra.mxu0 %v5688_v42 }
 0xbb7   : > { %v3013_v55 = vpop.f32.mrf.mxu0 }
 0xbb8   : > { %5676 = vmatmul.msk.f32.vlgmr.msrb.gmra.mxu0 %vm1976_vm5, %v3013_v55  ;;  %v6821_v55 = vld [vmem:[%s7377_s15 + $0x10] sm:$0xff] }
 0xbbc   : > { %v3342_v17 = vpop.xlane.xlu0 %3341 }
 0xbc8   : > { %v2990_v56 = vpop.f32.mrf.mxu3 }
 0xbc9   : > { %5675 = vmatmul.msk.f32.vlgmr.msrb.gmra.mxu3 %vm1976_vm5, %v2990_v56  ;;  %v3315_v56 = vmul.f32 %v6811_v49, %v6811_v49 }
 0xbcc   : > { %v3036_v58 = vpop.f32.mrf.mxu1 }
 0xbcd   : > { %5677 = vmatmul.msk.f32.vlgmr.msra.gmra.mxu1 %vm1976_vm5, %v3036_v58  ;;  %v3314_v58 = vmul.f32 %v6814_v50, %v6814_v50 }
 0xbd1   : > { %v3059_v59 = vpop.f32.mrf.mxu2 }
 0xbd2   : > { %5678 = vmatmul.msk.f32.vlgmr.msra.gmra.mxu2 %vm1976_vm5, %v3059_v59 }
 0xc35   : > { %v3110_v60 = vpop.f32.mrf.mxu0 }
 0xc36   : > { %v3160_v63 = vsel %vm1599_vm0, %v3110_v60, 0.0  ;;  %v3313_v60 = vmul.f32 %v6821_v55, %v6821_v55 }
 0xc4a   : > { %v3133_v0 = vpop.f32.mrf.mxu1 }
 0xc4b   : > { %v3162_v2 = vsel %vm1599_vm0, %v3133_v0, 0.0  ;;  %v3328_v0 = vsel %vm1599_vm0, %v3314_v58, 0.0 }
 0xc4c   : > { %v3087_v61 = vpop.f32.mrf.mxu3 }
 0xc4d   : > { %v3159_v62 = vsel %vm1599_vm0, %v3087_v61, 0.0 }
 0xc4e   : > { %v3161_v1 = vadd.f32 %v3160_v63, %v3159_v62  ;;  %v3331_v63 = vsel %vm1599_vm0, %v3315_v56, 0.0 }
 0xc4f   : > { %3332 = vadd.xlane.f32.xlu0 %v3331_v63 }
 0xc50   : > { %v3163_v4 = vadd.f32 %v3162_v2, %v3161_v1  ;;  %v3325_v1 = vsel %vm1599_vm0, %v3313_v60, 0.0  ;;  %v6833_v2 = vld [vmem:[%s7377_s15 + $0x8] sm:$0xff] }
 0xc55   : > { %v3156_v3 = vpop.f32.mrf.mxu2 }
 0xc56   : > { %v3164_v6 = vsel %vm1599_vm0, %v3156_v3, 0.0  ;;  %v6836_v3 = vld [vmem:[%s7377_s15] sm:$0xff]  ;;  %s7395_s15 = sld [smem:[#allocation33_spill]] }
 0xc57   : > { %v3165_v7 = vadd.f32 %v3164_v6, %v3163_v4  ;;  %v3312_v6 = vmul.f32 %v6833_v2, %v6833_v2 }
 0xc59   : > { %v3171_v8 = vadd.f32 %v5957_v5, %v3165_v7  ;;  %v3311_v7 = vmul.f32 %v6836_v3, %v6836_v3 }
 0xc5b   : > { %v6772_v9 = vadd.f32 %v3171_v8, %v6651_v25  ;;  %v5682_v25 = vld [vmem:[%s7371_s2 + $0x20] sm:$0xff]  ;;  %s7387_s2 = sld [smem:[#allocation28_spill]] }
 0xc5c   : > { %3235 = vmatpush.msra.mxu3 %v5682_v25  ;;  %v3350_v25 = vadd.f32 1e-12, %v3342_v17 }
 0xc5d   : > { %v3177_v10 = vsel %vm1599_vm0, %v6772_v9, 0.0 }
 0xc5e   : > { %3178 = vadd.xlane.f32.xlu1 %v3177_v10  ;;  %vm3427_vm1 = vweird.f32 %v3350_v25 }
 0xc66   : > { %3338 = vadd.xlane.f32.xlu1 %v3337_v53 }
 0xc6e   : > { %3329 = vadd.xlane.f32.xlu1 %v3328_v0 }
 0xcd1   : > { %v3179_v11 = vpop.xlane.xlu1 %3178 }
 0xcd2   : > { %v3180_v12 = vmul.f32 %v3179_v11, %v6505_v57  ;;  %v3322_v11 = vsel %vm1599_vm0, %v3312_v6, 0.0 }
 0xcd3   : > { %3323 = vadd.xlane.f32.xlu0 %v3322_v11 }
 0xcd4   : > { %v3181_v13 = vsub.f32 %v6772_v9, %v3180_v12  ;;  %v3319_v12 = vsel %vm1599_vm0, %v3311_v7, 0.0 }
 0xcd5   : > { %3320 = vadd.xlane.f32.xlu1 %v3319_v12 }
 0xcd6   : > { %v3182_v14 = vmul.f32 %v3181_v13, %v3181_v13 }
 0xcd8   : > { %v3183_v15 = vsel %vm1599_vm0, %v3182_v14, 0.0 }
 0xcd9   : > { %3184 = vadd.xlane.f32.xlu2 %v3183_v15  ;;  %v3339_v18 = vpop.xlane.xlu1 %3338 }
 0xce1   : > { %3335 = vadd.xlane.f32.xlu2 %v3334_v54 }
 0xce9   : > { %3326 = vadd.xlane.f32.xlu2 %v3325_v1  ;;  %v5961_v1 = vld [vmem:[%s7376_s4 + $0x1] ss:$0 sm:$0xff]  ;;  %s7389_s4 = sld [smem:[#allocation24_spill]] }
 0xd4c   : > { %v3185_v19 = vpop.xlane.xlu2 %3184 }
 0xd4d   : > { %v3186_v20 = vmul.f32 %v3185_v19, %v6505_v57  ;;  %v3349_v19 = vadd.f32 1e-12, %v3339_v18 }
 0xd4f   : > { %v3187_v21 = vadd.f32 1e-05, %v3186_v20  ;;  %vm3417_vm3 = vweird.f32 %v3349_v19 }
 0xd51   : > { %6047 = vrsqrt.f32 %v3187_v21  ;;  %vm3194_vm14 = vweird.f32 %v3187_v21 }
 0xd54   : > { %v3336_v20 = vpop.xlane.xlu2 %3335 }
 0xd57   : > { %v6048_v22 = vpop.eup %6047 }
 0xd58   : > { %v3189_v23 = vmul.f32 %v6048_v22, %v3187_v21  ;;  %vm3195_vm13 = vweird.f32 %v6048_v22  ;;  %v3348_v21 = vadd.f32 1e-12, %v3336_v20 }
 0xd59   : > { %vm3196_vm15 = vmor %vm3194_vm14, %vm3195_vm13 }
 0xd5a   : > { %v3190_v24 = vmul.f32 %v6048_v22, %v3189_v23  ;;  %v3330_v23 = vpop.xlane.xlu1 %3329  ;;  %vm3407_vm6 = vweird.f32 %v3348_v21 }
 0xd5c   : > { %v3191_v26 = vmul.f32 0.5, %v3190_v24 }
 0xd5e   : > { %v3192_v27 = vsub.f32 1.5, %v3191_v26 }
 0xd60   : > { %v3193_v28 = vmul.f32 %v6048_v22, %v3192_v27  ;;  %v6847_v27 = vadd.f32 1e-12, %v3330_v23 }
 0xd62   : > { %v3197_v30 = vsel %vm3196_vm15, %v6048_v22, %v3193_v28  ;;  %v3333_v22 = vpop.xlane.xlu0 %3332  ;;  %v3327_v28 = vpop.xlane.xlu2 %3326  ;;  %vm3387_vm13 = vweird.f32 %v6847_v27 }
 0xd63   : > { %v3198_v31 = vmul.f32 %v3197_v30, %v3181_v13  ;;  %v6845_v26 = vadd.f32 1e-12, %v3333_v22 }
 0xd65   : > { %v3202_v33 = vmul.f32 %v5958_v29, %v3198_v31  ;;  %v6849_v31 = vadd.f32 1e-12, %v3327_v28  ;;  %vm3397_vm12 = vweird.f32 %v6845_v26 }
 0xd67   : > { %v3206_v34 = vadd.f32 %v5959_v32, %v3202_v33 }
 0xd69   : > { %5687 = vmatmul.msk.f32.vlgmr.msra.gmra.mxu3 %vm1599_vm0, %v3206_v34 }
 0xdec   : > { %v3237_v59 = vpop.f32.mrf.mxu3 }
 0xded   : > { %v3238_v61 = vadd.f32 %v5960_v51, %v3237_v59 }
 0xdef   : > { %v3240_v62 = vmul.f32 %v3238_v61, %v3238_v61 }
 0xdf1   : > { %v3241_v4 = vmul.f32 %v3240_v62, %v3238_v61 }
 0xdf3   : > { %v3242_v5 = vmul.f32 0.044715, %v3241_v4 }
 0xdf5   : > { %v3243_v8 = vadd.f32 %v3242_v5, %v3238_v61 }
 0xdf7   : > { %v3244_v10 = vmul.f32 0.7978846, %v3243_v8 }
 0xdf9   : > { %6049 = vtanh.f32 %v3244_v10 }
 0xdfa   : > { %6051 = vrsqrt.f32 %v3350_v25 }
 0xdfb   : > { %6053 = vrsqrt.f32 %v3349_v19 }
 0xdfc   : > { %6055 = vrsqrt.f32 %v3348_v21 }
 0xdfd   : > { %6057 = vrsqrt.f32 %v6845_v26 }
 0xdfe   : > { %6059 = vrsqrt.f32 %v6847_v27 }
 0xdff   : > { %v6050_v13 = vpop.eup %6049  ;;  %6061 = vrsqrt.f32 %v6849_v31 }
 0xe00   : > { %v3246_v14 = vadd.f32 1.0, %v6050_v13  ;;  %v6052_v24 = vpop.eup %6051 }
 0xe01   : > { %v6054_v29 = vpop.eup %6053  ;;  %v3422_v30 = vmul.f32 %v6052_v24, %v3350_v25  ;;  %vm3428_vm2 = vweird.f32 %v6052_v24 }
 0xe02   : > { %v3247_v15 = vmul.f32 0.5, %v3246_v14  ;;  %v6056_v32 = vpop.eup %6055  ;;  %v3412_v33 = vmul.f32 %v6054_v29, %v3349_v19  ;;  %vm3418_vm4 = vweird.f32 %v6054_v29  ;;  %vm6854_vm8 = vmor %vm3427_vm1, %vm3428_vm2  ;;  %vm3377_vm1 = vweird.f32 %v6849_v31 }
 0xe03   : > { %v3423_v34 = vmul.f32 %v6052_v24, %v3422_v30  ;;  %v3402_v35 = vmul.f32 %v6056_v32, %v3348_v21  ;;  %vm3408_vm7 = vweird.f32 %v6056_v32  ;;  %v6058_v42 = vpop.eup %6057  ;;  %vm6858_vm10 = vmor %vm3417_vm3, %vm3418_vm4  ;;  %v3321_v30 = vpop.xlane.xlu1 %3320 }
 0xe04   : > { %v3248_v16 = vmul.f32 %v3247_v15, %v3238_v61  ;;  %v3413_v36 = vmul.f32 %v6054_v29, %v3412_v33  ;;  %v6060_v48 = vpop.eup %6059  ;;  %v3392_v54 = vmul.f32 %v6058_v42, %v6845_v26  ;;  %vm6863_vm11 = vmor %vm3407_vm6, %vm3408_vm7  ;;  %vm3398_vm14 = vweird.f32 %v6058_v42 }
 0xe05   : > { %v3424_v37 = vmul.f32 0.5, %v3423_v34  ;;  %v3403_v38 = vmul.f32 %v6056_v32, %v3402_v35  ;;  %v6062_v56 = vpop.eup %6061  ;;  %v3382_v60 = vmul.f32 %v6060_v48, %v6847_v27  ;;  %vm3388_vm15 = vweird.f32 %v6060_v48  ;;  %vm3399_vm3 = vmor %vm3397_vm12, %vm3398_vm14 }
 0xe06   : > { %5697 = vmatmul.msk.f32.vlgmr.msra.gmra.mxu0 %vm2414_vm9, %v3248_v16  ;;  %v3414_v39 = vmul.f32 0.5, %v3413_v36  ;;  %v3393_v63 = vmul.f32 %v6058_v42, %v3392_v54  ;;  %v3372_v0 = vmul.f32 %v6062_v56, %v6849_v31  ;;  %vm3378_vm2 = vweird.f32 %v6062_v56  ;;  %vm6888_vm4 = vmor %vm3387_vm13, %vm3388_vm15 }
 0xe07   : > { %v3425_v40 = vsub.f32 1.5, %v3424_v37  ;;  %v3404_v41 = vmul.f32 0.5, %v3403_v38  ;;  %v3383_v6 = vmul.f32 %v6060_v48, %v3382_v60  ;;  %vm3379_vm6 = vmor %vm3377_vm1, %vm3378_vm2  ;;  %v3343_v31 = vadd.f32 1e-12, %v3321_v30  ;;  %v3596_v30 = vld [vmem:[%s7386_s1 + $0x70] sm:$0xff] }
 0xe08   : > { %v3415_v47 = vsub.f32 1.5, %v3414_v39  ;;  %v3394_v8 = vmul.f32 0.5, %v3393_v63  ;;  %v3373_v10 = vmul.f32 %v6062_v56, %v3372_v0  ;;  %v3486_v63 = vlaneseq }
 0xe09   : > { %v3426_v51 = vmul.f32 %v6052_v24, %v3425_v40  ;;  %v3405_v53 = vsub.f32 1.5, %v3404_v41  ;;  %v3384_v11 = vmul.f32 0.5, %v3383_v6 }
 0xe0a   : > { %v3416_v58 = vmul.f32 %v6054_v29, %v3415_v47  ;;  %v3395_v13 = vsub.f32 1.5, %v3394_v8  ;;  %v3374_v14 = vmul.f32 0.5, %v3373_v10  ;;  %v3487_v0 = vand.u32 127, %v3486_v63 }
 0xe0b   : > { %v3430_v61 = vsel %vm6854_vm8, %v6052_v24, %v3426_v51  ;;  %v3406_v62 = vmul.f32 %v6056_v32, %v3405_v53  ;;  %v3385_v17 = vsub.f32 1.5, %v3384_v11 }
 0xe0c   : > { %v3438_v4 = vmul.f32 %v3430_v61, %v6796_v43  ;;  %v3420_v5 = vsel %vm6858_vm10, %v6054_v29, %v3416_v58  ;;  %v3396_v18 = vmul.f32 %v6058_v42, %v3395_v13 }
 0xe0d   : > { %v3410_v7 = vsel %vm6863_vm11, %v6056_v32, %v3406_v62  ;;  %v3437_v43 = vmul.f32 %v3420_v5, %v6799_v44  ;;  %v3375_v44 = vsub.f32 1.5, %v3374_v14  ;;  %v3386_v20 = vmul.f32 %v6060_v48, %v3385_v17 }
 0xe0e   : > { %5698 = vmatpush.xpose.msk.msrb.mxu1 %vm1599_vm0, %v3438_v4  ;;  %3522 = vmatpush.msrb.mxu3 %v3438_v4  ;;  %v3436_v15 = vmul.f32 %v3410_v7, %v6802_v45  ;;  %v3400_v45 = vsel %vm3399_vm3, %v6058_v42, %v3396_v18  ;;  %vm3357_vm11 = vweird.f32 %v3343_v31  ;;  %v6187_v17 = vmov 0.0  }
 0xe0f   : > { %v3376_v21 = vmul.f32 %v6062_v56, %v3375_v44  ;;  %v3390_v23 = vsel %vm6888_vm4, %v6060_v48, %v3386_v20  ;;  %v3435_v24 = vmul.f32 %v3400_v45, %v6811_v49  ;;  %v3324_v49 = vpop.xlane.xlu0 %3323  ;;  %v6113_v44 = vld [vmem:[%s7364_s3] sm:$0xff]  ;;  %s7388_s3 = sld [smem:[#allocation27_spill]] }
 0xe10   : > { %3523 = vmatpush.msrb.mxu3 %v3437_v43  ;;  %v3434_v27 = vmul.f32 %v3390_v23, %v6814_v50  ;;  %v3344_v29 = vadd.f32 1e-12, %v3324_v49  ;;  %v3584_v49 = vld [vmem:[%s7386_s1 + $0x10] sm:$0xff] }
 0xe11   : > { %v3380_v26 = vsel %vm3379_vm6, %v6062_v56, %v3376_v21 }
 0xe12   : > { %5699 = vmatpush.xpose.msk.msrb.mxu1 %vm1599_vm0, %v3437_v43  ;;  %3524 = vmatpush.msrb.mxu3 %v3436_v15  ;;  %v3433_v28 = vmul.f32 %v3380_v26, %v6821_v55  ;;  %6063 = vrsqrt.f32 %v3344_v29  ;;  %vm3367_vm7 = vweird.f32 %v3344_v29  ;;  %v3585_v26 = vld [vmem:[%s7386_s1 + $0x18] sm:$0xff] }
 0xe13   : > { %6065 = vrsqrt.f32 %v3343_v31 }
 0xe14   : > { %3525 = vmatpush.msrb.mxu3 %v3435_v24 }
 0xe16   : > { %5700 = vmatpush.xpose.msk.msrb.mxu1 %vm1599_vm0, %v3436_v15  ;;  %3526 = vmatpush.msrb.mxu3 %v3434_v27 }
 0xe18   : > { %3527 = vmatpush.msrb.mxu3 %v3433_v28  ;;  %v6064_v32 = vpop.eup %6063 }
 0xe19   : > { %v3362_v33 = vmul.f32 %v6064_v32, %v3344_v29  ;;  %v6066_v50 = vpop.eup %6065  ;;  %vm3368_vm8 = vweird.f32 %v6064_v32  ;;  %v3592_v29 = vld [vmem:[%s7386_s1 + $0x50] sm:$0xff] }
 0xe1a   : > { %5701 = vmatpush.xpose.msk.msrb.mxu1 %vm1599_vm0, %v3435_v24  ;;  %v3352_v55 = vmul.f32 %v6066_v50, %v3343_v31  ;;  %vm3369_vm10 = vmor %vm3367_vm7, %vm3368_vm8  ;;  %vm3358_vm12 = vweird.f32 %v6066_v50  ;;  %v3815_v31 = vld [vmem:[%s7387_s2 + $0x30] sm:$0xff] }
 0xe1b   : > { %v3363_v34 = vmul.f32 %v6064_v32, %v3362_v33  ;;  %vm3359_vm13 = vmor %vm3357_vm11, %vm3358_vm12  ;;  %v3591_v33 = vld [vmem:[%s7386_s1 + $0x48] sm:$0xff] }
 0xe1c   : > { %v3353_v36 = vmul.f32 %v6066_v50, %v3352_v55  ;;  %v3582_v55 = vld [vmem:[%s7386_s1] sm:$0xff] }
 0xe1d   : > { %v3364_v35 = vmul.f32 0.5, %v3363_v34  ;;  %v3814_v34 = vld [vmem:[%s7387_s2 + $0x28] sm:$0xff] }
 0xe1e   : > { %5702 = vmatpush.xpose.msk.msrb.mxu1 %vm1599_vm0, %v3434_v27  ;;  %v3354_v38 = vmul.f32 0.5, %v3353_v36  ;;  %v3597_v27 = vld [vmem:[%s7386_s1 + $0x78] sm:$0xff]  ;;  %v3594_v36 = vld [vmem:[%s7386_s1 + $0x60] sm:$0xff] }
 0xe1f   : > { %v3365_v37 = vsub.f32 1.5, %v3364_v35  ;;  %3689 = vmatpush.msrb.mxu2 %v3597_v27  ;;  %v3590_v35 = vld [vmem:[%s7386_s1 + $0x40] sm:$0xff] }
 0xe20   : > { %v3355_v40 = vsub.f32 1.5, %v3354_v38  ;;  %v3589_v38 = vld [vmem:[%s7386_s1 + $0x38] sm:$0xff]  ;;  %v3821_v27 = vld [vmem:[%s7387_s2 + $0x60] sm:$0xff] }
 0xe21   : > { %v3366_v39 = vmul.f32 %v6064_v32, %v3365_v37  ;;  %3690 = vmatpush.msrb.mxu2 %v3596_v30  ;;  %v3813_v37 = vld [vmem:[%s7387_s2 + $0x20] sm:$0xff] }
 0xe22   : > { %5703 = vmatpush.xpose.msk.msrb.mxu1 %vm1599_vm0, %v3433_v28  ;;  %v3356_v42 = vmul.f32 %v6066_v50, %v3355_v40  ;;  %v3816_v28 = vld [vmem:[%s7387_s2 + $0x38] sm:$0xff] }
 0xe23   : > { %v3370_v41 = vsel %vm3369_vm10, %v6064_v32, %v3366_v39  ;;  %v3583_v32 = vld [vmem:[%s7386_s1 + $0x8] sm:$0xff]  ;;  %v3704_v39 = vld [vmem:[%s7388_s3 + $0x38] sm:$0xff] }
 0xe24   : > { %v3432_v46 = vmul.f32 %v3370_v41, %v6833_v2  ;;  %v3360_v47 = vsel %vm3359_vm13, %v6066_v50, %v3356_v42  ;;  %v3595_v50 = vld [vmem:[%s7386_s1 + $0x68] sm:$0xff]  ;;  %v3708_v40 = vld [vmem:[%s7388_s3 + $0x58] sm:$0xff]  ;;  %v3588_v41 = vld [vmem:[%s7386_s1 + $0x30] sm:$0xff] }
 0xe25   : > { %v3431_v48 = vmul.f32 %v3360_v47, %v6836_v3  ;;  %3691 = vmatpush.msrb.mxu2 %v3595_v50  ;;  %v3703_v42 = vld [vmem:[%s7388_s3 + $0x30] sm:$0xff] }
 0xe26   : > { %5704 = vmatpush.xpose.msk.msrb.mxu1 %vm1599_vm0, %v3432_v46  ;;  %3528 = vmatpush.msrb.mxu3 %v3432_v46  ;;  %v3707_v46 = vld [vmem:[%s7388_s3 + $0x50] sm:$0xff] }
 0xe27   : > { %3692 = vmatpush.msrb.mxu2 %v3594_v36 }
 0xe28   : > { %3529 = vmatpush.msrb.mxu3 %v3431_v48 }
 0xe29   : > { %3781 = vmatpush.msra.mxu2 %v3708_v40 }
 0xe2a   : > { %5705 = vmatpush.xpose.msk.msrb.mxu1 %vm1599_vm0, %v3431_v48  ;;  %3629 = vmatpush.msra.mxu3 %v3585_v26  ;;  %v3587_v48 = vld [vmem:[%s7386_s1 + $0x28] sm:$0xff]  ;;  %v3823_v26 = vld [vmem:[%s7387_s2 + $0x70] sm:$0xff] }
 0xe2b   : > { %3782 = vmatpush.msra.mxu2 %v3707_v46  ;;  %v5971_v46 = vld [vmem:[%s7392_s9] ss:$0 sm:$0xff] }
 0xe2c   : > { %3630 = vmatpush.msra.mxu3 %v3584_v49  ;;  %v5968_v49 = vld [vmem:[%s7391_s8 + $0x1] ss:$0 sm:$0xff] }
 0xe2e   : > { %3873 = vmatpush.msra.mxu1 %v3816_v28  ;;  %3631 = vmatpush.msra.mxu3 %v3583_v32 }
 0xe30   : > { %3874 = vmatpush.msra.mxu1 %v3815_v31  ;;  %3632 = vmatpush.msra.mxu3 %v3582_v55  ;;  %v5969_v55 = vld [vmem:[%s7393_s12 + $0x1] ss:$0 sm:$0xff] }
 0xe32   : > { %3875 = vmatpush.msra.mxu1 %v3814_v34 }
 0xe34   : > { %3876 = vmatpush.msra.mxu1 %v3813_v37  ;;  %v5964_v37 = vld [vmem:[%s7393_s12 + $0x2] ss:$0 sm:$0xff] }
 0xe83   : > { %v3283_v12 = vpop.f32.mrf.mxu0 }
 0xe84   : > { %v3284_v16 = vadd.f32 %v5961_v1, %v3283_v12 }
 0xe86   : > { %v6893_v19 = vadd.f32 %v3284_v16, %v6772_v9 }
 0xe88   : > { %v3287_v22 = vmul.f32 %v6893_v19, %v6893_v19 }
 0xe8a   : > { %v3288_v9 = vsel %vm1599_vm0, %v3287_v22, 0.0 }
 0xe8b   : > { %3289 = vadd.xlane.f32.xlu2 %v3288_v9  ;;  %v3593_v9 = vld [vmem:[%s7386_s1 + $0x58] sm:$0xff] }
 0xe8c   : > { %3669 = vmatpush.msrb.mxu0 %v3593_v9  ;;  %v3822_v9 = vld [vmem:[%s7387_s2 + $0x68] sm:$0xff] }
 0xe8e   : > { %3670 = vmatpush.msrb.mxu0 %v3592_v29  ;;  %v5965_v29 = vld [vmem:[%s7392_s9 + $0x1] ss:$0 sm:$0xff] }
 0xe90   : > { %3671 = vmatpush.msrb.mxu0 %v3591_v33 }
 0xe92   : > { %3672 = vmatpush.msrb.mxu0 %v3590_v35  ;;  %v5970_v35 = vld [vmem:[%s7391_s8 + $0x2] ss:$0 sm:$0xff] }
 0xe94   : > { %3761 = vmatpush.msra.mxu0 %v3704_v39 }
 0xe96   : > { %3762 = vmatpush.msra.mxu0 %v3703_v42  ;;  %v5972_v42 = vld [vmem:[%s7391_s8] ss:$0 sm:$0xff] }
 0xefe   : > { %v3290_v51 = vpop.xlane.xlu2 %3289 }
 0xeff   : > { %v3291_v52 = vadd.f32 1e-12, %v3290_v51  ;;  %v3702_v51 = vld [vmem:[%s7388_s3 + $0x28] sm:$0xff] }
 0xf00   : > { %3763 = vmatpush.msra.mxu0 %v3702_v51  ;;  %v5966_v51 = vld [vmem:[%s7393_s12] ss:$0 sm:$0xff] }
 0xf01   : > { %6067 = vrsqrt.f32 %v3291_v52  ;;  %vm3298_vm15 = vweird.f32 %v3291_v52 }
 0xf07   : > { %v6068_v53 = vpop.eup %6067 }
 0xf08   : > { %v3293_v54 = vmul.f32 %v6068_v53, %v3291_v52  ;;  %vm3299_vm14 = vweird.f32 %v6068_v53 }
 0xf09   : > { %vm3300_vm1 = vmor %vm3298_vm15, %vm3299_vm14 }
 0xf0a   : > { %v3294_v56 = vmul.f32 %v6068_v53, %v3293_v54  ;;  %v3586_v54 = vld [vmem:[%s7386_s1 + $0x20] sm:$0xff] }
 0xf0c   : > { %v3295_v58 = vmul.f32 0.5, %v3294_v56  ;;  %v3701_v56 = vld [vmem:[%s7388_s3 + $0x20] sm:$0xff] }
 0xf0d   : > { %3764 = vmatpush.msra.mxu0 %v3701_v56 }
 0xf0e   : > { %v3296_v59 = vsub.f32 1.5, %v3295_v58 }
 0xf10   : > { %v3297_v60 = vmul.f32 %v6068_v53, %v3296_v59  ;;  %v3705_v59 = vld [vmem:[%s7388_s3 + $0x40] sm:$0xff] }
 0xf12   : > { %v3301_v2 = vsel %vm3300_vm1, %v6068_v53, %v3297_v60  ;;  %v3706_v53 = vld [vmem:[%s7388_s3 + $0x48] sm:$0xff]  ;;  %vm3547_vm1 = vcmask 0  }
 0xf13   : > { %v6915_v61 = vmul.f32 %v3301_v2, %v6893_v19  ;;  %3783 = vmatpush.msra.mxu2 %v3706_v53 }
 0xf15   : > { %5706 = vmatmul.msk.f32.vlgmr.msrb.gmra.mxu1 %vm1599_vm0, %v6915_v61  ;;  %3784 = vmatpush.msra.mxu2 %v3705_v59 }
 0xf92   : > { %v3483_v3 = vpop.f32.mrf.mxu1 }
 0xf93   : > { %v3488_v62 = vsel %vm2414_vm9, %v3483_v3, -inf }
 0xf94   : > { %3489 = vmax.xlane.f32.xlu0 %v3488_v62 }
0x1007   : > { %v3490_v1 = vpop.xlane.xlu0 %3489 }
0x1008   : > { %vm3491_vm2 = vcmp.ge.f32.partialorder %v3483_v3, %v3490_v1  ;;  %v5962_v1 = vld [vmem:[%s7389_s4] ss:$0 sm:$0xff] }
0x1009   : > { %v3492_v4 = vsel %vm3491_vm2, %v3487_v0, 64 }
0x100a   : > { %v3493_v5 = vsel %vm2414_vm9, %v3492_v4, 2147483647 }
0x100b   : > { %v3495_v6 = vshra.s32 %v3493_v5, 16  ;;  %v3494_v8 = vand.u32 65535, %v3493_v5  ;;  %v5963_v5 = vld [vmem:[%s7390_s5] ss:$0 sm:$0xff] }
0x100d   : > { %v3497_v7 = vcvt.s32.f32 %v3495_v6  ;;  %v3496_v11 = vcvt.s32.f32 %v3494_v8 }
0x100f   : > { %3498 = vmin.xlane.f32.xlu1 %v3497_v7 }
0x1082   : > { %v3499_v10 = vpop.xlane.xlu1 %3498 }
0x1083   : > { %vm3500_vm3 = vcmp.eq.f32.partialorder %v3497_v7, %v3499_v10  ;;  %v3505_v12 = vcvt.f32.s32 %v3499_v10  ;;  %v3700_v10 = vld [vmem:[%s7388_s3 + $0x18] sm:$0xff] }
0x1084   : > { %v3501_v43 = vsel %vm3500_vm3, %v3496_v11, inf  ;;  %v3812_v11 = vld [vmem:[%s7387_s2 + $0x18] sm:$0xff] }
0x1085   : > { %3502 = vmin.xlane.f32.xlu2 %v3501_v43  ;;  %v3506_v14 = vshll.u32 %v3505_v12, 16  ;;  %v3820_v43 = vld [vmem:[%s7387_s2 + $0x58] sm:$0xff]  ;;  %v3699_v12 = vld [vmem:[%s7388_s3 + $0x10] sm:$0xff] }
0x10f8   : > { %v3503_v13 = vpop.xlane.xlu2 %3502 }
0x10f9   : > { %v3504_v15 = vcvt.f32.s32 %v3503_v13  ;;  %v3811_v13 = vld [vmem:[%s7387_s2 + $0x10] sm:$0xff] }
0x10fb   : > { %v3507_v16 = vadd.s32 %v3506_v14, %v3504_v15  ;;  %v3819_v14 = vld [vmem:[%s7387_s2 + $0x50] sm:$0xff]  ;;  %v3698_v15 = vld [vmem:[%s7388_s3 + $0x8] sm:$0xff] }
0x10fd   : > { %vm3508_vm4 = vcmp.eq.s32.totalorder %v3487_v0, %v3507_v16  ;;  %v3810_v16 = vld [vmem:[%s7387_s2 + $0x8] sm:$0xff] }
0x10fe   : > { %v5707_v18 = vsel %vm3508_vm4, 1.0, %v6187_v17  ;;  %v3818_v17 = vld [vmem:[%s7387_s2 + $0x48] sm:$0xff] }
0x10ff   : > { %5708 = vmatmul.msk.f32.vlgmr.msrb.gmra.mxu3 %vm2414_vm9, %v5707_v18  ;;  %v3697_v18 = vld [vmem:[%s7388_s3] sm:$0xff] }
0x1100   : > { %3649 = vmatpush.msrb.mxu3 %v3589_v38 }
0x1102   : > { %3650 = vmatpush.msrb.mxu3 %v3588_v41 }
0x1104   : > { %3651 = vmatpush.msrb.mxu3 %v3587_v48 }
0x1106   : > { %3652 = vmatpush.msrb.mxu3 %v3586_v54 }
0x1182   : > { %v6922_v25 = vpop.f32.mrf.mxu3 }
0x1183   : > { %v6926_v19 = vadd.f32 %v6113_v44, %v6922_v25  ;;  %v3809_v44 = vld [vmem:[%s7387_s2] sm:$0xff] }
0x1185   : > { %v3552_v20 = vsel %vm1599_vm0, %v6926_v19, 0.0 }
0x1186   : > { %3553 = vadd.xlane.f32.xlu0 %v3552_v20  ;;  %v3817_v20 = vld [vmem:[%s7387_s2 + $0x40] sm:$0xff] }
0x11f9   : > { %v3554_v45 = vpop.xlane.xlu0 %3553 }
0x11fa   : > { %v3555_v21 = vmul.f32 %v3554_v45, %v6505_v57  ;;  %v3712_v45 = vld [vmem:[%s7388_s3 + $0x78] sm:$0xff] }
0x11fc   : > { %v6932_v22 = vsub.f32 %v6926_v19, %v3555_v21  ;;  %v3711_v21 = vld [vmem:[%s7388_s3 + $0x70] sm:$0xff] }
0x11fe   : > { %v3557_v23 = vmul.f32 %v6932_v22, %v6932_v22 }
0x1200   : > { %v3558_v24 = vsel %vm1599_vm0, %v3557_v23, 0.0  ;;  %v3709_v23 = vld [vmem:[%s7388_s3 + $0x60] sm:$0xff] }
0x1201   : > { %3559 = vadd.xlane.f32.xlu1 %v3558_v24  ;;  %v3824_v24 = vld [vmem:[%s7387_s2 + $0x78] sm:$0xff] }
0x1274   : > { %v3560_v47 = vpop.xlane.xlu1 %3559 }
0x1275   : > { %v3561_v52 = vmul.f32 %v3560_v47, %v6505_v57  ;;  %v5973_v47 = vld [vmem:[%s7392_s9 + $0x2] ss:$0 sm:$0xff] }
0x1277   : > { %v3562_v58 = vadd.f32 1e-05, %v3561_v52 }
0x1279   : > { %6069 = vrsqrt.f32 %v3562_v58  ;;  %vm3569_vm7 = vweird.f32 %v3562_v58 }
0x127f   : > { %v6070_v60 = vpop.eup %6069 }
0x1280   : > { %v3564_v2 = vmul.f32 %v6070_v60, %v3562_v58  ;;  %vm3570_vm6 = vweird.f32 %v6070_v60 }
0x1281   : > { %vm3571_vm8 = vmor %vm3569_vm7, %vm3570_vm6 }
0x1282   : > { %v3565_v3 = vmul.f32 %v6070_v60, %v3564_v2  ;;  %v5967_v2 = vld [vmem:[%s7393_s12 + $0x3] ss:$0 sm:$0xff] }
0x1284   : > { %v3566_v62 = vmul.f32 0.5, %v3565_v3 }
0x1286   : > { %v3567_v63 = vsub.f32 1.5, %v3566_v62 }
0x1288   : > { %v3568_v0 = vmul.f32 %v6070_v60, %v3567_v63 }
0x128a   : > { %v3572_v4 = vsel %vm3571_vm8, %v6070_v60, %v3568_v0  ;;  %v5974_v60 = vld [vmem:[%s7391_s8 + $0x3] ss:$0 sm:$0xff] }
0x128b   : > { %v3573_v6 = vmul.f32 %v3572_v4, %v6932_v22  ;;  %v3710_v22 = vld [vmem:[%s7388_s3 + $0x68] sm:$0xff]  ;;  %v5975_v0 = vld [vmem:[%s7392_s9 + $0x3] ss:$0 sm:$0xff] }
0x128d   : > { %v3577_v7 = vmul.f32 %v5962_v1, %v3573_v6 }
0x128f   : > { %v3581_v8 = vadd.f32 %v5963_v5, %v3577_v7 }
0x1291   : > { %5709 = vmatmul.msk.f32.vlgmr.msra.gmra.mxu3 %vm1599_vm0, %v3581_v8  ;;  %5711 = vmatmul.msk.f32.vlgmr.msrb.gmra.mxu0 %vm1599_vm0, %v3581_v8 }
0x1292   : > { %5712 = vmatmul.msk.f32.vlgmr.msrb.gmra.mxu2 %vm1599_vm0, %v3581_v8  ;;  %5718 = vmatmul.msk.f32.vlgmr.msra.gmra.mxu1 %vm1599_vm0, %v3581_v8 }
0x1293   : > { %3741 = vmatpush.msra.mxu3 %v3700_v10  ;;  %3853 = vmatpush.msrb.mxu0 %v3812_v11 }
0x1294   : > { %3893 = vmatpush.msrb.mxu2 %v3820_v43 }
0x1295   : > { %3742 = vmatpush.msra.mxu3 %v3699_v12  ;;  %3854 = vmatpush.msrb.mxu0 %v3811_v13 }
0x1296   : > { %3894 = vmatpush.msrb.mxu2 %v3819_v14 }
0x1297   : > { %3743 = vmatpush.msra.mxu3 %v3698_v15  ;;  %3855 = vmatpush.msrb.mxu0 %v3810_v16 }
0x1298   : > { %3895 = vmatpush.msrb.mxu2 %v3818_v17 }
0x1299   : > { %5710 = vmatmul.msk.f32.vlgmr.msrb.gmra.mxu3 %vm1599_vm0, %v3581_v8  ;;  %5714 = vmatmul.msk.f32.vlgmr.msra.gmra.mxu0 %vm1599_vm0, %v3581_v8 }
0x129a   : > { %5715 = vmatmul.msk.f32.vlgmr.msra.gmra.mxu2 %vm1599_vm0, %v3581_v8  ;;  %3744 = vmatpush.msra.mxu3 %v3697_v18 }
0x129b   : > { %3856 = vmatpush.msrb.mxu0 %v3809_v44  ;;  %3896 = vmatpush.msrb.mxu2 %v3817_v20 }
0x129c   : > { %3801 = vmatpush.msrb.mxu3 %v3712_v45 }
0x129e   : > { %3802 = vmatpush.msrb.mxu3 %v3711_v21 }
0x12a0   : > { %3803 = vmatpush.msrb.mxu3 %v3710_v22 }
0x12a1   : > { %5713 = vmatmul.msk.f32.vlgmr.msra.gmra.mxu3 %vm1599_vm0, %v3581_v8  ;;  %5717 = vmatmul.msk.f32.vlgmr.msrb.gmra.mxu0 %vm1599_vm0, %v3581_v8 }
0x12a2   : > { %5719 = vmatmul.msk.f32.vlgmr.msrb.gmra.mxu2 %vm1599_vm0, %v3581_v8  ;;  %3804 = vmatpush.msrb.mxu3 %v3709_v23 }
0x12a4   : > { %3913 = vmatpush.msra.mxu3 %v3824_v24 }
0x12a6   : > { %3914 = vmatpush.msra.mxu3 %v3823_v26 }
0x12a8   : > { %3915 = vmatpush.msra.mxu3 %v3822_v9 }
0x12a9   : > { %5716 = vmatmul.msk.f32.vlgmr.msrb.gmra.mxu3 %vm1599_vm0, %v3581_v8 }
0x12aa   : > { %3916 = vmatpush.msra.mxu3 %v3821_v27 }
0x12b1   : > { %5720 = vmatmul.msk.f32.vlgmr.msra.gmra.mxu3 %vm1599_vm0, %v3581_v8 }
0x130e   : > { %v3674_v28 = vpop.f32.mrf.mxu0 }
0x130f   : > { %v3878_v31 = vpop.f32.mrf.mxu1  ;;  %v3675_v41 = vadd.f32 %v5964_v37, %v3674_v28 }
0x1310   : > { %v3879_v34 = vadd.f32 %v5965_v29, %v3878_v31 }
0x1314   : > { %v3634_v30 = vpop.f32.mrf.mxu3 }
0x1315   : > { %v3694_v32 = vpop.f32.mrf.mxu2  ;;  %v3635_v59 = vadd.f32 %v5966_v51, %v3634_v30  ;;  %v4167_v51 = vld [vmem:[%s7394_s14 + $0x10] sm:$0xff] }
0x1316   : > { %v3766_v33 = vpop.f32.mrf.mxu0  ;;  %v3695_v63 = vadd.f32 %v5967_v2, %v3694_v32 }
0x1317   : > { %v3767_v50 = vadd.f32 %v5968_v49, %v3766_v33 }
0x1319   : > { %5723 = vmatpush.xpose.msk.msrb.mxu1 %vm1976_vm5, %v3767_v50 }
0x131c   : > { %v3654_v36 = vpop.f32.mrf.mxu3 }
0x131d   : > { %4114 = vmatpush.msra.mxu1 %v3879_v34  ;;  %v3655_v38 = vadd.f32 %v5969_v55, %v3654_v36  ;;  %v3786_v39 = vpop.f32.mrf.mxu2 }
0x131e   : > { %v3787_v40 = vadd.f32 %v5970_v35, %v3786_v39  ;;  %v3858_v48 = vpop.f32.mrf.mxu0 }
0x131f   : > { %5724 = vmatmul.msk.f32.vlgmr.msrb.gmra.mxu1 %vm1976_vm5, %v3655_v38  ;;  %v3859_v56 = vadd.f32 %v5971_v46, %v3858_v48  ;;  %v4165_v48 = vld [vmem:[%s7394_s14] sm:$0xff] }
0x1320   : > { %5725 = vmatpush.xpose.msk.msra.mxu2 %vm1976_vm5, %v3787_v40 }
0x1323   : > { %5726 = vmatmul.msk.f32.vlgmr.msra.gmra.mxu2 %vm1976_vm5, %v3675_v41 }
0x1324   : > { %v3746_v52 = vpop.f32.mrf.mxu3 }
0x1325   : > { %v3747_v53 = vadd.f32 %v5972_v42, %v3746_v52  ;;  %v3898_v54 = vpop.f32.mrf.mxu2  ;;  %v4166_v52 = vld [vmem:[%s7394_s14 + $0x8] sm:$0xff] }
0x1326   : > { %v3899_v58 = vadd.f32 %v5973_v47, %v3898_v54  ;;  %4210 = vmatpush.msrb.mxu1 %v4166_v52 }
0x1327   : > { %5721 = vmatpush.xpose.msk.msra.mxu0 %vm1976_vm5, %v3747_v53  ;;  %v4168_v53 = vld [vmem:[%s7394_s14 + $0x18] sm:$0xff] }
0x1328   : > { %4137 = vmatpush.msrb.mxu2 %v3899_v58 }
0x132a   : > { %5722 = vmatmul.msk.f32.vlgmr.msra.gmra.mxu0 %vm1976_vm5, %v3635_v59  ;;  %4233 = vmatpush.msra.mxu2 %v4167_v51 }
0x132b   : > { %4091 = vmatpush.msrb.mxu0 %v3859_v56 }
0x132c   : > { %v3806_v3 = vpop.f32.mrf.mxu3 }
0x132d   : > { %v3807_v62 = vadd.f32 %v5974_v60, %v3806_v3  ;;  %4187 = vmatpush.msra.mxu0 %v4165_v48 }
0x132f   : > { %5727 = vmatpush.xpose.msk.msrb.mxu3 %vm1976_vm5, %v3807_v62 }
0x1332   : > { %5728 = vmatmul.msk.f32.vlgmr.msrb.gmra.mxu3 %vm1976_vm5, %v3695_v63 }
0x1334   : > { %v3918_v1 = vpop.f32.mrf.mxu3 }
0x1335   : > { %v3919_v4 = vadd.f32 %v5975_v0, %v3918_v1 }
0x1337   : > { %4160 = vmatpush.msra.mxu3 %v3919_v4 }
0x1339   : > { %4256 = vmatpush.msrb.mxu3 %v4168_v53 }
0x139c   : > { %v3970_v11 = vpop.f32.mrf.mxu1 }
0x139d   : > { %v4026_v12 = vmul.f32 0.35355338, %v3970_v11 }
0x139f   : > { %v4032_v13 = vsel %vm1976_vm5, %v4026_v12, -inf }
0x13a6   : > { %v3996_v5 = vpop.f32.mrf.mxu2 }
0x13a7   : > { %v4027_v6 = vmul.f32 0.35355338, %v3996_v5  ;;  %v3944_v7 = vpop.f32.mrf.mxu0 }
0x13a8   : > { %v4025_v8 = vmul.f32 0.35355338, %v3944_v7 }
0x13a9   : > { %v4035_v10 = vsel %vm1976_vm5, %v4027_v6, -inf }
0x13aa   : > { %4036 = vmax.xlane.f32.xlu2 %v4035_v10  ;;  %v4029_v43 = vsel %vm1976_vm5, %v4025_v8, -inf }
0x13ab   : > { %4030 = vmax.xlane.f32.xlu1 %v4029_v43 }
0x13b2   : > { %4033 = vmax.xlane.f32.xlu2 %v4032_v13 }
0x13b5   : > { %v4022_v14 = vpop.f32.mrf.mxu3 }
0x13b6   : > { %v4028_v15 = vmul.f32 0.35355338, %v4022_v14 }
0x13b8   : > { %v4038_v16 = vsel %vm1976_vm5, %v4028_v15, -inf }
0x13b9   : > { %4039 = vmax.xlane.f32.xlu0 %v4038_v16 }
0x141d   : > { %v4037_v17 = vpop.xlane.xlu2 %4036 }
0x141e   : > { %v4043_v18 = vsub.f32 %v4027_v6, %v4037_v17  ;;  %v4031_v44 = vpop.xlane.xlu1 %4030  ;;  %v5976_v6 = vld [vmem:[%s7395_s15] ss:$0 sm:$0xff]  ;;  %v4309_v17 = vld [vmem:[%s7396_s16 + $0x18] sm:$0xff] }
0x141f   : > { %v4041_v20 = vsub.f32 %v4025_v8, %v4031_v44  ;;  %v4307_v44 = vld [vmem:[%s7396_s16 + $0x8] sm:$0xff] }
0x1420   : > { %v4049_v45 = vmul.f32 1.442695, %v4043_v18  ;;  %v4308_v18 = vld [vmem:[%s7396_s16 + $0x10] sm:$0xff] }
0x1421   : > { %v4045_v21 = vmul.f32 1.442695, %v4041_v20 }
0x1422   : > { %6071 = vpow2.f32 %v4049_v45 }
0x1423   : > { %6073 = vpow2.f32 %v4045_v21 }
0x1425   : > { %v4034_v22 = vpop.xlane.xlu2 %4033 }
0x1426   : > { %v4042_v23 = vsub.f32 %v4026_v12, %v4034_v22 }
0x1428   : > { %v6072_v24 = vpop.eup %6071  ;;  %v4047_v26 = vmul.f32 1.442695, %v4042_v23 }
0x1429   : > { %v6074_v9 = vpop.eup %6073  ;;  %v4059_v27 = vsel %vm1976_vm5, %v6072_v24, 0.0 }
0x142a   : > { %6075 = vpow2.f32 %v4047_v26  ;;  %4060 = vadd.xlane.f32.xlu0 %v4059_v27  ;;  %v4053_v28 = vsel %vm1976_vm5, %v6074_v9, 0.0 }
0x142b   : > { %4054 = vadd.xlane.f32.xlu2 %v4053_v28  ;;  %v5977_v28 = vld [vmem:[%s7397_s17] ss:$0 sm:$0xff] }
0x142c   : > { %v4040_v49 = vpop.xlane.xlu0 %4039 }
0x142d   : > { %v4044_v29 = vsub.f32 %v4028_v15, %v4040_v49 }
0x142f   : > { %v4051_v30 = vmul.f32 1.442695, %v4044_v29 }
0x1430   : > { %v6076_v31 = vpop.eup %6075 }
0x1431   : > { %6077 = vpow2.f32 %v4051_v30  ;;  %v4056_v32 = vsel %vm1976_vm5, %v6076_v31, 0.0  ;;  %v5978_v30 = vld [vmem:[%s7398_s19] ss:$0 sm:$0xff] }
0x1432   : > { %4057 = vadd.xlane.f32.xlu0 %v4056_v32 }
0x1437   : > { %v6078_v33 = vpop.eup %6077 }
0x1438   : > { %v4062_v50 = vsel %vm1976_vm5, %v6078_v33, 0.0 }
0x1439   : > { %4063 = vadd.xlane.f32.xlu1 %v4062_v50  ;;  %v4352_v50 = vld [vmem:[%s7399_s20 + $0x30] sm:$0xff] }
0x149d   : > { %v4061_v34 = vpop.xlane.xlu0 %4060 }
0x149e   : > { %6079 = vrcp.f32 %v4061_v34  ;;  %v4055_v55 = vpop.xlane.xlu2 %4054  ;;  %v4351_v34 = vld [vmem:[%s7399_s20 + $0x28] sm:$0xff] }
0x149f   : > { %6081 = vrcp.f32 %v4055_v55  ;;  %v4350_v55 = vld [vmem:[%s7399_s20 + $0x20] sm:$0xff] }
0x14a4   : > { %v6080_v35 = vpop.eup %6079 }
0x14a5   : > { %v6082_v36 = vpop.eup %6081  ;;  %v4071_v37 = vmul.f32 %v6080_v35, %v6072_v24  ;;  %v4058_v38 = vpop.xlane.xlu0 %4057  ;;  %v4349_v35 = vld [vmem:[%s7399_s20 + $0x18] sm:$0xff] }
0x14a6   : > { %v4069_v39 = vmul.f32 %v6082_v36, %v6074_v9  ;;  %6083 = vrcp.f32 %v4058_v38  ;;  %v4348_v36 = vld [vmem:[%s7399_s20 + $0x10] sm:$0xff]  ;;  %v4346_v38 = vld [vmem:[%s7399_s20] sm:$0xff] }
0x14a7   : > { %5731 = vmatmul.msk.f32.vlgmr.msrb.gmra.mxu2 %vm1976_vm5, %v4071_v37  ;;  %v4347_v37 = vld [vmem:[%s7399_s20 + $0x8] sm:$0xff] }
0x14a8   : > { %5729 = vmatmul.msk.f32.vlgmr.msrb.gmra.mxu0 %vm1976_vm5, %v4069_v39  ;;  %v5979_v39 = vld [vmem:[%s7400_s21] ss:$0 sm:$0xff] }
0x14a9   : > { %4329 = vmatpush.msrb.mxu0 %v4309_v17  ;;  %v5741_v17 = vld [vmem:[%s7386_s1 + $0x80] sm:$0xff] }
0x14ab   : > { %4330 = vmatpush.msrb.mxu0 %v4308_v18  ;;  %v5745_v18 = vld [vmem:[%s7386_s1 + $0xa0] sm:$0xff] }
0x14ac   : > { %v6084_v40 = vpop.eup %6083  ;;  %v4064_v41 = vpop.xlane.xlu1 %4063 }
0x14ad   : > { %v4070_v42 = vmul.f32 %v6084_v40, %v6076_v31  ;;  %6085 = vrcp.f32 %v4064_v41  ;;  %4331 = vmatpush.msrb.mxu0 %v4307_v44  ;;  %v5749_v44 = vld [vmem:[%s7386_s1 + $0xc0] sm:$0xff] }
0x14af   : > { %5730 = vmatmul.msk.f32.vlgmr.msra.gmra.mxu1 %vm1976_vm5, %v4070_v42 }
0x14b3   : > { %v6086_v46 = vpop.eup %6085 }
0x14b4   : > { %v4072_v47 = vmul.f32 %v6086_v46, %v6078_v33  ;;  %v4353_v33 = vld [vmem:[%s7399_s20 + $0x38] sm:$0xff] }
0x14b5   : > { %4369 = vmatpush.msra.mxu1 %v4353_v33  ;;  %v5765_v33 = vld [vmem:[%s7388_s3 + $0x80] sm:$0xff] }
0x14b6   : > { %5732 = vmatmul.msk.f32.vlgmr.msra.gmra.mxu3 %vm1976_vm5, %v4072_v47 }
0x14b7   : > { %4370 = vmatpush.msra.mxu1 %v4352_v50 }
0x14b9   : > { %4371 = vmatpush.msra.mxu1 %v4351_v34  ;;  %v5769_v34 = vld [vmem:[%s7388_s3 + $0xa0] sm:$0xff] }
0x14bb   : > { %4372 = vmatpush.msra.mxu1 %v4350_v55  ;;  %v5797_v55 = vld [vmem:[%s7387_s2 + $0xc0] sm:$0xff] }
0x14bd   : > { %4373 = vmatpush.msra.mxu1 %v4349_v35 }
0x14bf   : > { %4374 = vmatpush.msra.mxu1 %v4348_v36 }
0x14c1   : > { %4375 = vmatpush.msra.mxu1 %v4347_v37 }
0x14c3   : > { %4376 = vmatpush.msra.mxu1 %v4346_v38 }
0x1525   : > { %v4093_v54 = vpop.f32.mrf.mxu0 }
0x1526   : > { %5733 = vmatmul.msk.f32.vlgmr.msra.gmra.mxu0 %vm1976_vm5, %v4093_v54 }
0x152a   : > { %v4139_v56 = vpop.f32.mrf.mxu2 }
0x152b   : > { %5735 = vmatmul.msk.f32.vlgmr.msra.gmra.mxu2 %vm1976_vm5, %v4139_v56 }
0x152c   : > { %v4116_v58 = vpop.f32.mrf.mxu1 }
0x152d   : > { %5734 = vmatmul.msk.f32.vlgmr.msrb.gmra.mxu1 %vm1976_vm5, %v4116_v58  ;;  %v5980_v58 = vld [vmem:[%s7401_s22] ss:$0 sm:$0xff] }
0x1539   : > { %v4162_v59 = vpop.f32.mrf.mxu3 }
0x153a   : > { %5736 = vmatmul.msk.f32.vlgmr.msrb.gmra.mxu3 %vm1976_vm5, %v4162_v59 }
0x15a3   : > { %v4189_v2 = vpop.f32.mrf.mxu0 }
0x15a4   : > { %v4261_v63 = vsel %vm1599_vm0, %v4189_v2, 0.0 }
0x15aa   : > { %v4212_v60 = vpop.f32.mrf.mxu1 }
0x15ab   : > { %v4262_v62 = vsel %vm1599_vm0, %v4212_v60, 0.0 }
0x15ac   : > { %v4263_v1 = vadd.f32 %v4262_v62, %v4261_v63 }
0x15ae   : > { %v4235_v3 = vpop.f32.mrf.mxu2 }
0x15af   : > { %v4264_v0 = vsel %vm1599_vm0, %v4235_v3, 0.0 }
0x15b0   : > { %v4265_v4 = vadd.f32 %v4264_v0, %v4263_v1 }
0x15bd   : > { %v4258_v5 = vpop.f32.mrf.mxu3 }
0x15be   : > { %v4266_v7 = vsel %vm1599_vm0, %v4258_v5, 0.0  ;;  %v5744_v5 = vld [vmem:[%s7386_s1 + $0x98] sm:$0xff] }
0x15bf   : > { %v4267_v8 = vadd.f32 %v4266_v7, %v4265_v4  ;;  %v5752_v7 = vld [vmem:[%s7386_s1 + $0xd8] sm:$0xff]  ;;  %4465 = vmatpush.msrb.mxu2 %v5744_v5  ;;  %v5803_v5 = vld [vmem:[%s7387_s2 + $0xf0] sm:$0xff] }
0x15c1   : > { %v4272_v10 = vadd.f32 %v5976_v6, %v4267_v8  ;;  %v5748_v6 = vld [vmem:[%s7386_s1 + $0xb8] sm:$0xff] }
0x15c2   : > { %4485 = vmatpush.msra.mxu3 %v5748_v6  ;;  %v5776_v8 = vld [vmem:[%s7388_s3 + $0xd8] sm:$0xff]  ;;  %v5802_v6 = vld [vmem:[%s7387_s2 + $0xe8] sm:$0xff] }
0x15c3   : > { %v7047_v11 = vadd.f32 %v4272_v10, %v6926_v19  ;;  %v4306_v19 = vld [vmem:[%s7396_s16] sm:$0xff]  ;;  %4619 = vmatpush.msrb.mxu1 %v5776_v8  ;;  %v5743_v10 = vld [vmem:[%s7386_s1 + $0x90] sm:$0xff] }
0x15c4   : > { %4332 = vmatpush.msrb.mxu0 %v4306_v19  ;;  %4466 = vmatpush.msrb.mxu2 %v5743_v10  ;;  %v5773_v19 = vld [vmem:[%s7388_s3 + $0xc0] sm:$0xff] }
0x15c5   : > { %v4276_v43 = vsel %vm1599_vm0, %v7047_v11, 0.0  ;;  %v5984_v8 = vld [vmem:[%s7391_s8 + $0x6] ss:$0 sm:$0xff] }
0x15c6   : > { %4277 = vadd.xlane.f32.xlu1 %v4276_v43  ;;  %4505 = vmatpush.msra.mxu0 %v5752_v7  ;;  %v5751_v43 = vld [vmem:[%s7386_s1 + $0xd0] sm:$0xff]  ;;  %v5801_v7 = vld [vmem:[%s7387_s2 + $0xe0] sm:$0xff] }
0x15c7   : > { %v5983_v10 = vld [vmem:[%s7393_s12 + $0x6] ss:$0 sm:$0xff] }
0x15c8   : > { %4506 = vmatpush.msra.mxu0 %v5751_v43 }
0x1639   : > { %v4278_v12 = vpop.xlane.xlu1 %4277 }
0x163a   : > { %v4279_v13 = vmul.f32 %v4278_v12, %v6505_v57  ;;  %v5775_v12 = vld [vmem:[%s7388_s3 + $0xd0] sm:$0xff] }
0x163b   : > { %4620 = vmatpush.msrb.mxu1 %v5775_v12 }
0x163c   : > { %v4280_v14 = vsub.f32 %v7047_v11, %v4279_v13  ;;  %v5742_v13 = vld [vmem:[%s7386_s1 + $0x88] sm:$0xff] }
0x163d   : > { %4467 = vmatpush.msrb.mxu2 %v5742_v13 }
0x163e   : > { %v4281_v15 = vmul.f32 %v4280_v14, %v4280_v14 }
0x163f   : > { %4468 = vmatpush.msrb.mxu2 %v5741_v17  ;;  %v5988_v17 = vld [vmem:[%s7392_s9 + $0x6] ss:$0 sm:$0xff] }
0x1640   : > { %v4282_v16 = vsel %vm1599_vm0, %v4281_v15, 0.0  ;;  %v5750_v15 = vld [vmem:[%s7386_s1 + $0xc8] sm:$0xff] }
0x1641   : > { %4283 = vadd.xlane.f32.xlu2 %v4282_v16  ;;  %v5774_v16 = vld [vmem:[%s7388_s3 + $0xc8] sm:$0xff]  ;;  %4507 = vmatpush.msra.mxu0 %v5750_v15 }
0x1642   : > { %4621 = vmatpush.msrb.mxu1 %v5774_v16  ;;  %v5987_v16 = vld [vmem:[%s7391_s8 + $0x5] ss:$0 sm:$0xff] }
0x1643   : > { %4508 = vmatpush.msra.mxu0 %v5749_v44 }
0x1644   : > { %4622 = vmatpush.msrb.mxu1 %v5773_v19 }
0x16b4   : > { %v4284_v20 = vpop.xlane.xlu2 %4283 }
0x16b5   : > { %v4285_v45 = vmul.f32 %v4284_v20, %v6505_v57  ;;  %v5756_v20 = vld [vmem:[%s7386_s1 + $0xf8] sm:$0xff] }
0x16b6   : > { %4525 = vmatpush.msra.mxu2 %v5756_v20 }
0x16b7   : > { %v4286_v21 = vadd.f32 1e-05, %v4285_v45  ;;  %v5768_v45 = vld [vmem:[%s7388_s3 + $0x98] sm:$0xff] }
0x16b9   : > { %6087 = vrsqrt.f32 %v4286_v21  ;;  %vm4293_vm11 = vweird.f32 %v4286_v21 }
0x16bf   : > { %v6088_v22 = vpop.eup %6087 }
0x16c0   : > { %v4288_v23 = vmul.f32 %v6088_v22, %v4286_v21  ;;  %vm4294_vm10 = vweird.f32 %v6088_v22  ;;  %v5772_v21 = vld [vmem:[%s7388_s3 + $0xb8] sm:$0xff] }
0x16c1   : > { %vm4295_vm12 = vmor %vm4293_vm11, %vm4294_vm10 }
0x16c2   : > { %v4289_v24 = vmul.f32 %v6088_v22, %v4288_v23  ;;  %v5755_v23 = vld [vmem:[%s7386_s1 + $0xf0] sm:$0xff] }
0x16c3   : > { %4526 = vmatpush.msra.mxu2 %v5755_v23  ;;  %v5985_v23 = vld [vmem:[%s7393_s12 + $0x4] ss:$0 sm:$0xff] }
0x16c4   : > { %v4290_v26 = vmul.f32 0.5, %v4289_v24  ;;  %v5767_v24 = vld [vmem:[%s7388_s3 + $0x90] sm:$0xff] }
0x16c6   : > { %v4291_v9 = vsub.f32 1.5, %v4290_v26 }
0x16c8   : > { %v4292_v27 = vmul.f32 %v6088_v22, %v4291_v9  ;;  %v5771_v9 = vld [vmem:[%s7388_s3 + $0xb0] sm:$0xff] }
0x16ca   : > { %v4296_v49 = vsel %vm4295_vm12, %v6088_v22, %v4292_v27  ;;  %v5800_v22 = vld [vmem:[%s7387_s2 + $0xd8] sm:$0xff]  ;;  %v5799_v27 = vld [vmem:[%s7387_s2 + $0xd0] sm:$0xff] }
0x16cb   : > { %v4297_v29 = vmul.f32 %v4296_v49, %v4280_v14  ;;  %v5746_v14 = vld [vmem:[%s7386_s1 + $0xa8] sm:$0xff] }
0x16cd   : > { %v4301_v31 = vmul.f32 %v5977_v28, %v4297_v29  ;;  %v5754_v28 = vld [vmem:[%s7386_s1 + $0xe8] sm:$0xff] }
0x16ce   : > { %v5766_v29 = vld [vmem:[%s7388_s3 + $0x88] sm:$0xff]  ;;  %4527 = vmatpush.msra.mxu2 %v5754_v28 }
0x16cf   : > { %v4305_v32 = vadd.f32 %v5978_v30, %v4301_v31  ;;  %v5770_v30 = vld [vmem:[%s7388_s3 + $0xa8] sm:$0xff] }
0x16d0   : > { %v5798_v31 = vld [vmem:[%s7387_s2 + $0xc8] sm:$0xff] }
0x16d1   : > { %5737 = vmatmul.msk.f32.vlgmr.msrb.gmra.mxu0 %vm1599_vm0, %v4305_v32  ;;  %v5753_v32 = vld [vmem:[%s7386_s1 + $0xe0] sm:$0xff] }
0x16d2   : > { %4599 = vmatpush.msrb.mxu0 %v5772_v21  ;;  %4528 = vmatpush.msra.mxu2 %v5753_v32  ;;  %v5990_v21 = vld [vmem:[%s7391_s8 + $0x4] ss:$0 sm:$0xff]  ;;  %v5989_v32 = vld [vmem:[%s7393_s12 + $0x7] ss:$0 sm:$0xff] }
0x16d4   : > { %4600 = vmatpush.msrb.mxu0 %v5771_v9  ;;  %v5991_v9 = vld [vmem:[%s7392_s9 + $0x5] ss:$0 sm:$0xff] }
0x16d6   : > { %4601 = vmatpush.msrb.mxu0 %v5770_v30  ;;  %v5992_v30 = vld [vmem:[%s7391_s8 + $0x7] ss:$0 sm:$0xff] }
0x16d8   : > { %4602 = vmatpush.msrb.mxu0 %v5769_v34 }
0x174e   : > { %v4334_v40 = vpop.f32.mrf.mxu0 }
0x174f   : > { %v4335_v41 = vadd.f32 %v5979_v39, %v4334_v40 }
0x1751   : > { %v4337_v42 = vmul.f32 %v4335_v41, %v4335_v41 }
0x1753   : > { %v4338_v46 = vmul.f32 %v4337_v42, %v4335_v41 }
0x1755   : > { %v4339_v47 = vmul.f32 0.044715, %v4338_v46  ;;  %v5982_v46 = vld [vmem:[%s7390_s5 + $0x1] ss:$0 sm:$0xff] }
0x1757   : > { %v4340_v48 = vadd.f32 %v4339_v47, %v4335_v41 }
0x1759   : > { %v4341_v51 = vmul.f32 0.7978846, %v4340_v48 }
0x175b   : > { %6089 = vtanh.f32 %v4341_v51 }
0x1761   : > { %v6090_v52 = vpop.eup %6089 }
0x1762   : > { %v4343_v53 = vadd.f32 1.0, %v6090_v52  ;;  %v5780_v52 = vld [vmem:[%s7388_s3 + $0xf8] sm:$0xff] }
0x1764   : > { %v4344_v54 = vmul.f32 0.5, %v4343_v53  ;;  %v5792_v53 = vld [vmem:[%s7387_s2 + $0x98] sm:$0xff] }
0x1766   : > { %v4345_v56 = vmul.f32 %v4344_v54, %v4335_v41  ;;  %v5981_v41 = vld [vmem:[%s7389_s4 + $0x1] ss:$0 sm:$0xff]  ;;  %v5796_v54 = vld [vmem:[%s7387_s2 + $0xb8] sm:$0xff] }
0x1768   : > { %5738 = vmatmul.msk.f32.vlgmr.msra.gmra.mxu1 %vm2414_vm9, %v4345_v56  ;;  %v5779_v56 = vld [vmem:[%s7388_s3 + $0xf0] sm:$0xff] }
0x1769   : > { %4733 = vmatpush.msra.mxu1 %v5800_v22 }
0x176b   : > { %4734 = vmatpush.msra.mxu1 %v5799_v27 }
0x176d   : > { %4735 = vmatpush.msra.mxu1 %v5798_v31  ;;  %v5993_v31 = vld [vmem:[%s7392_s9 + $0x4] ss:$0 sm:$0xff] }
0x176f   : > { %4736 = vmatpush.msra.mxu1 %v5797_v55 }
0x17e5   : > { %v4378_v59 = vpop.f32.mrf.mxu1 }
0x17e6   : > { %v4379_v60 = vadd.f32 %v5980_v58, %v4378_v59  ;;  %v5791_v58 = vld [vmem:[%s7387_s2 + $0x90] sm:$0xff] }
0x17e7   : > { %v5795_v59 = vld [vmem:[%s7387_s2 + $0xb0] sm:$0xff] }
0x17e8   : > { %v7074_v2 = vadd.f32 %v4379_v60, %v7047_v11  ;;  %v5747_v11 = vld [vmem:[%s7386_s1 + $0xb0] sm:$0xff]  ;;  %v5778_v60 = vld [vmem:[%s7388_s3 + $0xe8] sm:$0xff]  ;;  %s1504_s1 = scalar_lea.vmem %s6437_s10, %s6461_s11 }
0x17e9   : > { %4486 = vmatpush.msra.mxu3 %v5747_v11 }
0x17ea   : > { %v4386_v3 = vsel %vm1599_vm0, %v7074_v2, 0.0 }
0x17eb   : > { %4387 = vadd.xlane.f32.xlu0 %v4386_v3  ;;  %4487 = vmatpush.msra.mxu3 %v5746_v14  ;;  %v5790_v3 = vld [vmem:[%s7387_s2 + $0x88] sm:$0xff] }
0x17ed   : > { %4488 = vmatpush.msra.mxu3 %v5745_v18  ;;  %v5986_v18 = vld [vmem:[%s7393_s12 + $0x5] ss:$0 sm:$0xff] }
0x17ef   : > { %4579 = vmatpush.msrb.mxu3 %v5768_v45 }
0x17f1   : > { %4580 = vmatpush.msrb.mxu3 %v5767_v24 }
0x17f3   : > { %4581 = vmatpush.msrb.mxu3 %v5766_v29 }
0x17f5   : > { %4582 = vmatpush.msrb.mxu3 %v5765_v33 }
0x185e   : > { %v4388_v62 = vpop.xlane.xlu0 %4387 }
0x185f   : > { %v4389_v63 = vmul.f32 %v4388_v62, %v6505_v57  ;;  %v5794_v62 = vld [vmem:[%s7387_s2 + $0xa8] sm:$0xff] }
0x1861   : > { %v7080_v0 = vsub.f32 %v7074_v2, %v4389_v63  ;;  %v5777_v63 = vld [vmem:[%s7388_s3 + $0xe0] sm:$0xff]  ;;  %s1485_s3 = sld [smem:[#allocation3 + %s6447_s0]] }
0x1862   : > { %s7405_s0 = sld [smem:[#allocation6_spill]] }
0x1863   : > { %v4391_v1 = vmul.f32 %v7080_v0, %v7080_v0 }
0x1865   : > { %v4392_v4 = vsel %vm1599_vm0, %v4391_v1, 0.0  ;;  %v5793_v1 = vld [vmem:[%s7387_s2 + $0xa0] sm:$0xff] }
0x1866   : > { %4393 = vadd.xlane.f32.xlu1 %v4392_v4  ;;  %v5804_v4 = vld [vmem:[%s7387_s2 + $0xf8] sm:$0xff] }
0x1867   : > { %p1486_p10 = scmp.lt.s32.totalorder %s1485_s3, 2 }
0x1869   : > { %s7411_s3 = smov (!%p1486_p10, %s1485_s3), 2 }
0x186a   : > { %s5856_s4 = sshll.u32 %s7411_s3, 7  ;;  %s7404_s3 = sld [smem:[#allocation42_spill]] }
0x18d9   : > { %v4394_v26 = vpop.xlane.xlu1 %4393 }
0x18da   : > { %v4395_v49 = vmul.f32 %v4394_v26, %v6505_v57 }
0x18dc   : > { %v4396_v50 = vadd.f32 1e-05, %v4395_v49 }
0x18de   : > { %6091 = vrsqrt.f32 %v4396_v50  ;;  %vm4403_vm14 = vweird.f32 %v4396_v50 }
0x18e4   : > { %v6092_v35 = vpop.eup %6091 }
0x18e5   : > { %v4398_v36 = vmul.f32 %v6092_v35, %v4396_v50  ;;  %vm4404_vm13 = vweird.f32 %v6092_v35 }
0x18e6   : > { %vm4405_vm15 = vmor %vm4403_vm14, %vm4404_vm13 }
0x18e7   : > { %v4399_v37 = vmul.f32 %v6092_v35, %v4398_v36  ;;  %v5994_v36 = vld [vmem:[%s7392_s9 + $0x7] ss:$0 sm:$0xff] }
0x18e9   : > { %v4400_v38 = vmul.f32 0.5, %v4399_v37 }
0x18eb   : > { %v4401_v39 = vsub.f32 1.5, %v4400_v38 }
0x18ed   : > { %v4402_v40 = vmul.f32 %v6092_v35, %v4401_v39 }
0x18ef   : > { %v4406_v42 = vsel %vm4405_vm15, %v6092_v35, %v4402_v40 }
0x18f0   : > { %v4407_v47 = vmul.f32 %v4406_v42, %v7080_v0  ;;  %v5789_v0 = vld [vmem:[%s7387_s2 + $0x80] sm:$0xff] }
0x18f2   : > { %v4411_v48 = vmul.f32 %v5981_v41, %v4407_v47 }
0x18f4   : > { %v4415_v51 = vadd.f32 %v5982_v46, %v4411_v48 }
0x18f6   : > { %5761 = vmatmul.msk.f32.vlgmr.msrb.gmra.mxu2 %vm1599_vm0, %v4415_v51  ;;  %5762 = vmatmul.msk.f32.vlgmr.msra.gmra.mxu3 %vm1599_vm0, %v4415_v51 }
0x18f7   : > { %5763 = vmatmul.msk.f32.vlgmr.msra.gmra.mxu0 %vm1599_vm0, %v4415_v51  ;;  %5787 = vmatmul.msk.f32.vlgmr.msrb.gmra.mxu1 %vm1599_vm0, %v4415_v51 }
0x18f8   : > { %4639 = vmatpush.msrb.mxu2 %v5780_v52  ;;  %4693 = vmatpush.msra.mxu3 %v5792_v53 }
0x18f9   : > { %4713 = vmatpush.msra.mxu0 %v5796_v54 }
0x18fa   : > { %4640 = vmatpush.msrb.mxu2 %v5779_v56  ;;  %4694 = vmatpush.msra.mxu3 %v5791_v58 }
0x18fb   : > { %4714 = vmatpush.msra.mxu0 %v5795_v59 }
0x18fc   : > { %4641 = vmatpush.msrb.mxu2 %v5778_v60  ;;  %4695 = vmatpush.msra.mxu3 %v5790_v3 }
0x18fd   : > { %4715 = vmatpush.msra.mxu0 %v5794_v62 }
0x18fe   : > { %5764 = vmatmul.msk.f32.vlgmr.msra.gmra.mxu2 %vm1599_vm0, %v4415_v51  ;;  %5785 = vmatmul.msk.f32.vlgmr.msrb.gmra.mxu3 %vm1599_vm0, %v4415_v51 }
0x18ff   : > { %5786 = vmatmul.msk.f32.vlgmr.msrb.gmra.mxu0 %vm1599_vm0, %v4415_v51  ;;  %5811 = vmatmul.msk.f32.vlgmr.msra.gmra.mxu1 %vm1599_vm0, %v4415_v51 }
0x1900   : > { %4642 = vmatpush.msrb.mxu2 %v5777_v63  ;;  %4696 = vmatpush.msra.mxu3 %v5789_v0 }
0x1901   : > { %4716 = vmatpush.msra.mxu0 %v5793_v1 }
0x1902   : > { %4753 = vmatpush.msra.mxu2 %v5804_v4 }
0x1904   : > { %4754 = vmatpush.msra.mxu2 %v5803_v5 }
0x1906   : > { %4755 = vmatpush.msra.mxu2 %v5802_v6  ;;  %5809 = vmatmul.msk.f32.vlgmr.msra.gmra.mxu3 %vm1599_vm0, %v4415_v51 }
0x1907   : > { %5788 = vmatmul.msk.f32.vlgmr.msrb.gmra.mxu2 %vm1599_vm0, %v4415_v51  ;;  %5810 = vmatmul.msk.f32.vlgmr.msra.gmra.mxu0 %vm1599_vm0, %v4415_v51 }
0x1908   : > { %4756 = vmatpush.msra.mxu2 %v5801_v7 }
0x190f   : > { %5812 = vmatmul.msk.f32.vlgmr.msra.gmra.mxu2 %vm1599_vm0, %v4415_v51 }
0x1974   : > { %v4510_v11 = vpop.f32.mrf.mxu0  ;;  %v4624_v43 = vpop.f32.mrf.mxu1 }
0x1975   : > { %v4625_v12 = vadd.f32 %v5984_v8, %v4624_v43  ;;  %v4511_v13 = vadd.f32 %v5983_v10, %v4510_v11 }
0x1977   : > { %5817 = vmatpush.xpose.msk.msrb.mxu1 %vm1976_vm5, %v4625_v12 }
0x1979   : > { %v4470_v14 = vpop.f32.mrf.mxu2  ;;  %v4490_v15 = vpop.f32.mrf.mxu3 }
0x197a   : > { %5818 = vmatmul.msk.f32.vlgmr.msrb.gmra.mxu1 %vm1976_vm5, %v4511_v13  ;;  %v4491_v22 = vadd.f32 %v5986_v18, %v4490_v15  ;;  %v4471_v49 = vadd.f32 %v5985_v23, %v4470_v14  ;;  %v3534_v15 = vsub.f32 %v6922_v25, %v6915_v61 }
0x197c   : > { %v4604_v44 = vpop.f32.mrf.mxu0  ;;  %v4738_v19 = vpop.f32.mrf.mxu1 }
0x197d   : > { %v4605_v20 = vadd.f32 %v5987_v16, %v4604_v44  ;;  %v4739_v45 = vadd.f32 %v5988_v17, %v4738_v19  ;;  %v3535_v17 = vmul.f32 %v3534_v15, %v3534_v15 }
0x197f   : > { %5815 = vmatpush.xpose.msk.msrb.mxu0 %vm1976_vm5, %v4605_v20  ;;  %4977 = vmatpush.msra.mxu1 %v4739_v45  ;;  %v3536_v18 = vsel %vm1599_vm0, %v3535_v17, 0.0  ;;  %v5996_v17 = vld [vmem:[%s7397_s17 + $0x1] ss:$0 sm:$0xff] }
0x1981   : > { %v4530_v24 = vpop.f32.mrf.mxu2  ;;  %v4584_v26 = vpop.f32.mrf.mxu3 }
0x1982   : > { %v4585_v27 = vadd.f32 %v5990_v21, %v4584_v26  ;;  %5816 = vmatmul.msk.f32.vlgmr.msrb.gmra.mxu0 %vm1976_vm5, %v4491_v22  ;;  %v4531_v35 = vadd.f32 %v5989_v32, %v4530_v24 }
0x1984   : > { %v4718_v28 = vpop.f32.mrf.mxu0  ;;  %5813 = vmatpush.xpose.msk.msrb.mxu3 %vm1976_vm5, %v4585_v27 }
0x1985   : > { %v4719_v29 = vadd.f32 %v5991_v9, %v4718_v28 }
0x1987   : > { %4954 = vmatpush.msra.mxu0 %v4719_v29  ;;  %5814 = vmatmul.msk.f32.vlgmr.msrb.gmra.mxu3 %vm1976_vm5, %v4471_v49 }
0x1989   : > { %v4698_v50 = vpop.f32.mrf.mxu3 }
0x198a   : > { %v4644_v33 = vpop.f32.mrf.mxu2  ;;  %v4699_v55 = vadd.f32 %v5993_v31, %v4698_v50  ;;  %v5826_v50 = vld [vmem:[%s7394_s14 + $0x28] sm:$0xff] }
0x198b   : > { %v4645_v34 = vadd.f32 %v5992_v30, %v4644_v33  ;;  %5051 = vmatpush.msrb.mxu0 %v5826_v50 }
0x198c   : > { %4931 = vmatpush.msra.mxu3 %v4699_v55  ;;  %v5827_v55 = vld [vmem:[%s7394_s14 + $0x30] sm:$0xff] }
0x198d   : > { %5819 = vmatpush.xpose.msk.msrb.mxu2 %vm1976_vm5, %v4645_v34  ;;  %v5825_v34 = vld [vmem:[%s7394_s14 + $0x20] sm:$0xff]  ;;  %5074 = vmatpush.msrb.mxu1 %v5827_v55 }
0x198e   : > { %5028 = vmatpush.msrb.mxu3 %v5825_v34 }
0x1990   : > { %5820 = vmatmul.msk.f32.vlgmr.msrb.gmra.mxu2 %vm1976_vm5, %v4531_v35  ;;  %v5828_v35 = vld [vmem:[%s7394_s14 + $0x38] sm:$0xff] }
0x1992   : > { %v4758_v37 = vpop.f32.mrf.mxu2 }
0x1993   : > { %v4759_v38 = vadd.f32 %v5994_v36, %v4758_v37 }
0x1995   : > { %5000 = vmatpush.msra.mxu2 %v4759_v38 }
0x1997   : > { %5097 = vmatpush.msrb.mxu2 %v5828_v35 }
0x19f7   : > { %v4836_v48 = vpop.f32.mrf.mxu1 }
0x19f8   : > { %v4867_v51 = vmul.f32 0.35355338, %v4836_v48 }
0x19fa   : > { %v4875_v56 = vsel %vm1976_vm5, %v4867_v51, -inf }
0x19ff   : > { %v4810_v39 = vpop.f32.mrf.mxu0 }
0x1a00   : > { %v4866_v40 = vmul.f32 0.35355338, %v4810_v39 }
0x1a02   : > { %v4872_v41 = vsel %vm1976_vm5, %v4866_v40, -inf }
0x1a03   : > { %4873 = vmax.xlane.f32.xlu1 %v4872_v41 }
0x1a0a   : > { %v4784_v42 = vpop.f32.mrf.mxu3 }
0x1a0b   : > { %v4865_v46 = vmul.f32 0.35355338, %v4784_v42 }
0x1a0d   : > { %v4869_v47 = vsel %vm1976_vm5, %v4865_v46, -inf }
0x1a0e   : > { %4870 = vmax.xlane.f32.xlu2 %v4869_v47 }
0x1a13   : > { %v4862_v52 = vpop.f32.mrf.mxu2 }
0x1a14   : > { %v4868_v53 = vmul.f32 0.35355338, %v4862_v52 }
0x1a16   : > { %v4878_v54 = vsel %vm1976_vm5, %v4868_v53, -inf  ;;  %4876 = vmax.xlane.f32.xlu2 %v4875_v56 }
0x1a17   : > { %4879 = vmax.xlane.f32.xlu0 %v4878_v54  ;;  %v5995_v54 = vld [vmem:[%s7395_s15 + $0x1] ss:$0 sm:$0xff] }
0x1a76   : > { %v4874_v58 = vpop.xlane.xlu1 %4873 }
0x1a77   : > { %v4882_v59 = vsub.f32 %v4866_v40, %v4874_v58 }
0x1a79   : > { %v4887_v60 = vmul.f32 1.442695, %v4882_v59 }
0x1a7b   : > { %6093 = vpow2.f32 %v4887_v60 }
0x1a81   : > { %v6094_v3 = vpop.eup %6093  ;;  %v4871_v62 = vpop.xlane.xlu2 %4870 }
0x1a82   : > { %v4881_v63 = vsub.f32 %v4865_v46, %v4871_v62  ;;  %v4896_v0 = vsel %vm1976_vm5, %v6094_v3, 0.0 }
0x1a83   : > { %4897 = vadd.xlane.f32.xlu2 %v4896_v0 }
0x1a84   : > { %v4885_v1 = vmul.f32 1.442695, %v4881_v63 }
0x1a86   : > { %6095 = vpow2.f32 %v4885_v1 }
0x1a89   : > { %v4877_v5 = vpop.xlane.xlu2 %4876 }
0x1a8a   : > { %v4880_v4 = vpop.xlane.xlu0 %4879  ;;  %v4883_v7 = vsub.f32 %v4867_v51, %v4877_v5  ;;  %v5839_v5 = vld [vmem:[%s7396_s16 + $0x38] sm:$0xff] }
0x1a8b   : > { %v4884_v6 = vsub.f32 %v4868_v53, %v4880_v4 }
0x1a8c   : > { %v6096_v8 = vpop.eup %6095  ;;  %v4889_v11 = vmul.f32 1.442695, %v4883_v7  ;;  %v5837_v7 = vld [vmem:[%s7396_s16 + $0x28] sm:$0xff] }
0x1a8d   : > { %v4891_v10 = vmul.f32 1.442695, %v4884_v6  ;;  %v4893_v43 = vsel %vm1976_vm5, %v6096_v8, 0.0  ;;  %v5838_v6 = vld [vmem:[%s7396_s16 + $0x30] sm:$0xff] }
0x1a8e   : > { %4894 = vadd.xlane.f32.xlu0 %v4893_v43 }
0x1a8f   : > { %6097 = vpow2.f32 %v4891_v10 }
0x1a90   : > { %6099 = vpow2.f32 %v4889_v11 }
0x1a95   : > { %v6098_v12 = vpop.eup %6097 }
0x1a96   : > { %v6100_v13 = vpop.eup %6099  ;;  %v4902_v14 = vsel %vm1976_vm5, %v6098_v12, 0.0 }
0x1a97   : > { %4903 = vadd.xlane.f32.xlu1 %v4902_v14  ;;  %v4899_v16 = vsel %vm1976_vm5, %v6100_v13, 0.0 }
0x1a98   : > { %4900 = vadd.xlane.f32.xlu0 %v4899_v16 }
0x1aa0   : > { %3537 = vadd.xlane.f32.xlu0 %v3536_v18 }
0x1af6   : > { %v4898_v44 = vpop.xlane.xlu2 %4897 }
0x1af7   : > { %6101 = vrcp.f32 %v4898_v44 }
0x1afd   : > { %v6102_v19 = vpop.eup %6101 }
0x1afe   : > { %v4910_v20 = vmul.f32 %v6102_v19, %v6094_v3 }
0x1b00   : > { %5822 = vmatmul.msk.f32.vlgmr.msra.gmra.mxu0 %vm1976_vm5, %v4910_v20 }
0x1b01   : > { %v4895_v45 = vpop.xlane.xlu0 %4894 }
0x1b02   : > { %6103 = vrcp.f32 %v4895_v45  ;;  %v5849_v45 = vld [vmem:[%s7399_s20 + $0x78] sm:$0xff] }
0x1b03   : > { %5217 = vmatpush.msra.mxu0 %v5849_v45 }
0x1b08   : > { %v6104_v21 = vpop.eup %6103 }
0x1b09   : > { %v4909_v22 = vmul.f32 %v6104_v21, %v6096_v8  ;;  %v5848_v21 = vld [vmem:[%s7399_s20 + $0x70] sm:$0xff] }
0x1b0a   : > { %v4904_v23 = vpop.xlane.xlu1 %4903  ;;  %5218 = vmatpush.msra.mxu0 %v5848_v21 }
0x1b0b   : > { %6105 = vrcp.f32 %v4904_v23  ;;  %v4901_v61 = vpop.xlane.xlu0 %4900  ;;  %5821 = vmatmul.msk.f32.vlgmr.msra.gmra.mxu3 %vm1976_vm5, %v4909_v22  ;;  %v5847_v22 = vld [vmem:[%s7399_s20 + $0x68] sm:$0xff]  ;;  %v5846_v23 = vld [vmem:[%s7399_s20 + $0x60] sm:$0xff] }
0x1b0c   : > { %6107 = vrcp.f32 %v4901_v61  ;;  %5175 = vmatpush.msra.mxu3 %v5839_v5  ;;  %5219 = vmatpush.msra.mxu0 %v5847_v22  ;;  %v5845_v61 = vld [vmem:[%s7399_s20 + $0x58] sm:$0xff]  ;;  %v6000_v5 = vld [vmem:[%s7404_s3] ss:$0 sm:$0xff] }
0x1b0e   : > { %5176 = vmatpush.msra.mxu3 %v5838_v6  ;;  %5220 = vmatpush.msra.mxu0 %v5846_v23 }
0x1b10   : > { %5177 = vmatpush.msra.mxu3 %v5837_v7  ;;  %5221 = vmatpush.msra.mxu0 %v5845_v61 }
0x1b11   : > { %v6106_v25 = vpop.eup %6105 }
0x1b12   : > { %v6108_v24 = vpop.eup %6107  ;;  %v4912_v26 = vmul.f32 %v6106_v25, %v6098_v12  ;;  %v5844_v25 = vld [vmem:[%s7399_s20 + $0x50] sm:$0xff] }
0x1b13   : > { %v4911_v9 = vmul.f32 %v6108_v24, %v6100_v13  ;;  %v3538_v27 = vpop.xlane.xlu0 %3537  ;;  %5222 = vmatpush.msra.mxu0 %v5844_v25  ;;  %v5843_v24 = vld [vmem:[%s7399_s20 + $0x48] sm:$0xff] }
0x1b14   : > { %v3539_v28 = vrot.slane %v3538_v27, 4  ;;  %5824 = vmatmul.msk.f32.vlgmr.msra.gmra.mxu2 %vm1976_vm5, %v4912_v26  ;;  %v5842_v26 = vld [vmem:[%s7399_s20 + $0x40] sm:$0xff] }
0x1b15   : > { %5823 = vmatmul.msk.f32.vlgmr.msra.gmra.mxu1 %vm1976_vm5, %v4911_v9  ;;  %5223 = vmatpush.msra.mxu0 %v5843_v24 }
0x1b16   : > { %v3540_v49 = vadd.f32 %v3539_v28, %v3538_v27  ;;  %v5998_v27 = vld [vmem:[%s7400_s21 + $0x1] ss:$0 sm:$0xff] }
0x1b17   : > { %5224 = vmatpush.msra.mxu0 %v5842_v26 }
0x1b18   : > { %v3541_v29 = vrot.slane %v3540_v49, 2 }
0x1b1a   : > { %v3542_v30 = vadd.f32 %v3541_v29, %v3540_v49 }
0x1b1c   : > { %v3543_v31 = vrot.slane %v3542_v30, 1 }
0x1b1e   : > { %v3544_v32 = vadd.f32 %v3543_v31, %v3542_v30 }
0x1b20   : > { %5857 = vpush %v3544_v32 }
0x1b51   : > { %s5858_s2 = spop %5857 }
0x1b52   : > { %v3546_v33 = vstv %s5858_s2  ;;  %s7402_s2 = sld [smem:[#allocation41_spill]] }
0x1b53   : > { %3548 = vst.msk [vmem:[%s1504_s1] sm:$0x1] %vm3547_vm1, %v3546_v33  ;;  %s7403_s1 = sld [smem:[#allocation43_spill]] }
0x1b58   : > { %v5233_v9 = vld [vmem:[%s7402_s2 + $0x18] sm:$0xff] }
0x1b59   : > { %5253 = vmatpush.msra.mxu1 %v5233_v9  ;;  %s7231_s5 = scalar_lea.vmem %s7403_s1, %s5856_s4  ;;  %s7406_s4 = sld [smem:[#allocation44_spill]] }
0x1b5a   : > { %s1477_s1 = scalar_lea.vmem %s7405_s0, %s6461_s11 }
0x1b7d   : > { %v4956_v36 = vpop.f32.mrf.mxu0 }
0x1b7e   : > { %5830 = vmatmul.msk.f32.vlgmr.msrb.gmra.mxu0 %vm1976_vm5, %v4956_v36  ;;  %v5232_v36 = vld [vmem:[%s7402_s2 + $0x10] sm:$0xff] }
0x1b7f   : > { %5254 = vmatpush.msra.mxu1 %v5232_v36 }
0x1b8e   : > { %v4933_v37 = vpop.f32.mrf.mxu3 }
0x1b8f   : > { %5829 = vmatmul.msk.f32.vlgmr.msrb.gmra.mxu3 %vm1976_vm5, %v4933_v37  ;;  %v5231_v37 = vld [vmem:[%s7402_s2 + $0x8] sm:$0xff] }
0x1b90   : > { %5255 = vmatpush.msra.mxu1 %v5231_v37 }
0x1b92   : > { %v4979_v38 = vpop.f32.mrf.mxu1 }
0x1b93   : > { %5831 = vmatmul.msk.f32.vlgmr.msrb.gmra.mxu1 %vm1976_vm5, %v4979_v38  ;;  %v5230_v38 = vld [vmem:[%s7402_s2] sm:$0xff]  ;;  %s7407_s2 = sshll.u32 %s6461_s11, 3 }
0x1b94   : > { %5256 = vmatpush.msra.mxu1 %v5230_v38  ;;  %s1495_s8 = scalar_lea.vmem %s6421_s13, %s7407_s2  ;;  %s1501_s2 = scalar_lea.vmem %s6432_s6, %s6461_s11 }
0x1b97   : > { %v5002_v39 = vpop.f32.mrf.mxu2 }
0x1b98   : > { %5832 = vmatmul.msk.f32.vlgmr.msrb.gmra.mxu2 %vm1976_vm5, %v5002_v39  ;;  %v5276_v39 = vld [vmem:[%s7231_s5 + $0x78] sm:$0xff] }
0x1b99   : > { %5281 = vmatpush.msra.mxu2 %v5276_v39 }
0x1bfb   : > { %v5053_v40 = vpop.f32.mrf.mxu0 }
0x1bfc   : > { %v5103_v46 = vsel %vm1599_vm0, %v5053_v40, 0.0  ;;  %v5275_v40 = vld [vmem:[%s7231_s5 + $0x70] sm:$0xff] }
0x1bfd   : > { %5282 = vmatpush.msra.mxu2 %v5275_v40 }
0x1c10   : > { %v5076_v47 = vpop.f32.mrf.mxu1 }
0x1c11   : > { %v5105_v51 = vsel %vm1599_vm0, %v5076_v47, 0.0  ;;  %v5271_v47 = vld [vmem:[%s7231_s5 + $0x50] sm:$0xff] }
0x1c12   : > { %v5030_v41 = vpop.f32.mrf.mxu3 }
0x1c13   : > { %v5102_v42 = vsel %vm1599_vm0, %v5030_v41, 0.0  ;;  %v5274_v41 = vld [vmem:[%s7231_s5 + $0x68] sm:$0xff] }
0x1c14   : > { %v5104_v48 = vadd.f32 %v5103_v46, %v5102_v42  ;;  %v5273_v42 = vld [vmem:[%s7231_s5 + $0x60] sm:$0xff]  ;;  %5283 = vmatpush.msra.mxu2 %v5274_v41  ;;  %v5272_v46 = vld [vmem:[%s7231_s5 + $0x58] sm:$0xff] }
0x1c16   : > { %v5106_v53 = vadd.f32 %v5105_v51, %v5104_v48  ;;  %5284 = vmatpush.msra.mxu2 %v5273_v42  ;;  %v5270_v48 = vld [vmem:[%s7231_s5 + $0x48] sm:$0xff]  ;;  %v5269_v51 = vld [vmem:[%s7231_s5 + $0x40] sm:$0xff] }
0x1c18   : > { %5285 = vmatpush.msra.mxu2 %v5272_v46 }
0x1c1a   : > { %5286 = vmatpush.msra.mxu2 %v5271_v47 }
0x1c1b   : > { %v5099_v52 = vpop.f32.mrf.mxu2 }
0x1c1c   : > { %v5107_v56 = vsel %vm1599_vm0, %v5099_v52, 0.0  ;;  %5287 = vmatpush.msra.mxu2 %v5270_v48  ;;  %v5268_v52 = vld [vmem:[%s7231_s5 + $0x38] sm:$0xff] }
0x1c1d   : > { %v5108_v58 = vadd.f32 %v5107_v56, %v5106_v53  ;;  %v5267_v53 = vld [vmem:[%s7231_s5 + $0x30] sm:$0xff]  ;;  %v5265_v56 = vld [vmem:[%s7231_s5 + $0x20] sm:$0xff] }
0x1c1e   : > { %5288 = vmatpush.msra.mxu2 %v5269_v51 }
0x1c1f   : > { %v5114_v59 = vadd.f32 %v5995_v54, %v5108_v58  ;;  %v5266_v54 = vld [vmem:[%s7231_s5 + $0x28] sm:$0xff]  ;;  %v5264_v58 = vld [vmem:[%s7231_s5 + $0x18] sm:$0xff] }
0x1c20   : > { %5289 = vmatpush.msra.mxu2 %v5268_v52 }
0x1c21   : > { %v7201_v60 = vadd.f32 %v5114_v59, %v7074_v2  ;;  %v5836_v2 = vld [vmem:[%s7396_s16 + $0x20] sm:$0xff] }
0x1c22   : > { %5178 = vmatpush.msra.mxu3 %v5836_v2  ;;  %5290 = vmatpush.msra.mxu2 %v5267_v53  ;;  %v5999_v59 = vld [vmem:[%s7401_s22 + $0x1] ss:$0 sm:$0xff]  ;;  %v5302_v2 = vld [vmem:[%s1477_s1] sm:$0x1] }
0x1c23   : > { %v5120_v3 = vsel %vm1599_vm0, %v7201_v60, 0.0 }
0x1c24   : > { %5121 = vadd.xlane.f32.xlu1 %v5120_v3  ;;  %5291 = vmatpush.msra.mxu2 %v5266_v54  ;;  %v5263_v3 = vld [vmem:[%s7231_s5 + $0x10] sm:$0xff] }
0x1c26   : > { %5292 = vmatpush.msra.mxu2 %v5265_v56 }
0x1c28   : > { %5293 = vmatpush.msra.mxu2 %v5264_v58 }
0x1c2a   : > { %5294 = vmatpush.msra.mxu2 %v5263_v3 }
0x1c97   : > { %v5122_v62 = vpop.xlane.xlu1 %5121 }
0x1c98   : > { %v5123_v63 = vmul.f32 %v5122_v62, %v6505_v57 }
0x1c9a   : > { %v5124_v0 = vsub.f32 %v7201_v60, %v5123_v63 }
0x1c9c   : > { %v5125_v1 = vmul.f32 %v5124_v0, %v5124_v0 }
0x1c9e   : > { %v5126_v4 = vsel %vm1599_vm0, %v5125_v1, 0.0  ;;  %v5262_v1 = vld [vmem:[%s7231_s5 + $0x8] sm:$0xff] }
0x1c9f   : > { %5127 = vadd.xlane.f32.xlu2 %v5126_v4  ;;  %5295 = vmatpush.msra.mxu2 %v5262_v1  ;;  %v5261_v4 = vld [vmem:[%s7231_s5] sm:$0xff] }
0x1ca1   : > { %5296 = vmatpush.msra.mxu2 %v5261_v4 }
0x1d12   : > { %v5128_v8 = vpop.xlane.xlu2 %5127 }
0x1d13   : > { %v5129_v10 = vmul.f32 %v5128_v8, %v6505_v57  ;;  %v5997_v57 = vld [vmem:[%s7398_s19 + $0x1] ss:$0 sm:$0xff] }
0x1d15   : > { %v5130_v11 = vadd.f32 1e-05, %v5129_v10  ;;  %v6001_v10 = vld [vmem:[%s7406_s4] ss:$0 sm:$0xff] }
0x1d17   : > { %6109 = vrsqrt.f32 %v5130_v11  ;;  %vm5137_vm2 = vweird.f32 %v5130_v11 }
0x1d1d   : > { %v6110_v43 = vpop.eup %6109 }
0x1d1e   : > { %v5132_v12 = vmul.f32 %v6110_v43, %v5130_v11  ;;  %vm5138_vm5 = vweird.f32 %v6110_v43 }
0x1d1f   : > { %vm5139_vm3 = vmor %vm5137_vm2, %vm5138_vm5 }
0x1d20   : > { %v5133_v13 = vmul.f32 %v6110_v43, %v5132_v12 }
0x1d22   : > { %v5134_v14 = vmul.f32 0.5, %v5133_v13  ;;  %v6002_v13 = vld [vmem:[%s1477_s1] ss:$0 sm:$0xff] }
0x1d24   : > { %v5135_v15 = vsub.f32 1.5, %v5134_v14 }
0x1d26   : > { %v5136_v16 = vmul.f32 %v6110_v43, %v5135_v15 }
0x1d28   : > { %v5140_v18 = vsel %vm5139_vm3, %v6110_v43, %v5136_v16  ;;  %v6114_v43 = vld [vmem:[%s6490_s18] sm:$0xff]  ;;  %s1498_s18 = scalar_lea.vmem %s6426_s23, %s6461_s11 }
0x1d29   : > { %v5141_v44 = vmul.f32 %v5140_v18, %v5124_v0 }
0x1d2b   : > { %v5145_v19 = vmul.f32 %v5996_v17, %v5141_v44 }
0x1d2d   : > { %v5149_v20 = vadd.f32 %v5997_v57, %v5145_v19 }
0x1d2f   : > { %5841 = vmatmul.msk.f32.vlgmr.msra.gmra.mxu3 %vm1599_vm0, %v5149_v20 }
0x1db2   : > { %v5180_v28 = vpop.f32.mrf.mxu3 }
0x1db3   : > { %v5181_v49 = vadd.f32 %v5998_v27, %v5180_v28 }
0x1db5   : > { %v5183_v29 = vmul.f32 %v5181_v49, %v5181_v49 }
0x1db7   : > { %v5184_v30 = vmul.f32 %v5183_v29, %v5181_v49 }
0x1db9   : > { %v5185_v31 = vmul.f32 0.044715, %v5184_v30 }
0x1dbb   : > { %v5186_v32 = vadd.f32 %v5185_v31, %v5181_v49 }
0x1dbd   : > { %v5187_v33 = vmul.f32 0.7978846, %v5186_v32 }
0x1dbf   : > { %6111 = vtanh.f32 %v5187_v33 }
0x1dc5   : > { %v6112_v50 = vpop.eup %6111 }
0x1dc6   : > { %v5189_v34 = vadd.f32 1.0, %v6112_v50 }
0x1dc8   : > { %v5190_v55 = vmul.f32 0.5, %v5189_v34 }
0x1dca   : > { %v5191_v35 = vmul.f32 %v5190_v55, %v5181_v49 }
0x1dcc   : > { %5851 = vmatmul.msk.f32.vlgmr.msra.gmra.mxu0 %vm2414_vm9, %v5191_v35  ;;  %vm5321_vm9 = vcmask 1040384  }
0x1dcd   : > { %v5322_v8 = vsel %vm5321_vm9, %v5302_v2, 0.0 }
0x1dce   : > { %5323 = vadd.xlane.f32.xlu2 %v5322_v8 }
0x1e41   : > { %v5324_v16 = vpop.xlane.xlu2 %5323 }
0x1e42   : > { %v5325_v17 = vrot.slane %v5324_v16, 4 }
0x1e44   : > { %v5326_v18 = vadd.f32 %v5325_v17, %v5324_v16 }
0x1e46   : > { %v5327_v57 = vrot.slane %v5326_v18, 2 }
0x1e48   : > { %v5328_v45 = vadd.f32 %v5327_v57, %v5326_v18 }
0x1e49   : > { %v5226_v62 = vpop.f32.mrf.mxu0 }
0x1e4a   : > { %v5227_v63 = vadd.f32 %v5999_v59, %v5226_v62  ;;  %v5329_v23 = vrot.slane %v5328_v45, 1 }
0x1e4c   : > { %v5229_v0 = vadd.f32 %v5227_v63, %v7201_v60  ;;  %v5330_v24 = vadd.f32 %v5329_v23, %v5328_v45 }
0x1e4e   : > { %5852 = vmatmul.msk.f32.vlgmr.msra.gmra.mxu1 %vm1599_vm0, %v5229_v0 }
0x1ecb   : > { %v5258_v6 = vpop.f32.mrf.mxu1 }
0x1ecc   : > { %v5259_v7 = vadd.f32 %v6000_v5, %v5258_v6 }
0x1ece   : > { %5297 = vmatmul.f32.vlgmr.msra.gmra.mxu2 %v5259_v7 }
0x1f51   : > { %v5298_v60 = vpop.f32.mrf.mxu2 }
0x1f52   : > { %v5299_v11 = vadd.f32 %v6001_v10, %v5298_v60 }
0x1f54   : > { %5301 = vst [vmem:[%s1495_s8] sm:$0xff] %v5299_v11  ;;  %v5303_v12 = vsub.f32 %v6114_v43, %v5299_v11 }
0x1f56   : > { %v5304_v14 = vmul.f32 %v5303_v12, %v5303_v12 }
0x1f58   : > { %v5308_v15 = vmul.f32 %v6002_v13, %v5304_v14 }
0x1f5a   : > { %5309 = vadd.xlane.f32.xlu1 %v5308_v15 }
0x1fcd   : > { %v5310_v44 = vpop.xlane.xlu1 %5309 }
0x1fce   : > { %v5311_v19 = vrot.slane %v5310_v44, 4 }
0x1fd0   : > { %v5312_v20 = vadd.f32 %v5311_v19, %v5310_v44 }
0x1fd2   : > { %v5313_v21 = vrot.slane %v5312_v20, 2 }
0x1fd4   : > { %v5314_v22 = vadd.f32 %v5313_v21, %v5312_v20 }
0x1fd6   : > { %v5315_v61 = vrot.slane %v5314_v22, 1 }
0x1fd8   : > { %v5316_v25 = vadd.f32 %v5315_v61, %v5314_v22 }
0x1fda   : > { %5859 = vpush %v5316_v25 }
0x1fdb   : > { %5861 = vpush %v5330_v24 }
0x200b   : > { %s5860_s8 = spop %5859 }
0x200c   : > { %v5318_v26 = vstv %s5860_s8  ;;  %s5862_s5 = spop %5861 }
0x200d   : > { %v5319_v9 = vmul.f32 0.015625, %v5318_v26  ;;  %v5332_v27 = vstv %s5862_s5 }
0x200e   : > { %v5333_v28 = vmul.f32 0.125, %v5332_v27 }
0x200f   : > { %5320 = vst.msk [vmem:[%s1498_s18] sm:$0x1] %vm3547_vm1, %v5319_v9 }
0x2010   : > { %5334 = vst.msk [vmem:[%s1501_s2] sm:$0x1] %vm3547_vm1, %v5333_v28 }
0x2011 PF: > { %s116_s7 = sadd.s32 1, %s6135_s7  }
0x2012   : > { %p113_p11 = scmp.ge.s32.totalorder %s116_s7, 4  }
0x2014   :  { %115 = sbr.rel (!%p113_p11) target bundleno = 108 (0x6c), region = 351 }

</bundles_post_ra>
